<compile_context>
chip_gen: v7x
topology: tpu7x:2x2x1
jax: 0.10.0
libtpu: 0.0.40
codegen_flags: <defaults>
</compile_context>

<pallas_src>
import jax
import jax.numpy as jnp
from jax import lax
from jax.experimental import pallas as pl
from jax.experimental.pallas import tpu as pltpu


def _round_up(v, m):
    return ((v + m - 1) // m) * m


def _pick_channel_tile(C, S, itemsize, max_bytes=8 * 1024 * 1024):
    """Largest multiple-of-8 divisor of C whose (TC, S) block fits the budget."""
    if C % 8 != 0:
        # No multiple-of-8 tiling possible; use a single block and let the
        # kernel handle the <8-row remainder explicitly.
        return C
    best = 8
    tc = 8
    while tc <= C:
        if C % tc == 0 and tc * S * itemsize <= max_bytes:
            best = tc
        tc += 8
    return best


def _make_kernel(C, TC, S, W, K, PAD, MARGIN, out_dtype):
    KK = K * K
    n_full = TC // 8
    rem = TC - 8 * n_full

    # Rows combined in registers before a single accumulator read-modify-write.
    vregs_per_chunk = max(1, -(-S // 128))
    UN = 1
    for cand in (4, 2):
        if n_full >= cand and n_full % cand == 0 and cand * vregs_per_chunk <= 16:
            UN = cand
            break
    n_steps = n_full // UN if n_full else 0
    rows_per_step = 8 * UN

    def kernel(x_ref, w_ref, col_ref, o_ref, sum_acc, max_acc, fpad):
        cb = pl.program_id(1)

        # ---- init running accumulators at the first channel tile ------------
        @pl.when(cb == 0)
        def _init():
            sum_acc[...] = jnp.zeros(sum_acc.shape, sum_acc.dtype)
            max_acc[...] = jnp.full(max_acc.shape, -jnp.inf, max_acc.dtype)

        # ---- fused single-pass streaming sum + max over this channel tile ---
        if n_steps > 0:
            def body(j, carry):
                parts = []
                for u in range(UN):
                    base = pl.multiple_of(j * rows_per_step + u * 8, 8)
                    parts.append(
                        x_ref[pl.ds(base, 8), :].astype(jnp.float32))  # (8, S)
                psum = parts[0]
                pmax = parts[0]
                for p in parts[1:]:
                    psum = psum + p
                    pmax = jnp.maximum(pmax, p)
                sum_acc[...] = sum_acc[...] + psum
                max_acc[...] = jnp.maximum(max_acc[...], pmax)
                return carry

            lax.fori_loop(0, n_steps, body, 0,
                          unroll=True if n_steps <= 8 else 4)

        if rem > 0:
            tail = x_ref[8 * n_full:, :].astype(jnp.float32)          # (rem, S)
            sum_acc[0:1, :] = sum_acc[0:1, :] + jnp.sum(tail, axis=0,
                                                        keepdims=True)
            max_acc[0:1, :] = jnp.maximum(max_acc[0:1, :],
                                          jnp.max(tail, axis=0, keepdims=True))

        # ---- finalize: 2 x K x K conv + sigmoid, all in flat layout ---------
        @pl.when(cb == pl.num_programs(1) - 1)
        def _finalize():
            mean_flat = jnp.sum(sum_acc[...], axis=0) * (1.0 / C)      # (S,)
            max_flat = jnp.max(max_acc[...], axis=0)                   # (S,)

            # Zero-margined feature rows: the margins implement vertical SAME
            # padding (out-of-range rows land in the zero margin), so only a
            # per-column mask is needed.  The buffer is tiny, clearing it each
            # finalize is negligible.
            fpad[...] = jnp.zeros(fpad.shape, fpad.dtype)
            fpad[0, MARGIN:MARGIN + S] = mean_flat
            fpad[1, MARGIN:MARGIN + S] = max_flat

            col = col_ref[0, :]                                        # (S,) i32
            acc = jnp.zeros((S,), jnp.float32)
            for kw in range(K):
                dc = kw - PAD
                ok = (col + dc >= 0) & (col + dc < W)   # hoisted per column tap
                for c in range(2):
                    for kh in range(K):
                        d = (kh - PAD) * W + dc
                        wv = w_ref[c * KK + kh * K + kw]
                        win = fpad[c, MARGIN + d:MARGIN + d + S]       # (S,)
                        acc = acc + wv * jnp.where(ok, win, 0.0)

            o_ref[0, :] = jax.nn.sigmoid(acc).astype(out_dtype)

    return kernel


def spatial_attention(x, w, kernel_size=7, channel_tile=None,
                      block_budget_bytes=8 * 1024 * 1024):
    """SpatialAttention forward.  x: (N, C, H, W); w: (1, 2, K, K) conv weight."""
    N, C, H, W = x.shape
    K = kernel_size
    assert K in (3, 7), "kernel size must be 3 or 7"
    PAD = K // 2
    assert w.shape == (1, 2, K, K)

    S = H * W
    x_flat = x.reshape(N, C, S)                     # lane-dense view (free)
    w_flat = w.reshape(-1).astype(jnp.float32)      # (2*K*K,) scalar weights
    col_idx = (jnp.arange(S, dtype=jnp.int32) % W).reshape(1, S)

    itemsize = jnp.dtype(x.dtype).itemsize
    if channel_tile is None:
        TC = _pick_channel_tile(C, S, itemsize, block_budget_bytes)
    else:
        TC = channel_tile
        assert C % TC == 0 and (TC % 8 == 0 or TC == C)
    n_cb = C // TC

    MARGIN = _round_up(PAD * W + PAD, 128)          # lane-aligned interior store
    SP = S + 2 * MARGIN

    kernel = _make_kernel(C, TC, S, W, K, PAD, MARGIN, x.dtype)

    out_flat = pl.pallas_call(
        kernel,
        out_shape=jax.ShapeDtypeStruct((N, 1, S), x.dtype),
        grid=(N, n_cb),
        in_specs=[
            pl.BlockSpec((pl.Squeezed(), TC, S), lambda n, cb: (n, cb, 0)),
            pl.BlockSpec(memory_space=pltpu.MemorySpace.SMEM),    # conv weights
            pl.BlockSpec((1, S), lambda n, cb: (0, 0)),           # column index
        ],
        out_specs=pl.BlockSpec((pl.Squeezed(), 1, S), lambda n, cb: (n, 0, 0)),
        scratch_shapes=[
            pltpu.VMEM((8, S), jnp.float32),        # running channel-sum partials
            pltpu.VMEM((8, S), jnp.float32),        # running channel-max partials
            pltpu.VMEM((2, SP), jnp.float32),       # zero-margined feature rows
        ],
        compiler_params=pltpu.CompilerParams(
            dimension_semantics=("parallel", "arbitrary"),
            vmem_limit_bytes=40 * 1024 * 1024,
        ),
    )(x_flat, w_flat, col_idx)

    return out_flat.reshape(N, 1, H, W)


def reference(x, w, kernel_size=7):
    """Pure-JAX reference mirroring the PyTorch SpatialAttention module."""
    PAD = kernel_size // 2
    avg_out = jnp.mean(x, axis=1, keepdims=True)
    max_out = jnp.max(x, axis=1, keepdims=True)
    feat = jnp.concatenate([avg_out, max_out], axis=1)          # (N, 2, H, W)
    out = lax.conv_general_dilated(
        feat, w.astype(feat.dtype), window_strides=(1, 1),
        padding=((PAD, PAD), (PAD, PAD)),
        dimension_numbers=("NCHW", "OIHW", "NCHW"))
    return jax.nn.sigmoid(out)


if __name__ == "__main__":
    N, C, H, W = 2, 64, 16, 16
    K = 7

    key = jax.random.PRNGKey(0)
    kx, kw_ = jax.random.split(key)
    x = jax.random.normal(kx, (N, C, H, W), dtype=jnp.float32)
    # Conv2d(2, 1, 7, padding=3, bias=False) weight: (out=1, in=2, 7, 7)
    w = jax.random.normal(kw_, (1, 2, K, K), dtype=jnp.float32) * 0.1

    ref = reference(x, w, kernel_size=K)

    # 1) multi-tile channel accumulation (4 grid steps along the channel axis)
    out1 = jax.block_until_ready(spatial_attention(x, w, kernel_size=K,
                                                   channel_tile=16))
    assert out1.shape == (N, 1, H, W)
    assert jnp.allclose(out1, ref, atol=1e-5, rtol=1e-5), "mismatch (tiled)"

    # 2) auto tile (single block, in-register 4-chunk combine path)
    out2 = jax.block_until_ready(spatial_attention(x, w, kernel_size=K))
    assert jnp.allclose(out2, ref, atol=1e-5, rtol=1e-5), "mismatch (auto tile)"

    # 3) channel count not divisible by 8: exercises the remainder path
    x3 = x[:, :12]
    ref3 = reference(x3, w, kernel_size=K)
    out3 = jax.block_until_ready(spatial_attention(x3, w, kernel_size=K))
    assert jnp.allclose(out3, ref3, atol=1e-5, rtol=1e-5), "mismatch (C=12)"

    print("KERNEL_OK")
</pallas_src>

<mosaic_0001>
module attributes {stable_mosaic.version = 11 : i64} {
  func.func @kernel(%arg0: i32, %arg1: i32, %arg2: memref<1x16x256xf32, #tpu.memory_space<vmem>>, %arg3: memref<98xf32, #tpu.memory_space<smem>>, %arg4: memref<1x256xi32, #tpu.memory_space<vmem>>, %arg5: memref<1x1x256xf32, #tpu.memory_space<vmem>>, %arg6: memref<8x256xf32, #tpu.memory_space<vmem>>, %arg7: memref<8x256xf32, #tpu.memory_space<vmem>>, %arg8: memref<2x512xf32, #tpu.memory_space<vmem>>) attributes {dimension_semantics = [#tpu.dimension_semantics<parallel>, #tpu.dimension_semantics<arbitrary>], iteration_bounds = array<i64: 2, 4>, scalar_prefetch = 0 : i64, scratch_operands = 3 : i64, tpu.core_type = #tpu.core_type<tc>, window_params = [{transform_indices = @transform_0, window_bounds = array<i64: 1, 16, 256>}, {transform_indices = @transform_1, window_bounds = array<i64: 98>}, {pipeline_mode = #tpu.pipeline_mode<synchronous>, transform_indices = @transform_2, window_bounds = array<i64: 1, 256>}, {transform_indices = @transform_3, window_bounds = array<i64: 1, 1, 256>}]} {
    %c0_i32 = arith.constant 0 : i32
    %0 = arith.cmpi eq, %arg1, %c0_i32 : i32
    %1 = arith.extui %0 : i1 to i32
    %c0_i32_0 = arith.constant 0 : i32
    %2 = arith.cmpi ne, %1, %c0_i32_0 : i32
    scf.if %2 {
      %cst = arith.constant 0.000000e+00 : f32
      %26 = vector.broadcast %cst : f32 to vector<8x256xf32>
      %c0_16 = arith.constant 0 : index
      %c0_17 = arith.constant 0 : index
      %27 = vector.load %arg6[%c0_16, %c0_17] : memref<8x256xf32, #tpu.memory_space<vmem>>, vector<8x256xf32>
      tpu.vector_store %arg6[%c0_16, %c0_17], %26 {strides = array<i32>} : memref<8x256xf32, #tpu.memory_space<vmem>>, vector<8x256xf32>,
      %cst_18 = arith.constant 0xFF800000 : f32
      %28 = vector.broadcast %cst_18 : f32 to vector<8x256xf32>
      %c0_19 = arith.constant 0 : index
      %c0_20 = arith.constant 0 : index
      %29 = vector.load %arg7[%c0_19, %c0_20] : memref<8x256xf32, #tpu.memory_space<vmem>>, vector<8x256xf32>
      tpu.vector_store %arg7[%c0_19, %c0_20], %28 {strides = array<i32>} : memref<8x256xf32, #tpu.memory_space<vmem>>, vector<8x256xf32>,
    } else {
    }
    %c0_i32_1 = arith.constant 0 : i32
    %c16_i32 = arith.constant 16 : i32
    %3 = arith.muli %c0_i32_1, %c16_i32 : i32
    %c0_i32_2 = arith.constant 0 : i32
    %4 = arith.addi %3, %c0_i32_2 : i32
    %5 = tpu.assume_multiple %4, 8 : i32
    %c0 = arith.constant 0 : index
    %6 = arith.index_cast %5 : i32 to index
    %c0_3 = arith.constant 0 : index
    %7 = vector.load %arg2[%c0, %6, %c0_3] : memref<1x16x256xf32, #tpu.memory_space<vmem>>, vector<1x8x256xf32>
    %8 = vector.shape_cast %7 : vector<1x8x256xf32> to vector<8x256xf32>
    %c16_i32_4 = arith.constant 16 : i32
    %9 = arith.muli %c0_i32_1, %c16_i32_4 : i32
    %c8_i32 = arith.constant 8 : i32
    %10 = arith.addi %9, %c8_i32 : i32
    %11 = tpu.assume_multiple %10, 8 : i32
    %c0_5 = arith.constant 0 : index
    %12 = arith.index_cast %11 : i32 to index
    %c0_6 = arith.constant 0 : index
    %13 = vector.load %arg2[%c0_5, %12, %c0_6] : memref<1x16x256xf32, #tpu.memory_space<vmem>>, vector<1x8x256xf32>
    %14 = vector.shape_cast %13 : vector<1x8x256xf32> to vector<8x256xf32>
    %15 = arith.addf %8, %14 : vector<8x256xf32>
    %16 = arith.maximumf %8, %14 : vector<8x256xf32>
    %c0_7 = arith.constant 0 : index
    %c0_8 = arith.constant 0 : index
    %17 = vector.load %arg6[%c0_7, %c0_8] : memref<8x256xf32, #tpu.memory_space<vmem>>, vector<8x256xf32>
    %18 = arith.addf %17, %15 : vector<8x256xf32>
    %c0_9 = arith.constant 0 : index
    %c0_10 = arith.constant 0 : index
    %19 = vector.load %arg6[%c0_9, %c0_10] : memref<8x256xf32, #tpu.memory_space<vmem>>, vector<8x256xf32>
    tpu.vector_store %arg6[%c0_9, %c0_10], %18 {strides = array<i32>} : memref<8x256xf32, #tpu.memory_space<vmem>>, vector<8x256xf32>,
    %c0_11 = arith.constant 0 : index
    %c0_12 = arith.constant 0 : index
    %20 = vector.load %arg7[%c0_11, %c0_12] : memref<8x256xf32, #tpu.memory_space<vmem>>, vector<8x256xf32>
    %21 = arith.maximumf %20, %16 : vector<8x256xf32>
    %c0_13 = arith.constant 0 : index
    %c0_14 = arith.constant 0 : index
    %22 = vector.load %arg7[%c0_13, %c0_14] : memref<8x256xf32, #tpu.memory_space<vmem>>, vector<8x256xf32>
    tpu.vector_store %arg7[%c0_13, %c0_14], %21 {strides = array<i32>} : memref<8x256xf32, #tpu.memory_space<vmem>>, vector<8x256xf32>,
    %c1_i32 = arith.constant 1 : i32
    %c3_i32 = arith.constant 3 : i32
    %23 = arith.cmpi eq, %arg1, %c3_i32 : i32
    %24 = arith.extui %23 : i1 to i32
    %c0_i32_15 = arith.constant 0 : i32
    %25 = arith.cmpi ne, %24, %c0_i32_15 : i32
    scf.if %25 {
      %c0_16 = arith.constant 0 : index
      %c0_17 = arith.constant 0 : index
      %26 = vector.load %arg6[%c0_16, %c0_17] : memref<8x256xf32, #tpu.memory_space<vmem>>, vector<8x256xf32>
      %cst = arith.constant dense<0.000000e+00> : vector<256xf32>
      %27 = vector.multi_reduction <add>, %26, %cst [0] : vector<8x256xf32> to vector<256xf32>
      %cst_18 = arith.constant 1.562500e-02 : f32
      %28 = vector.broadcast %cst_18 : f32 to vector<256xf32>
      %29 = arith.mulf %27, %28 : vector<256xf32>
      %c0_19 = arith.constant 0 : index
      %c0_20 = arith.constant 0 : index
      %30 = vector.load %arg7[%c0_19, %c0_20] : memref<8x256xf32, #tpu.memory_space<vmem>>, vector<8x256xf32>
      %cst_21 = arith.constant dense<0xFF800000> : vector<256xf32>
      %31 = vector.multi_reduction <maximumf>, %30, %cst_21 [0] : vector<8x256xf32> to vector<256xf32>
      %cst_22 = arith.constant 0.000000e+00 : f32
      %32 = vector.broadcast %cst_22 : f32 to vector<2x512xf32>
      %c0_23 = arith.constant 0 : index
      %c0_24 = arith.constant 0 : index
      %33 = vector.load %arg8[%c0_23, %c0_24] : memref<2x512xf32, #tpu.memory_space<vmem>>, vector<2x512xf32>
      tpu.vector_store %arg8[%c0_23, %c0_24], %32 {strides = array<i32>} : memref<2x512xf32, #tpu.memory_space<vmem>>, vector<2x512xf32>,
      %c0_25 = arith.constant 0 : index
      %c128 = arith.constant 128 : index
      %34 = vector.load %arg8[%c0_25, %c128] : memref<2x512xf32, #tpu.memory_space<vmem>>, vector<1x256xf32>
      %35 = vector.shape_cast %34 : vector<1x256xf32> to vector<256xf32>
      %36 = vector.shape_cast %29 : vector<256xf32> to vector<1x256xf32>
      tpu.vector_store %arg8[%c0_25, %c128], %36 {strides = array<i32>} : memref<2x512xf32, #tpu.memory_space<vmem>>, vector<1x256xf32>,
      %c1 = arith.constant 1 : index
      %c128_26 = arith.constant 128 : index
      %37 = vector.load %arg8[%c1, %c128_26] : memref<2x512xf32, #tpu.memory_space<vmem>>, vector<1x256xf32>
      %38 = vector.shape_cast %37 : vector<1x256xf32> to vector<256xf32>
      %39 = vector.shape_cast %31 : vector<256xf32> to vector<1x256xf32>
      tpu.vector_store %arg8[%c1, %c128_26], %39 {strides = array<i32>} : memref<2x512xf32, #tpu.memory_space<vmem>>, vector<1x256xf32>,
      %c0_27 = arith.constant 0 : index
      %c0_28 = arith.constant 0 : index
      %40 = vector.load %arg4[%c0_27, %c0_28] : memref<1x256xi32, #tpu.memory_space<vmem>>, vector<1x256xi32>
      %41 = vector.shape_cast %40 : vector<1x256xi32> to vector<256xi32>
      %cst_29 = arith.constant 0.000000e+00 : f32
      %42 = vector.broadcast %cst_29 : f32 to vector<256xf32>
      %c-3_i32 = arith.constant -3 : i32
      %43 = vector.broadcast %c-3_i32 : i32 to vector<256xi32>
      %44 = arith.addi %41, %43 : vector<256xi32>
      %c0_i32_30 = arith.constant 0 : i32
      %45 = vector.broadcast %c0_i32_30 : i32 to vector<256xi32>
      %46 = arith.cmpi sge, %44, %45 : vector<256xi32>
      %c-3_i32_31 = arith.constant -3 : i32
      %47 = vector.broadcast %c-3_i32_31 : i32 to vector<256xi32>
      %48 = arith.addi %41, %47 : vector<256xi32>
      %c16_i32_32 = arith.constant 16 : i32
      %49 = vector.broadcast %c16_i32_32 : i32 to vector<256xi32>
      %50 = arith.cmpi slt, %48, %49 : vector<256xi32>
      %51 = arith.andi %46, %50 : vector<256xi1>
      %c0_33 = arith.constant 0 : index
      %52 = memref.load %arg3[%c0_33] : memref<98xf32, #tpu.memory_space<smem>>
      %c0_34 = arith.constant 0 : index
      %c77 = arith.constant 77 : index
      %53 = vector.load %arg8[%c0_34, %c77] : memref<2x512xf32, #tpu.memory_space<vmem>>, vector<1x256xf32>
      %54 = vector.shape_cast %53 : vector<1x256xf32> to vector<256xf32>
      %cst_35 = arith.constant 0.000000e+00 : f32
      %55 = vector.broadcast %cst_35 : f32 to vector<256xf32>
      %56 = arith.select %51, %54, %55 : vector<256xi1>, vector<256xf32>
      %57 = vector.broadcast %52 : f32 to vector<256xf32>
      %58 = arith.mulf %57, %56 : vector<256xf32>
      %59 = arith.addf %42, %58 : vector<256xf32>
      %c7 = arith.constant 7 : index
      %60 = memref.load %arg3[%c7] : memref<98xf32, #tpu.memory_space<smem>>
      %c0_36 = arith.constant 0 : index
      %c93 = arith.constant 93 : index
      %61 = vector.load %arg8[%c0_36, %c93] : memref<2x512xf32, #tpu.memory_space<vmem>>, vector<1x256xf32>
      %62 = vector.shape_cast %61 : vector<1x256xf32> to vector<256xf32>
      %cst_37 = arith.constant 0.000000e+00 : f32
      %63 = vector.broadcast %cst_37 : f32 to vector<256xf32>
      %64 = arith.select %51, %62, %63 : vector<256xi1>, vector<256xf32>
      %65 = vector.broadcast %60 : f32 to vector<256xf32>
      %66 = arith.mulf %65, %64 : vector<256xf32>
      %67 = arith.addf %59, %66 : vector<256xf32>
      %c14 = arith.constant 14 : index
      %68 = memref.load %arg3[%c14] : memref<98xf32, #tpu.memory_space<smem>>
      %c0_38 = arith.constant 0 : index
      %c109 = arith.constant 109 : index
      %69 = vector.load %arg8[%c0_38, %c109] : memref<2x512xf32, #tpu.memory_space<vmem>>, vector<1x256xf32>
      %70 = vector.shape_cast %69 : vector<1x256xf32> to vector<256xf32>
      %cst_39 = arith.constant 0.000000e+00 : f32
      %71 = vector.broadcast %cst_39 : f32 to vector<256xf32>
      %72 = arith.select %51, %70, %71 : vector<256xi1>, vector<256xf32>
      %73 = vector.broadcast %68 : f32 to vector<256xf32>
      %74 = arith.mulf %73, %72 : vector<256xf32>
      %75 = arith.addf %67, %74 : vector<256xf32>
      %c21 = arith.constant 21 : index
      %76 = memref.load %arg3[%c21] : memref<98xf32, #tpu.memory_space<smem>>
      %c0_40 = arith.constant 0 : index
      %c125 = arith.constant 125 : index
      %77 = vector.load %arg8[%c0_40, %c125] : memref<2x512xf32, #tpu.memory_space<vmem>>, vector<1x256xf32>
      %78 = vector.shape_cast %77 : vector<1x256xf32> to vector<256xf32>
      %cst_41 = arith.constant 0.000000e+00 : f32
      %79 = vector.broadcast %cst_41 : f32 to vector<256xf32>
      %80 = arith.select %51, %78, %79 : vector<256xi1>, vector<256xf32>
      %81 = vector.broadcast %76 : f32 to vector<256xf32>
      %82 = arith.mulf %81, %80 : vector<256xf32>
      %83 = arith.addf %75, %82 : vector<256xf32>
      %c28 = arith.constant 28 : index
      %84 = memref.load %arg3[%c28] : memref<98xf32, #tpu.memory_space<smem>>
      %c0_42 = arith.constant 0 : index
      %c141 = arith.constant 141 : index
      %85 = vector.load %arg8[%c0_42, %c141] : memref<2x512xf32, #tpu.memory_space<vmem>>, vector<1x256xf32>
      %86 = vector.shape_cast %85 : vector<1x256xf32> to vector<256xf32>
      %cst_43 = arith.constant 0.000000e+00 : f32
      %87 = vector.broadcast %cst_43 : f32 to vector<256xf32>
      %88 = arith.select %51, %86, %87 : vector<256xi1>, vector<256xf32>
      %89 = vector.broadcast %84 : f32 to vector<256xf32>
      %90 = arith.mulf %89, %88 : vector<256xf32>
      %91 = arith.addf %83, %90 : vector<256xf32>
      %c35 = arith.constant 35 : index
      %92 = memref.load %arg3[%c35] : memref<98xf32, #tpu.memory_space<smem>>
      %c0_44 = arith.constant 0 : index
      %c157 = arith.constant 157 : index
      %93 = vector.load %arg8[%c0_44, %c157] : memref<2x512xf32, #tpu.memory_space<vmem>>, vector<1x256xf32>
      %94 = vector.shape_cast %93 : vector<1x256xf32> to vector<256xf32>
      %cst_45 = arith.constant 0.000000e+00 : f32
      %95 = vector.broadcast %cst_45 : f32 to vector<256xf32>
      %96 = arith.select %51, %94, %95 : vector<256xi1>, vector<256xf32>
      %97 = vector.broadcast %92 : f32 to vector<256xf32>
      %98 = arith.mulf %97, %96 : vector<256xf32>
      %99 = arith.addf %91, %98 : vector<256xf32>
      %c42 = arith.constant 42 : index
      %100 = memref.load %arg3[%c42] : memref<98xf32, #tpu.memory_space<smem>>
      %c0_46 = arith.constant 0 : index
      %c173 = arith.constant 173 : index
      %101 = vector.load %arg8[%c0_46, %c173] : memref<2x512xf32, #tpu.memory_space<vmem>>, vector<1x256xf32>
      %102 = vector.shape_cast %101 : vector<1x256xf32> to vector<256xf32>
      %cst_47 = arith.constant 0.000000e+00 : f32
      %103 = vector.broadcast %cst_47 : f32 to vector<256xf32>
      %104 = arith.select %51, %102, %103 : vector<256xi1>, vector<256xf32>
      %105 = vector.broadcast %100 : f32 to vector<256xf32>
      %106 = arith.mulf %105, %104 : vector<256xf32>
      %107 = arith.addf %99, %106 : vector<256xf32>
      %c49 = arith.constant 49 : index
      %108 = memref.load %arg3[%c49] : memref<98xf32, #tpu.memory_space<smem>>
      %c1_48 = arith.constant 1 : index
      %c77_49 = arith.constant 77 : index
      %109 = vector.load %arg8[%c1_48, %c77_49] : memref<2x512xf32, #tpu.memory_space<vmem>>, vector<1x256xf32>
      %110 = vector.shape_cast %109 : vector<1x256xf32> to vector<256xf32>
      %cst_50 = arith.constant 0.000000e+00 : f32
      %111 = vector.broadcast %cst_50 : f32 to vector<256xf32>
      %112 = arith.select %51, %110, %111 : vector<256xi1>, vector<256xf32>
      %113 = vector.broadcast %108 : f32 to vector<256xf32>
      %114 = arith.mulf %113, %112 : vector<256xf32>
      %115 = arith.addf %107, %114 : vector<256xf32>
      %c56 = arith.constant 56 : index
      %116 = memref.load %arg3[%c56] : memref<98xf32, #tpu.memory_space<smem>>
      %c1_51 = arith.constant 1 : index
      %c93_52 = arith.constant 93 : index
      %117 = vector.load %arg8[%c1_51, %c93_52] : memref<2x512xf32, #tpu.memory_space<vmem>>, vector<1x256xf32>
      %118 = vector.shape_cast %117 : vector<1x256xf32> to vector<256xf32>
      %cst_53 = arith.constant 0.000000e+00 : f32
      %119 = vector.broadcast %cst_53 : f32 to vector<256xf32>
      %120 = arith.select %51, %118, %119 : vector<256xi1>, vector<256xf32>
      %121 = vector.broadcast %116 : f32 to vector<256xf32>
      %122 = arith.mulf %121, %120 : vector<256xf32>
      %123 = arith.addf %115, %122 : vector<256xf32>
      %c63 = arith.constant 63 : index
      %124 = memref.load %arg3[%c63] : memref<98xf32, #tpu.memory_space<smem>>
      %c1_54 = arith.constant 1 : index
      %c109_55 = arith.constant 109 : index
      %125 = vector.load %arg8[%c1_54, %c109_55] : memref<2x512xf32, #tpu.memory_space<vmem>>, vector<1x256xf32>
      %126 = vector.shape_cast %125 : vector<1x256xf32> to vector<256xf32>
      %cst_56 = arith.constant 0.000000e+00 : f32
      %127 = vector.broadcast %cst_56 : f32 to vector<256xf32>
      %128 = arith.select %51, %126, %127 : vector<256xi1>, vector<256xf32>
      %129 = vector.broadcast %124 : f32 to vector<256xf32>
      %130 = arith.mulf %129, %128 : vector<256xf32>
      %131 = arith.addf %123, %130 : vector<256xf32>
      %c70 = arith.constant 70 : index
      %132 = memref.load %arg3[%c70] : memref<98xf32, #tpu.memory_space<smem>>
      %c1_57 = arith.constant 1 : index
      %c125_58 = arith.constant 125 : index
      %133 = vector.load %arg8[%c1_57, %c125_58] : memref<2x512xf32, #tpu.memory_space<vmem>>, vector<1x256xf32>
      %134 = vector.shape_cast %133 : vector<1x256xf32> to vector<256xf32>
      %cst_59 = arith.constant 0.000000e+00 : f32
      %135 = vector.broadcast %cst_59 : f32 to vector<256xf32>
      %136 = arith.select %51, %134, %135 : vector<256xi1>, vector<256xf32>
      %137 = vector.broadcast %132 : f32 to vector<256xf32>
      %138 = arith.mulf %137, %136 : vector<256xf32>
      %139 = arith.addf %131, %138 : vector<256xf32>
      %c77_60 = arith.constant 77 : index
      %140 = memref.load %arg3[%c77_60] : memref<98xf32, #tpu.memory_space<smem>>
      %c1_61 = arith.constant 1 : index
      %c141_62 = arith.constant 141 : index
      %141 = vector.load %arg8[%c1_61, %c141_62] : memref<2x512xf32, #tpu.memory_space<vmem>>, vector<1x256xf32>
      %142 = vector.shape_cast %141 : vector<1x256xf32> to vector<256xf32>
      %cst_63 = arith.constant 0.000000e+00 : f32
      %143 = vector.broadcast %cst_63 : f32 to vector<256xf32>
      %144 = arith.select %51, %142, %143 : vector<256xi1>, vector<256xf32>
      %145 = vector.broadcast %140 : f32 to vector<256xf32>
      %146 = arith.mulf %145, %144 : vector<256xf32>
      %147 = arith.addf %139, %146 : vector<256xf32>
      %c84 = arith.constant 84 : index
      %148 = memref.load %arg3[%c84] : memref<98xf32, #tpu.memory_space<smem>>
      %c1_64 = arith.constant 1 : index
      %c157_65 = arith.constant 157 : index
      %149 = vector.load %arg8[%c1_64, %c157_65] : memref<2x512xf32, #tpu.memory_space<vmem>>, vector<1x256xf32>
      %150 = vector.shape_cast %149 : vector<1x256xf32> to vector<256xf32>
      %cst_66 = arith.constant 0.000000e+00 : f32
      %151 = vector.broadcast %cst_66 : f32 to vector<256xf32>
      %152 = arith.select %51, %150, %151 : vector<256xi1>, vector<256xf32>
      %153 = vector.broadcast %148 : f32 to vector<256xf32>
      %154 = arith.mulf %153, %152 : vector<256xf32>
      %155 = arith.addf %147, %154 : vector<256xf32>
      %c91 = arith.constant 91 : index
      %156 = memref.load %arg3[%c91] : memref<98xf32, #tpu.memory_space<smem>>
      %c1_67 = arith.constant 1 : index
      %c173_68 = arith.constant 173 : index
      %157 = vector.load %arg8[%c1_67, %c173_68] : memref<2x512xf32, #tpu.memory_space<vmem>>, vector<1x256xf32>
      %158 = vector.shape_cast %157 : vector<1x256xf32> to vector<256xf32>
      %cst_69 = arith.constant 0.000000e+00 : f32
      %159 = vector.broadcast %cst_69 : f32 to vector<256xf32>
      %160 = arith.select %51, %158, %159 : vector<256xi1>, vector<256xf32>
      %161 = vector.broadcast %156 : f32 to vector<256xf32>
      %162 = arith.mulf %161, %160 : vector<256xf32>
      %163 = arith.addf %155, %162 : vector<256xf32>
      %c-2_i32 = arith.constant -2 : i32
      %164 = vector.broadcast %c-2_i32 : i32 to vector<256xi32>
      %165 = arith.addi %41, %164 : vector<256xi32>
      %c0_i32_70 = arith.constant 0 : i32
      %166 = vector.broadcast %c0_i32_70 : i32 to vector<256xi32>
      %167 = arith.cmpi sge, %165, %166 : vector<256xi32>
      %c-2_i32_71 = arith.constant -2 : i32
      %168 = vector.broadcast %c-2_i32_71 : i32 to vector<256xi32>
      %169 = arith.addi %41, %168 : vector<256xi32>
      %c16_i32_72 = arith.constant 16 : i32
      %170 = vector.broadcast %c16_i32_72 : i32 to vector<256xi32>
      %171 = arith.cmpi slt, %169, %170 : vector<256xi32>
      %172 = arith.andi %167, %171 : vector<256xi1>
      %c1_73 = arith.constant 1 : index
      %173 = memref.load %arg3[%c1_73] : memref<98xf32, #tpu.memory_space<smem>>
      %c0_74 = arith.constant 0 : index
      %c78 = arith.constant 78 : index
      %174 = vector.load %arg8[%c0_74, %c78] : memref<2x512xf32, #tpu.memory_space<vmem>>, vector<1x256xf32>
      %175 = vector.shape_cast %174 : vector<1x256xf32> to vector<256xf32>
      %cst_75 = arith.constant 0.000000e+00 : f32
      %176 = vector.broadcast %cst_75 : f32 to vector<256xf32>
      %177 = arith.select %172, %175, %176 : vector<256xi1>, vector<256xf32>
      %178 = vector.broadcast %173 : f32 to vector<256xf32>
      %179 = arith.mulf %178, %177 : vector<256xf32>
      %180 = arith.addf %163, %179 : vector<256xf32>
      %c8 = arith.constant 8 : index
      %181 = memref.load %arg3[%c8] : memref<98xf32, #tpu.memory_space<smem>>
      %c0_76 = arith.constant 0 : index
      %c94 = arith.constant 94 : index
      %182 = vector.load %arg8[%c0_76, %c94] : memref<2x512xf32, #tpu.memory_space<vmem>>, vector<1x256xf32>
      %183 = vector.shape_cast %182 : vector<1x256xf32> to vector<256xf32>
      %cst_77 = arith.constant 0.000000e+00 : f32
      %184 = vector.broadcast %cst_77 : f32 to vector<256xf32>
      %185 = arith.select %172, %183, %184 : vector<256xi1>, vector<256xf32>
      %186 = vector.broadcast %181 : f32 to vector<256xf32>
      %187 = arith.mulf %186, %185 : vector<256xf32>
      %188 = arith.addf %180, %187 : vector<256xf32>
      %c15 = arith.constant 15 : index
      %189 = memref.load %arg3[%c15] : memref<98xf32, #tpu.memory_space<smem>>
      %c0_78 = arith.constant 0 : index
      %c110 = arith.constant 110 : index
      %190 = vector.load %arg8[%c0_78, %c110] : memref<2x512xf32, #tpu.memory_space<vmem>>, vector<1x256xf32>
      %191 = vector.shape_cast %190 : vector<1x256xf32> to vector<256xf32>
      %cst_79 = arith.constant 0.000000e+00 : f32
      %192 = vector.broadcast %cst_79 : f32 to vector<256xf32>
      %193 = arith.select %172, %191, %192 : vector<256xi1>, vector<256xf32>
      %194 = vector.broadcast %189 : f32 to vector<256xf32>
      %195 = arith.mulf %194, %193 : vector<256xf32>
      %196 = arith.addf %188, %195 : vector<256xf32>
      %c22 = arith.constant 22 : index
      %197 = memref.load %arg3[%c22] : memref<98xf32, #tpu.memory_space<smem>>
      %c0_80 = arith.constant 0 : index
      %c126 = arith.constant 126 : index
      %198 = vector.load %arg8[%c0_80, %c126] : memref<2x512xf32, #tpu.memory_space<vmem>>, vector<1x256xf32>
      %199 = vector.shape_cast %198 : vector<1x256xf32> to vector<256xf32>
      %cst_81 = arith.constant 0.000000e+00 : f32
      %200 = vector.broadcast %cst_81 : f32 to vector<256xf32>
      %201 = arith.select %172, %199, %200 : vector<256xi1>, vector<256xf32>
      %202 = vector.broadcast %197 : f32 to vector<256xf32>
      %203 = arith.mulf %202, %201 : vector<256xf32>
      %204 = arith.addf %196, %203 : vector<256xf32>
      %c29 = arith.constant 29 : index
      %205 = memref.load %arg3[%c29] : memref<98xf32, #tpu.memory_space<smem>>
      %c0_82 = arith.constant 0 : index
      %c142 = arith.constant 142 : index
      %206 = vector.load %arg8[%c0_82, %c142] : memref<2x512xf32, #tpu.memory_space<vmem>>, vector<1x256xf32>
      %207 = vector.shape_cast %206 : vector<1x256xf32> to vector<256xf32>
      %cst_83 = arith.constant 0.000000e+00 : f32
      %208 = vector.broadcast %cst_83 : f32 to vector<256xf32>
      %209 = arith.select %172, %207, %208 : vector<256xi1>, vector<256xf32>
      %210 = vector.broadcast %205 : f32 to vector<256xf32>
      %211 = arith.mulf %210, %209 : vector<256xf32>
      %212 = arith.addf %204, %211 : vector<256xf32>
      %c36 = arith.constant 36 : index
      %213 = memref.load %arg3[%c36] : memref<98xf32, #tpu.memory_space<smem>>
      %c0_84 = arith.constant 0 : index
      %c158 = arith.constant 158 : index
      %214 = vector.load %arg8[%c0_84, %c158] : memref<2x512xf32, #tpu.memory_space<vmem>>, vector<1x256xf32>
      %215 = vector.shape_cast %214 : vector<1x256xf32> to vector<256xf32>
      %cst_85 = arith.constant 0.000000e+00 : f32
      %216 = vector.broadcast %cst_85 : f32 to vector<256xf32>
      %217 = arith.select %172, %215, %216 : vector<256xi1>, vector<256xf32>
      %218 = vector.broadcast %213 : f32 to vector<256xf32>
      %219 = arith.mulf %218, %217 : vector<256xf32>
      %220 = arith.addf %212, %219 : vector<256xf32>
      %c43 = arith.constant 43 : index
      %221 = memref.load %arg3[%c43] : memref<98xf32, #tpu.memory_space<smem>>
      %c0_86 = arith.constant 0 : index
      %c174 = arith.constant 174 : index
      %222 = vector.load %arg8[%c0_86, %c174] : memref<2x512xf32, #tpu.memory_space<vmem>>, vector<1x256xf32>
      %223 = vector.shape_cast %222 : vector<1x256xf32> to vector<256xf32>
      %cst_87 = arith.constant 0.000000e+00 : f32
      %224 = vector.broadcast %cst_87 : f32 to vector<256xf32>
      %225 = arith.select %172, %223, %224 : vector<256xi1>, vector<256xf32>
      %226 = vector.broadcast %221 : f32 to vector<256xf32>
      %227 = arith.mulf %226, %225 : vector<256xf32>
      %228 = arith.addf %220, %227 : vector<256xf32>
      %c50 = arith.constant 50 : index
      %229 = memref.load %arg3[%c50] : memref<98xf32, #tpu.memory_space<smem>>
      %c1_88 = arith.constant 1 : index
      %c78_89 = arith.constant 78 : index
      %230 = vector.load %arg8[%c1_88, %c78_89] : memref<2x512xf32, #tpu.memory_space<vmem>>, vector<1x256xf32>
      %231 = vector.shape_cast %230 : vector<1x256xf32> to vector<256xf32>
      %cst_90 = arith.constant 0.000000e+00 : f32
      %232 = vector.broadcast %cst_90 : f32 to vector<256xf32>
      %233 = arith.select %172, %231, %232 : vector<256xi1>, vector<256xf32>
      %234 = vector.broadcast %229 : f32 to vector<256xf32>
      %235 = arith.mulf %234, %233 : vector<256xf32>
      %236 = arith.addf %228, %235 : vector<256xf32>
      %c57 = arith.constant 57 : index
      %237 = memref.load %arg3[%c57] : memref<98xf32, #tpu.memory_space<smem>>
      %c1_91 = arith.constant 1 : index
      %c94_92 = arith.constant 94 : index
      %238 = vector.load %arg8[%c1_91, %c94_92] : memref<2x512xf32, #tpu.memory_space<vmem>>, vector<1x256xf32>
      %239 = vector.shape_cast %238 : vector<1x256xf32> to vector<256xf32>
      %cst_93 = arith.constant 0.000000e+00 : f32
      %240 = vector.broadcast %cst_93 : f32 to vector<256xf32>
      %241 = arith.select %172, %239, %240 : vector<256xi1>, vector<256xf32>
      %242 = vector.broadcast %237 : f32 to vector<256xf32>
      %243 = arith.mulf %242, %241 : vector<256xf32>
      %244 = arith.addf %236, %243 : vector<256xf32>
      %c64 = arith.constant 64 : index
      %245 = memref.load %arg3[%c64] : memref<98xf32, #tpu.memory_space<smem>>
      %c1_94 = arith.constant 1 : index
      %c110_95 = arith.constant 110 : index
      %246 = vector.load %arg8[%c1_94, %c110_95] : memref<2x512xf32, #tpu.memory_space<vmem>>, vector<1x256xf32>
      %247 = vector.shape_cast %246 : vector<1x256xf32> to vector<256xf32>
      %cst_96 = arith.constant 0.000000e+00 : f32
      %248 = vector.broadcast %cst_96 : f32 to vector<256xf32>
      %249 = arith.select %172, %247, %248 : vector<256xi1>, vector<256xf32>
      %250 = vector.broadcast %245 : f32 to vector<256xf32>
      %251 = arith.mulf %250, %249 : vector<256xf32>
      %252 = arith.addf %244, %251 : vector<256xf32>
      %c71 = arith.constant 71 : index
      %253 = memref.load %arg3[%c71] : memref<98xf32, #tpu.memory_space<smem>>
      %c1_97 = arith.constant 1 : index
      %c126_98 = arith.constant 126 : index
      %254 = vector.load %arg8[%c1_97, %c126_98] : memref<2x512xf32, #tpu.memory_space<vmem>>, vector<1x256xf32>
      %255 = vector.shape_cast %254 : vector<1x256xf32> to vector<256xf32>
      %cst_99 = arith.constant 0.000000e+00 : f32
      %256 = vector.broadcast %cst_99 : f32 to vector<256xf32>
      %257 = arith.select %172, %255, %256 : vector<256xi1>, vector<256xf32>
      %258 = vector.broadcast %253 : f32 to vector<256xf32>
      %259 = arith.mulf %258, %257 : vector<256xf32>
      %260 = arith.addf %252, %259 : vector<256xf32>
      %c78_100 = arith.constant 78 : index
      %261 = memref.load %arg3[%c78_100] : memref<98xf32, #tpu.memory_space<smem>>
      %c1_101 = arith.constant 1 : index
      %c142_102 = arith.constant 142 : index
      %262 = vector.load %arg8[%c1_101, %c142_102] : memref<2x512xf32, #tpu.memory_space<vmem>>, vector<1x256xf32>
      %263 = vector.shape_cast %262 : vector<1x256xf32> to vector<256xf32>
      %cst_103 = arith.constant 0.000000e+00 : f32
      %264 = vector.broadcast %cst_103 : f32 to vector<256xf32>
      %265 = arith.select %172, %263, %264 : vector<256xi1>, vector<256xf32>
      %266 = vector.broadcast %261 : f32 to vector<256xf32>
      %267 = arith.mulf %266, %265 : vector<256xf32>
      %268 = arith.addf %260, %267 : vector<256xf32>
      %c85 = arith.constant 85 : index
      %269 = memref.load %arg3[%c85] : memref<98xf32, #tpu.memory_space<smem>>
      %c1_104 = arith.constant 1 : index
      %c158_105 = arith.constant 158 : index
      %270 = vector.load %arg8[%c1_104, %c158_105] : memref<2x512xf32, #tpu.memory_space<vmem>>, vector<1x256xf32>
      %271 = vector.shape_cast %270 : vector<1x256xf32> to vector<256xf32>
      %cst_106 = arith.constant 0.000000e+00 : f32
      %272 = vector.broadcast %cst_106 : f32 to vector<256xf32>
      %273 = arith.select %172, %271, %272 : vector<256xi1>, vector<256xf32>
      %274 = vector.broadcast %269 : f32 to vector<256xf32>
      %275 = arith.mulf %274, %273 : vector<256xf32>
      %276 = arith.addf %268, %275 : vector<256xf32>
      %c92 = arith.constant 92 : index
      %277 = memref.load %arg3[%c92] : memref<98xf32, #tpu.memory_space<smem>>
      %c1_107 = arith.constant 1 : index
      %c174_108 = arith.constant 174 : index
      %278 = vector.load %arg8[%c1_107, %c174_108] : memref<2x512xf32, #tpu.memory_space<vmem>>, vector<1x256xf32>
      %279 = vector.shape_cast %278 : vector<1x256xf32> to vector<256xf32>
      %cst_109 = arith.constant 0.000000e+00 : f32
      %280 = vector.broadcast %cst_109 : f32 to vector<256xf32>
      %281 = arith.select %172, %279, %280 : vector<256xi1>, vector<256xf32>
      %282 = vector.broadcast %277 : f32 to vector<256xf32>
      %283 = arith.mulf %282, %281 : vector<256xf32>
      %284 = arith.addf %276, %283 : vector<256xf32>
      %c-1_i32 = arith.constant -1 : i32
      %285 = vector.broadcast %c-1_i32 : i32 to vector<256xi32>
      %286 = arith.addi %41, %285 : vector<256xi32>
      %c0_i32_110 = arith.constant 0 : i32
      %287 = vector.broadcast %c0_i32_110 : i32 to vector<256xi32>
      %288 = arith.cmpi sge, %286, %287 : vector<256xi32>
      %c-1_i32_111 = arith.constant -1 : i32
      %289 = vector.broadcast %c-1_i32_111 : i32 to vector<256xi32>
      %290 = arith.addi %41, %289 : vector<256xi32>
      %c16_i32_112 = arith.constant 16 : i32
      %291 = vector.broadcast %c16_i32_112 : i32 to vector<256xi32>
      %292 = arith.cmpi slt, %290, %291 : vector<256xi32>
      %293 = arith.andi %288, %292 : vector<256xi1>
      %c2 = arith.constant 2 : index
      %294 = memref.load %arg3[%c2] : memref<98xf32, #tpu.memory_space<smem>>
      %c0_113 = arith.constant 0 : index
      %c79 = arith.constant 79 : index
      %295 = vector.load %arg8[%c0_113, %c79] : memref<2x512xf32, #tpu.memory_space<vmem>>, vector<1x256xf32>
      %296 = vector.shape_cast %295 : vector<1x256xf32> to vector<256xf32>
      %cst_114 = arith.constant 0.000000e+00 : f32
      %297 = vector.broadcast %cst_114 : f32 to vector<256xf32>
      %298 = arith.select %293, %296, %297 : vector<256xi1>, vector<256xf32>
      %299 = vector.broadcast %294 : f32 to vector<256xf32>
      %300 = arith.mulf %299, %298 : vector<256xf32>
      %301 = arith.addf %284, %300 : vector<256xf32>
      %c9 = arith.constant 9 : index
      %302 = memref.load %arg3[%c9] : memref<98xf32, #tpu.memory_space<smem>>
      %c0_115 = arith.constant 0 : index
      %c95 = arith.constant 95 : index
      %303 = vector.load %arg8[%c0_115, %c95] : memref<2x512xf32, #tpu.memory_space<vmem>>, vector<1x256xf32>
      %304 = vector.shape_cast %303 : vector<1x256xf32> to vector<256xf32>
      %cst_116 = arith.constant 0.000000e+00 : f32
      %305 = vector.broadcast %cst_116 : f32 to vector<256xf32>
      %306 = arith.select %293, %304, %305 : vector<256xi1>, vector<256xf32>
      %307 = vector.broadcast %302 : f32 to vector<256xf32>
      %308 = arith.mulf %307, %306 : vector<256xf32>
      %309 = arith.addf %301, %308 : vector<256xf32>
      %c16 = arith.constant 16 : index
      %310 = memref.load %arg3[%c16] : memref<98xf32, #tpu.memory_space<smem>>
      %c0_117 = arith.constant 0 : index
      %c111 = arith.constant 111 : index
      %311 = vector.load %arg8[%c0_117, %c111] : memref<2x512xf32, #tpu.memory_space<vmem>>, vector<1x256xf32>
      %312 = vector.shape_cast %311 : vector<1x256xf32> to vector<256xf32>
      %cst_118 = arith.constant 0.000000e+00 : f32
      %313 = vector.broadcast %cst_118 : f32 to vector<256xf32>
      %314 = arith.select %293, %312, %313 : vector<256xi1>, vector<256xf32>
      %315 = vector.broadcast %310 : f32 to vector<256xf32>
      %316 = arith.mulf %315, %314 : vector<256xf32>
      %317 = arith.addf %309, %316 : vector<256xf32>
      %c23 = arith.constant 23 : index
      %318 = memref.load %arg3[%c23] : memref<98xf32, #tpu.memory_space<smem>>
      %c0_119 = arith.constant 0 : index
      %c127 = arith.constant 127 : index
      %319 = vector.load %arg8[%c0_119, %c127] : memref<2x512xf32, #tpu.memory_space<vmem>>, vector<1x256xf32>
      %320 = vector.shape_cast %319 : vector<1x256xf32> to vector<256xf32>
      %cst_120 = arith.constant 0.000000e+00 : f32
      %321 = vector.broadcast %cst_120 : f32 to vector<256xf32>
      %322 = arith.select %293, %320, %321 : vector<256xi1>, vector<256xf32>
      %323 = vector.broadcast %318 : f32 to vector<256xf32>
      %324 = arith.mulf %323, %322 : vector<256xf32>
      %325 = arith.addf %317, %324 : vector<256xf32>
      %c30 = arith.constant 30 : index
      %326 = memref.load %arg3[%c30] : memref<98xf32, #tpu.memory_space<smem>>
      %c0_121 = arith.constant 0 : index
      %c143 = arith.constant 143 : index
      %327 = vector.load %arg8[%c0_121, %c143] : memref<2x512xf32, #tpu.memory_space<vmem>>, vector<1x256xf32>
      %328 = vector.shape_cast %327 : vector<1x256xf32> to vector<256xf32>
      %cst_122 = arith.constant 0.000000e+00 : f32
      %329 = vector.broadcast %cst_122 : f32 to vector<256xf32>
      %330 = arith.select %293, %328, %329 : vector<256xi1>, vector<256xf32>
      %331 = vector.broadcast %326 : f32 to vector<256xf32>
      %332 = arith.mulf %331, %330 : vector<256xf32>
      %333 = arith.addf %325, %332 : vector<256xf32>
      %c37 = arith.constant 37 : index
      %334 = memref.load %arg3[%c37] : memref<98xf32, #tpu.memory_space<smem>>
      %c0_123 = arith.constant 0 : index
      %c159 = arith.constant 159 : index
      %335 = vector.load %arg8[%c0_123, %c159] : memref<2x512xf32, #tpu.memory_space<vmem>>, vector<1x256xf32>
      %336 = vector.shape_cast %335 : vector<1x256xf32> to vector<256xf32>
      %cst_124 = arith.constant 0.000000e+00 : f32
      %337 = vector.broadcast %cst_124 : f32 to vector<256xf32>
      %338 = arith.select %293, %336, %337 : vector<256xi1>, vector<256xf32>
      %339 = vector.broadcast %334 : f32 to vector<256xf32>
      %340 = arith.mulf %339, %338 : vector<256xf32>
      %341 = arith.addf %333, %340 : vector<256xf32>
      %c44 = arith.constant 44 : index
      %342 = memref.load %arg3[%c44] : memref<98xf32, #tpu.memory_space<smem>>
      %c0_125 = arith.constant 0 : index
      %c175 = arith.constant 175 : index
      %343 = vector.load %arg8[%c0_125, %c175] : memref<2x512xf32, #tpu.memory_space<vmem>>, vector<1x256xf32>
      %344 = vector.shape_cast %343 : vector<1x256xf32> to vector<256xf32>
      %cst_126 = arith.constant 0.000000e+00 : f32
      %345 = vector.broadcast %cst_126 : f32 to vector<256xf32>
      %346 = arith.select %293, %344, %345 : vector<256xi1>, vector<256xf32>
      %347 = vector.broadcast %342 : f32 to vector<256xf32>
      %348 = arith.mulf %347, %346 : vector<256xf32>
      %349 = arith.addf %341, %348 : vector<256xf32>
      %c51 = arith.constant 51 : index
      %350 = memref.load %arg3[%c51] : memref<98xf32, #tpu.memory_space<smem>>
      %c1_127 = arith.constant 1 : index
      %c79_128 = arith.constant 79 : index
      %351 = vector.load %arg8[%c1_127, %c79_128] : memref<2x512xf32, #tpu.memory_space<vmem>>, vector<1x256xf32>
      %352 = vector.shape_cast %351 : vector<1x256xf32> to vector<256xf32>
      %cst_129 = arith.constant 0.000000e+00 : f32
      %353 = vector.broadcast %cst_129 : f32 to vector<256xf32>
      %354 = arith.select %293, %352, %353 : vector<256xi1>, vector<256xf32>
      %355 = vector.broadcast %350 : f32 to vector<256xf32>
      %356 = arith.mulf %355, %354 : vector<256xf32>
      %357 = arith.addf %349, %356 : vector<256xf32>
      %c58 = arith.constant 58 : index
      %358 = memref.load %arg3[%c58] : memref<98xf32, #tpu.memory_space<smem>>
      %c1_130 = arith.constant 1 : index
      %c95_131 = arith.constant 95 : index
      %359 = vector.load %arg8[%c1_130, %c95_131] : memref<2x512xf32, #tpu.memory_space<vmem>>, vector<1x256xf32>
      %360 = vector.shape_cast %359 : vector<1x256xf32> to vector<256xf32>
      %cst_132 = arith.constant 0.000000e+00 : f32
      %361 = vector.broadcast %cst_132 : f32 to vector<256xf32>
      %362 = arith.select %293, %360, %361 : vector<256xi1>, vector<256xf32>
      %363 = vector.broadcast %358 : f32 to vector<256xf32>
      %364 = arith.mulf %363, %362 : vector<256xf32>
      %365 = arith.addf %357, %364 : vector<256xf32>
      %c65 = arith.constant 65 : index
      %366 = memref.load %arg3[%c65] : memref<98xf32, #tpu.memory_space<smem>>
      %c1_133 = arith.constant 1 : index
      %c111_134 = arith.constant 111 : index
      %367 = vector.load %arg8[%c1_133, %c111_134] : memref<2x512xf32, #tpu.memory_space<vmem>>, vector<1x256xf32>
      %368 = vector.shape_cast %367 : vector<1x256xf32> to vector<256xf32>
      %cst_135 = arith.constant 0.000000e+00 : f32
      %369 = vector.broadcast %cst_135 : f32 to vector<256xf32>
      %370 = arith.select %293, %368, %369 : vector<256xi1>, vector<256xf32>
      %371 = vector.broadcast %366 : f32 to vector<256xf32>
      %372 = arith.mulf %371, %370 : vector<256xf32>
      %373 = arith.addf %365, %372 : vector<256xf32>
      %c72 = arith.constant 72 : index
      %374 = memref.load %arg3[%c72] : memref<98xf32, #tpu.memory_space<smem>>
      %c1_136 = arith.constant 1 : index
      %c127_137 = arith.constant 127 : index
      %375 = vector.load %arg8[%c1_136, %c127_137] : memref<2x512xf32, #tpu.memory_space<vmem>>, vector<1x256xf32>
      %376 = vector.shape_cast %375 : vector<1x256xf32> to vector<256xf32>
      %cst_138 = arith.constant 0.000000e+00 : f32
      %377 = vector.broadcast %cst_138 : f32 to vector<256xf32>
      %378 = arith.select %293, %376, %377 : vector<256xi1>, vector<256xf32>
      %379 = vector.broadcast %374 : f32 to vector<256xf32>
      %380 = arith.mulf %379, %378 : vector<256xf32>
      %381 = arith.addf %373, %380 : vector<256xf32>
      %c79_139 = arith.constant 79 : index
      %382 = memref.load %arg3[%c79_139] : memref<98xf32, #tpu.memory_space<smem>>
      %c1_140 = arith.constant 1 : index
      %c143_141 = arith.constant 143 : index
      %383 = vector.load %arg8[%c1_140, %c143_141] : memref<2x512xf32, #tpu.memory_space<vmem>>, vector<1x256xf32>
      %384 = vector.shape_cast %383 : vector<1x256xf32> to vector<256xf32>
      %cst_142 = arith.constant 0.000000e+00 : f32
      %385 = vector.broadcast %cst_142 : f32 to vector<256xf32>
      %386 = arith.select %293, %384, %385 : vector<256xi1>, vector<256xf32>
      %387 = vector.broadcast %382 : f32 to vector<256xf32>
      %388 = arith.mulf %387, %386 : vector<256xf32>
      %389 = arith.addf %381, %388 : vector<256xf32>
      %c86 = arith.constant 86 : index
      %390 = memref.load %arg3[%c86] : memref<98xf32, #tpu.memory_space<smem>>
      %c1_143 = arith.constant 1 : index
      %c159_144 = arith.constant 159 : index
      %391 = vector.load %arg8[%c1_143, %c159_144] : memref<2x512xf32, #tpu.memory_space<vmem>>, vector<1x256xf32>
      %392 = vector.shape_cast %391 : vector<1x256xf32> to vector<256xf32>
      %cst_145 = arith.constant 0.000000e+00 : f32
      %393 = vector.broadcast %cst_145 : f32 to vector<256xf32>
      %394 = arith.select %293, %392, %393 : vector<256xi1>, vector<256xf32>
      %395 = vector.broadcast %390 : f32 to vector<256xf32>
      %396 = arith.mulf %395, %394 : vector<256xf32>
      %397 = arith.addf %389, %396 : vector<256xf32>
      %c93_146 = arith.constant 93 : index
      %398 = memref.load %arg3[%c93_146] : memref<98xf32, #tpu.memory_space<smem>>
      %c1_147 = arith.constant 1 : index
      %c175_148 = arith.constant 175 : index
      %399 = vector.load %arg8[%c1_147, %c175_148] : memref<2x512xf32, #tpu.memory_space<vmem>>, vector<1x256xf32>
      %400 = vector.shape_cast %399 : vector<1x256xf32> to vector<256xf32>
      %cst_149 = arith.constant 0.000000e+00 : f32
      %401 = vector.broadcast %cst_149 : f32 to vector<256xf32>
      %402 = arith.select %293, %400, %401 : vector<256xi1>, vector<256xf32>
      %403 = vector.broadcast %398 : f32 to vector<256xf32>
      %404 = arith.mulf %403, %402 : vector<256xf32>
      %405 = arith.addf %397, %404 : vector<256xf32>
      %c0_i32_150 = arith.constant 0 : i32
      %406 = vector.broadcast %c0_i32_150 : i32 to vector<256xi32>
      %407 = arith.addi %41, %406 : vector<256xi32>
      %c0_i32_151 = arith.constant 0 : i32
      %408 = vector.broadcast %c0_i32_151 : i32 to vector<256xi32>
      %409 = arith.cmpi sge, %407, %408 : vector<256xi32>
      %c0_i32_152 = arith.constant 0 : i32
      %410 = vector.broadcast %c0_i32_152 : i32 to vector<256xi32>
      %411 = arith.addi %41, %410 : vector<256xi32>
      %c16_i32_153 = arith.constant 16 : i32
      %412 = vector.broadcast %c16_i32_153 : i32 to vector<256xi32>
      %413 = arith.cmpi slt, %411, %412 : vector<256xi32>
      %414 = arith.andi %409, %413 : vector<256xi1>
      %c3 = arith.constant 3 : index
      %415 = memref.load %arg3[%c3] : memref<98xf32, #tpu.memory_space<smem>>
      %c0_154 = arith.constant 0 : index
      %c80 = arith.constant 80 : index
      %416 = vector.load %arg8[%c0_154, %c80] : memref<2x512xf32, #tpu.memory_space<vmem>>, vector<1x256xf32>
      %417 = vector.shape_cast %416 : vector<1x256xf32> to vector<256xf32>
      %cst_155 = arith.constant 0.000000e+00 : f32
      %418 = vector.broadcast %cst_155 : f32 to vector<256xf32>
      %419 = arith.select %414, %417, %418 : vector<256xi1>, vector<256xf32>
      %420 = vector.broadcast %415 : f32 to vector<256xf32>
      %421 = arith.mulf %420, %419 : vector<256xf32>
      %422 = arith.addf %405, %421 : vector<256xf32>
      %c10 = arith.constant 10 : index
      %423 = memref.load %arg3[%c10] : memref<98xf32, #tpu.memory_space<smem>>
      %c0_156 = arith.constant 0 : index
      %c96 = arith.constant 96 : index
      %424 = vector.load %arg8[%c0_156, %c96] : memref<2x512xf32, #tpu.memory_space<vmem>>, vector<1x256xf32>
      %425 = vector.shape_cast %424 : vector<1x256xf32> to vector<256xf32>
      %cst_157 = arith.constant 0.000000e+00 : f32
      %426 = vector.broadcast %cst_157 : f32 to vector<256xf32>
      %427 = arith.select %414, %425, %426 : vector<256xi1>, vector<256xf32>
      %428 = vector.broadcast %423 : f32 to vector<256xf32>
      %429 = arith.mulf %428, %427 : vector<256xf32>
      %430 = arith.addf %422, %429 : vector<256xf32>
      %c17 = arith.constant 17 : index
      %431 = memref.load %arg3[%c17] : memref<98xf32, #tpu.memory_space<smem>>
      %c0_158 = arith.constant 0 : index
      %c112 = arith.constant 112 : index
      %432 = vector.load %arg8[%c0_158, %c112] : memref<2x512xf32, #tpu.memory_space<vmem>>, vector<1x256xf32>
      %433 = vector.shape_cast %432 : vector<1x256xf32> to vector<256xf32>
      %cst_159 = arith.constant 0.000000e+00 : f32
      %434 = vector.broadcast %cst_159 : f32 to vector<256xf32>
      %435 = arith.select %414, %433, %434 : vector<256xi1>, vector<256xf32>
      %436 = vector.broadcast %431 : f32 to vector<256xf32>
      %437 = arith.mulf %436, %435 : vector<256xf32>
      %438 = arith.addf %430, %437 : vector<256xf32>
      %c24 = arith.constant 24 : index
      %439 = memref.load %arg3[%c24] : memref<98xf32, #tpu.memory_space<smem>>
      %c0_160 = arith.constant 0 : index
      %c128_161 = arith.constant 128 : index
      %440 = vector.load %arg8[%c0_160, %c128_161] : memref<2x512xf32, #tpu.memory_space<vmem>>, vector<1x256xf32>
      %441 = vector.shape_cast %440 : vector<1x256xf32> to vector<256xf32>
      %cst_162 = arith.constant 0.000000e+00 : f32
      %442 = vector.broadcast %cst_162 : f32 to vector<256xf32>
      %443 = arith.select %414, %441, %442 : vector<256xi1>, vector<256xf32>
      %444 = vector.broadcast %439 : f32 to vector<256xf32>
      %445 = arith.mulf %444, %443 : vector<256xf32>
      %446 = arith.addf %438, %445 : vector<256xf32>
      %c31 = arith.constant 31 : index
      %447 = memref.load %arg3[%c31] : memref<98xf32, #tpu.memory_space<smem>>
      %c0_163 = arith.constant 0 : index
      %c144 = arith.constant 144 : index
      %448 = vector.load %arg8[%c0_163, %c144] : memref<2x512xf32, #tpu.memory_space<vmem>>, vector<1x256xf32>
      %449 = vector.shape_cast %448 : vector<1x256xf32> to vector<256xf32>
      %cst_164 = arith.constant 0.000000e+00 : f32
      %450 = vector.broadcast %cst_164 : f32 to vector<256xf32>
      %451 = arith.select %414, %449, %450 : vector<256xi1>, vector<256xf32>
      %452 = vector.broadcast %447 : f32 to vector<256xf32>
      %453 = arith.mulf %452, %451 : vector<256xf32>
      %454 = arith.addf %446, %453 : vector<256xf32>
      %c38 = arith.constant 38 : index
      %455 = memref.load %arg3[%c38] : memref<98xf32, #tpu.memory_space<smem>>
      %c0_165 = arith.constant 0 : index
      %c160 = arith.constant 160 : index
      %456 = vector.load %arg8[%c0_165, %c160] : memref<2x512xf32, #tpu.memory_space<vmem>>, vector<1x256xf32>
      %457 = vector.shape_cast %456 : vector<1x256xf32> to vector<256xf32>
      %cst_166 = arith.constant 0.000000e+00 : f32
      %458 = vector.broadcast %cst_166 : f32 to vector<256xf32>
      %459 = arith.select %414, %457, %458 : vector<256xi1>, vector<256xf32>
      %460 = vector.broadcast %455 : f32 to vector<256xf32>
      %461 = arith.mulf %460, %459 : vector<256xf32>
      %462 = arith.addf %454, %461 : vector<256xf32>
      %c45 = arith.constant 45 : index
      %463 = memref.load %arg3[%c45] : memref<98xf32, #tpu.memory_space<smem>>
      %c0_167 = arith.constant 0 : index
      %c176 = arith.constant 176 : index
      %464 = vector.load %arg8[%c0_167, %c176] : memref<2x512xf32, #tpu.memory_space<vmem>>, vector<1x256xf32>
      %465 = vector.shape_cast %464 : vector<1x256xf32> to vector<256xf32>
      %cst_168 = arith.constant 0.000000e+00 : f32
      %466 = vector.broadcast %cst_168 : f32 to vector<256xf32>
      %467 = arith.select %414, %465, %466 : vector<256xi1>, vector<256xf32>
      %468 = vector.broadcast %463 : f32 to vector<256xf32>
      %469 = arith.mulf %468, %467 : vector<256xf32>
      %470 = arith.addf %462, %469 : vector<256xf32>
      %c52 = arith.constant 52 : index
      %471 = memref.load %arg3[%c52] : memref<98xf32, #tpu.memory_space<smem>>
      %c1_169 = arith.constant 1 : index
      %c80_170 = arith.constant 80 : index
      %472 = vector.load %arg8[%c1_169, %c80_170] : memref<2x512xf32, #tpu.memory_space<vmem>>, vector<1x256xf32>
      %473 = vector.shape_cast %472 : vector<1x256xf32> to vector<256xf32>
      %cst_171 = arith.constant 0.000000e+00 : f32
      %474 = vector.broadcast %cst_171 : f32 to vector<256xf32>
      %475 = arith.select %414, %473, %474 : vector<256xi1>, vector<256xf32>
      %476 = vector.broadcast %471 : f32 to vector<256xf32>
      %477 = arith.mulf %476, %475 : vector<256xf32>
      %478 = arith.addf %470, %477 : vector<256xf32>
      %c59 = arith.constant 59 : index
      %479 = memref.load %arg3[%c59] : memref<98xf32, #tpu.memory_space<smem>>
      %c1_172 = arith.constant 1 : index
      %c96_173 = arith.constant 96 : index
      %480 = vector.load %arg8[%c1_172, %c96_173] : memref<2x512xf32, #tpu.memory_space<vmem>>, vector<1x256xf32>
      %481 = vector.shape_cast %480 : vector<1x256xf32> to vector<256xf32>
      %cst_174 = arith.constant 0.000000e+00 : f32
      %482 = vector.broadcast %cst_174 : f32 to vector<256xf32>
      %483 = arith.select %414, %481, %482 : vector<256xi1>, vector<256xf32>
      %484 = vector.broadcast %479 : f32 to vector<256xf32>
      %485 = arith.mulf %484, %483 : vector<256xf32>
      %486 = arith.addf %478, %485 : vector<256xf32>
      %c66 = arith.constant 66 : index
      %487 = memref.load %arg3[%c66] : memref<98xf32, #tpu.memory_space<smem>>
      %c1_175 = arith.constant 1 : index
      %c112_176 = arith.constant 112 : index
      %488 = vector.load %arg8[%c1_175, %c112_176] : memref<2x512xf32, #tpu.memory_space<vmem>>, vector<1x256xf32>
      %489 = vector.shape_cast %488 : vector<1x256xf32> to vector<256xf32>
      %cst_177 = arith.constant 0.000000e+00 : f32
      %490 = vector.broadcast %cst_177 : f32 to vector<256xf32>
      %491 = arith.select %414, %489, %490 : vector<256xi1>, vector<256xf32>
      %492 = vector.broadcast %487 : f32 to vector<256xf32>
      %493 = arith.mulf %492, %491 : vector<256xf32>
      %494 = arith.addf %486, %493 : vector<256xf32>
      %c73 = arith.constant 73 : index
      %495 = memref.load %arg3[%c73] : memref<98xf32, #tpu.memory_space<smem>>
      %c1_178 = arith.constant 1 : index
      %c128_179 = arith.constant 128 : index
      %496 = vector.load %arg8[%c1_178, %c128_179] : memref<2x512xf32, #tpu.memory_space<vmem>>, vector<1x256xf32>
      %497 = vector.shape_cast %496 : vector<1x256xf32> to vector<256xf32>
      %cst_180 = arith.constant 0.000000e+00 : f32
      %498 = vector.broadcast %cst_180 : f32 to vector<256xf32>
      %499 = arith.select %414, %497, %498 : vector<256xi1>, vector<256xf32>
      %500 = vector.broadcast %495 : f32 to vector<256xf32>
      %501 = arith.mulf %500, %499 : vector<256xf32>
      %502 = arith.addf %494, %501 : vector<256xf32>
      %c80_181 = arith.constant 80 : index
      %503 = memref.load %arg3[%c80_181] : memref<98xf32, #tpu.memory_space<smem>>
      %c1_182 = arith.constant 1 : index
      %c144_183 = arith.constant 144 : index
      %504 = vector.load %arg8[%c1_182, %c144_183] : memref<2x512xf32, #tpu.memory_space<vmem>>, vector<1x256xf32>
      %505 = vector.shape_cast %504 : vector<1x256xf32> to vector<256xf32>
      %cst_184 = arith.constant 0.000000e+00 : f32
      %506 = vector.broadcast %cst_184 : f32 to vector<256xf32>
      %507 = arith.select %414, %505, %506 : vector<256xi1>, vector<256xf32>
      %508 = vector.broadcast %503 : f32 to vector<256xf32>
      %509 = arith.mulf %508, %507 : vector<256xf32>
      %510 = arith.addf %502, %509 : vector<256xf32>
      %c87 = arith.constant 87 : index
      %511 = memref.load %arg3[%c87] : memref<98xf32, #tpu.memory_space<smem>>
      %c1_185 = arith.constant 1 : index
      %c160_186 = arith.constant 160 : index
      %512 = vector.load %arg8[%c1_185, %c160_186] : memref<2x512xf32, #tpu.memory_space<vmem>>, vector<1x256xf32>
      %513 = vector.shape_cast %512 : vector<1x256xf32> to vector<256xf32>
      %cst_187 = arith.constant 0.000000e+00 : f32
      %514 = vector.broadcast %cst_187 : f32 to vector<256xf32>
      %515 = arith.select %414, %513, %514 : vector<256xi1>, vector<256xf32>
      %516 = vector.broadcast %511 : f32 to vector<256xf32>
      %517 = arith.mulf %516, %515 : vector<256xf32>
      %518 = arith.addf %510, %517 : vector<256xf32>
      %c94_188 = arith.constant 94 : index
      %519 = memref.load %arg3[%c94_188] : memref<98xf32, #tpu.memory_space<smem>>
      %c1_189 = arith.constant 1 : index
      %c176_190 = arith.constant 176 : index
      %520 = vector.load %arg8[%c1_189, %c176_190] : memref<2x512xf32, #tpu.memory_space<vmem>>, vector<1x256xf32>
      %521 = vector.shape_cast %520 : vector<1x256xf32> to vector<256xf32>
      %cst_191 = arith.constant 0.000000e+00 : f32
      %522 = vector.broadcast %cst_191 : f32 to vector<256xf32>
      %523 = arith.select %414, %521, %522 : vector<256xi1>, vector<256xf32>
      %524 = vector.broadcast %519 : f32 to vector<256xf32>
      %525 = arith.mulf %524, %523 : vector<256xf32>
      %526 = arith.addf %518, %525 : vector<256xf32>
      %c1_i32_192 = arith.constant 1 : i32
      %527 = vector.broadcast %c1_i32_192 : i32 to vector<256xi32>
      %528 = arith.addi %41, %527 : vector<256xi32>
      %c0_i32_193 = arith.constant 0 : i32
      %529 = vector.broadcast %c0_i32_193 : i32 to vector<256xi32>
      %530 = arith.cmpi sge, %528, %529 : vector<256xi32>
      %c1_i32_194 = arith.constant 1 : i32
      %531 = vector.broadcast %c1_i32_194 : i32 to vector<256xi32>
      %532 = arith.addi %41, %531 : vector<256xi32>
      %c16_i32_195 = arith.constant 16 : i32
      %533 = vector.broadcast %c16_i32_195 : i32 to vector<256xi32>
      %534 = arith.cmpi slt, %532, %533 : vector<256xi32>
      %535 = arith.andi %530, %534 : vector<256xi1>
      %c4 = arith.constant 4 : index
      %536 = memref.load %arg3[%c4] : memref<98xf32, #tpu.memory_space<smem>>
      %c0_196 = arith.constant 0 : index
      %c81 = arith.constant 81 : index
      %537 = vector.load %arg8[%c0_196, %c81] : memref<2x512xf32, #tpu.memory_space<vmem>>, vector<1x256xf32>
      %538 = vector.shape_cast %537 : vector<1x256xf32> to vector<256xf32>
      %cst_197 = arith.constant 0.000000e+00 : f32
      %539 = vector.broadcast %cst_197 : f32 to vector<256xf32>
      %540 = arith.select %535, %538, %539 : vector<256xi1>, vector<256xf32>
      %541 = vector.broadcast %536 : f32 to vector<256xf32>
      %542 = arith.mulf %541, %540 : vector<256xf32>
      %543 = arith.addf %526, %542 : vector<256xf32>
      %c11 = arith.constant 11 : index
      %544 = memref.load %arg3[%c11] : memref<98xf32, #tpu.memory_space<smem>>
      %c0_198 = arith.constant 0 : index
      %c97 = arith.constant 97 : index
      %545 = vector.load %arg8[%c0_198, %c97] : memref<2x512xf32, #tpu.memory_space<vmem>>, vector<1x256xf32>
      %546 = vector.shape_cast %545 : vector<1x256xf32> to vector<256xf32>
      %cst_199 = arith.constant 0.000000e+00 : f32
      %547 = vector.broadcast %cst_199 : f32 to vector<256xf32>
      %548 = arith.select %535, %546, %547 : vector<256xi1>, vector<256xf32>
      %549 = vector.broadcast %544 : f32 to vector<256xf32>
      %550 = arith.mulf %549, %548 : vector<256xf32>
      %551 = arith.addf %543, %550 : vector<256xf32>
      %c18 = arith.constant 18 : index
      %552 = memref.load %arg3[%c18] : memref<98xf32, #tpu.memory_space<smem>>
      %c0_200 = arith.constant 0 : index
      %c113 = arith.constant 113 : index
      %553 = vector.load %arg8[%c0_200, %c113] : memref<2x512xf32, #tpu.memory_space<vmem>>, vector<1x256xf32>
      %554 = vector.shape_cast %553 : vector<1x256xf32> to vector<256xf32>
      %cst_201 = arith.constant 0.000000e+00 : f32
      %555 = vector.broadcast %cst_201 : f32 to vector<256xf32>
      %556 = arith.select %535, %554, %555 : vector<256xi1>, vector<256xf32>
      %557 = vector.broadcast %552 : f32 to vector<256xf32>
      %558 = arith.mulf %557, %556 : vector<256xf32>
      %559 = arith.addf %551, %558 : vector<256xf32>
      %c25 = arith.constant 25 : index
      %560 = memref.load %arg3[%c25] : memref<98xf32, #tpu.memory_space<smem>>
      %c0_202 = arith.constant 0 : index
      %c129 = arith.constant 129 : index
      %561 = vector.load %arg8[%c0_202, %c129] : memref<2x512xf32, #tpu.memory_space<vmem>>, vector<1x256xf32>
      %562 = vector.shape_cast %561 : vector<1x256xf32> to vector<256xf32>
      %cst_203 = arith.constant 0.000000e+00 : f32
      %563 = vector.broadcast %cst_203 : f32 to vector<256xf32>
      %564 = arith.select %535, %562, %563 : vector<256xi1>, vector<256xf32>
      %565 = vector.broadcast %560 : f32 to vector<256xf32>
      %566 = arith.mulf %565, %564 : vector<256xf32>
      %567 = arith.addf %559, %566 : vector<256xf32>
      %c32 = arith.constant 32 : index
      %568 = memref.load %arg3[%c32] : memref<98xf32, #tpu.memory_space<smem>>
      %c0_204 = arith.constant 0 : index
      %c145 = arith.constant 145 : index
      %569 = vector.load %arg8[%c0_204, %c145] : memref<2x512xf32, #tpu.memory_space<vmem>>, vector<1x256xf32>
      %570 = vector.shape_cast %569 : vector<1x256xf32> to vector<256xf32>
      %cst_205 = arith.constant 0.000000e+00 : f32
      %571 = vector.broadcast %cst_205 : f32 to vector<256xf32>
      %572 = arith.select %535, %570, %571 : vector<256xi1>, vector<256xf32>
      %573 = vector.broadcast %568 : f32 to vector<256xf32>
      %574 = arith.mulf %573, %572 : vector<256xf32>
      %575 = arith.addf %567, %574 : vector<256xf32>
      %c39 = arith.constant 39 : index
      %576 = memref.load %arg3[%c39] : memref<98xf32, #tpu.memory_space<smem>>
      %c0_206 = arith.constant 0 : index
      %c161 = arith.constant 161 : index
      %577 = vector.load %arg8[%c0_206, %c161] : memref<2x512xf32, #tpu.memory_space<vmem>>, vector<1x256xf32>
      %578 = vector.shape_cast %577 : vector<1x256xf32> to vector<256xf32>
      %cst_207 = arith.constant 0.000000e+00 : f32
      %579 = vector.broadcast %cst_207 : f32 to vector<256xf32>
      %580 = arith.select %535, %578, %579 : vector<256xi1>, vector<256xf32>
      %581 = vector.broadcast %576 : f32 to vector<256xf32>
      %582 = arith.mulf %581, %580 : vector<256xf32>
      %583 = arith.addf %575, %582 : vector<256xf32>
      %c46 = arith.constant 46 : index
      %584 = memref.load %arg3[%c46] : memref<98xf32, #tpu.memory_space<smem>>
      %c0_208 = arith.constant 0 : index
      %c177 = arith.constant 177 : index
      %585 = vector.load %arg8[%c0_208, %c177] : memref<2x512xf32, #tpu.memory_space<vmem>>, vector<1x256xf32>
      %586 = vector.shape_cast %585 : vector<1x256xf32> to vector<256xf32>
      %cst_209 = arith.constant 0.000000e+00 : f32
      %587 = vector.broadcast %cst_209 : f32 to vector<256xf32>
      %588 = arith.select %535, %586, %587 : vector<256xi1>, vector<256xf32>
      %589 = vector.broadcast %584 : f32 to vector<256xf32>
      %590 = arith.mulf %589, %588 : vector<256xf32>
      %591 = arith.addf %583, %590 : vector<256xf32>
      %c53 = arith.constant 53 : index
      %592 = memref.load %arg3[%c53] : memref<98xf32, #tpu.memory_space<smem>>
      %c1_210 = arith.constant 1 : index
      %c81_211 = arith.constant 81 : index
      %593 = vector.load %arg8[%c1_210, %c81_211] : memref<2x512xf32, #tpu.memory_space<vmem>>, vector<1x256xf32>
      %594 = vector.shape_cast %593 : vector<1x256xf32> to vector<256xf32>
      %cst_212 = arith.constant 0.000000e+00 : f32
      %595 = vector.broadcast %cst_212 : f32 to vector<256xf32>
      %596 = arith.select %535, %594, %595 : vector<256xi1>, vector<256xf32>
      %597 = vector.broadcast %592 : f32 to vector<256xf32>
      %598 = arith.mulf %597, %596 : vector<256xf32>
      %599 = arith.addf %591, %598 : vector<256xf32>
      %c60 = arith.constant 60 : index
      %600 = memref.load %arg3[%c60] : memref<98xf32, #tpu.memory_space<smem>>
      %c1_213 = arith.constant 1 : index
      %c97_214 = arith.constant 97 : index
      %601 = vector.load %arg8[%c1_213, %c97_214] : memref<2x512xf32, #tpu.memory_space<vmem>>, vector<1x256xf32>
      %602 = vector.shape_cast %601 : vector<1x256xf32> to vector<256xf32>
      %cst_215 = arith.constant 0.000000e+00 : f32
      %603 = vector.broadcast %cst_215 : f32 to vector<256xf32>
      %604 = arith.select %535, %602, %603 : vector<256xi1>, vector<256xf32>
      %605 = vector.broadcast %600 : f32 to vector<256xf32>
      %606 = arith.mulf %605, %604 : vector<256xf32>
      %607 = arith.addf %599, %606 : vector<256xf32>
      %c67 = arith.constant 67 : index
      %608 = memref.load %arg3[%c67] : memref<98xf32, #tpu.memory_space<smem>>
      %c1_216 = arith.constant 1 : index
      %c113_217 = arith.constant 113 : index
      %609 = vector.load %arg8[%c1_216, %c113_217] : memref<2x512xf32, #tpu.memory_space<vmem>>, vector<1x256xf32>
      %610 = vector.shape_cast %609 : vector<1x256xf32> to vector<256xf32>
      %cst_218 = arith.constant 0.000000e+00 : f32
      %611 = vector.broadcast %cst_218 : f32 to vector<256xf32>
      %612 = arith.select %535, %610, %611 : vector<256xi1>, vector<256xf32>
      %613 = vector.broadcast %608 : f32 to vector<256xf32>
      %614 = arith.mulf %613, %612 : vector<256xf32>
      %615 = arith.addf %607, %614 : vector<256xf32>
      %c74 = arith.constant 74 : index
      %616 = memref.load %arg3[%c74] : memref<98xf32, #tpu.memory_space<smem>>
      %c1_219 = arith.constant 1 : index
      %c129_220 = arith.constant 129 : index
      %617 = vector.load %arg8[%c1_219, %c129_220] : memref<2x512xf32, #tpu.memory_space<vmem>>, vector<1x256xf32>
      %618 = vector.shape_cast %617 : vector<1x256xf32> to vector<256xf32>
      %cst_221 = arith.constant 0.000000e+00 : f32
      %619 = vector.broadcast %cst_221 : f32 to vector<256xf32>
      %620 = arith.select %535, %618, %619 : vector<256xi1>, vector<256xf32>
      %621 = vector.broadcast %616 : f32 to vector<256xf32>
      %622 = arith.mulf %621, %620 : vector<256xf32>
      %623 = arith.addf %615, %622 : vector<256xf32>
      %c81_222 = arith.constant 81 : index
      %624 = memref.load %arg3[%c81_222] : memref<98xf32, #tpu.memory_space<smem>>
      %c1_223 = arith.constant 1 : index
      %c145_224 = arith.constant 145 : index
      %625 = vector.load %arg8[%c1_223, %c145_224] : memref<2x512xf32, #tpu.memory_space<vmem>>, vector<1x256xf32>
      %626 = vector.shape_cast %625 : vector<1x256xf32> to vector<256xf32>
      %cst_225 = arith.constant 0.000000e+00 : f32
      %627 = vector.broadcast %cst_225 : f32 to vector<256xf32>
      %628 = arith.select %535, %626, %627 : vector<256xi1>, vector<256xf32>
      %629 = vector.broadcast %624 : f32 to vector<256xf32>
      %630 = arith.mulf %629, %628 : vector<256xf32>
      %631 = arith.addf %623, %630 : vector<256xf32>
      %c88 = arith.constant 88 : index
      %632 = memref.load %arg3[%c88] : memref<98xf32, #tpu.memory_space<smem>>
      %c1_226 = arith.constant 1 : index
      %c161_227 = arith.constant 161 : index
      %633 = vector.load %arg8[%c1_226, %c161_227] : memref<2x512xf32, #tpu.memory_space<vmem>>, vector<1x256xf32>
      %634 = vector.shape_cast %633 : vector<1x256xf32> to vector<256xf32>
      %cst_228 = arith.constant 0.000000e+00 : f32
      %635 = vector.broadcast %cst_228 : f32 to vector<256xf32>
      %636 = arith.select %535, %634, %635 : vector<256xi1>, vector<256xf32>
      %637 = vector.broadcast %632 : f32 to vector<256xf32>
      %638 = arith.mulf %637, %636 : vector<256xf32>
      %639 = arith.addf %631, %638 : vector<256xf32>
      %c95_229 = arith.constant 95 : index
      %640 = memref.load %arg3[%c95_229] : memref<98xf32, #tpu.memory_space<smem>>
      %c1_230 = arith.constant 1 : index
      %c177_231 = arith.constant 177 : index
      %641 = vector.load %arg8[%c1_230, %c177_231] : memref<2x512xf32, #tpu.memory_space<vmem>>, vector<1x256xf32>
      %642 = vector.shape_cast %641 : vector<1x256xf32> to vector<256xf32>
      %cst_232 = arith.constant 0.000000e+00 : f32
      %643 = vector.broadcast %cst_232 : f32 to vector<256xf32>
      %644 = arith.select %535, %642, %643 : vector<256xi1>, vector<256xf32>
      %645 = vector.broadcast %640 : f32 to vector<256xf32>
      %646 = arith.mulf %645, %644 : vector<256xf32>
      %647 = arith.addf %639, %646 : vector<256xf32>
      %c2_i32 = arith.constant 2 : i32
      %648 = vector.broadcast %c2_i32 : i32 to vector<256xi32>
      %649 = arith.addi %41, %648 : vector<256xi32>
      %c0_i32_233 = arith.constant 0 : i32
      %650 = vector.broadcast %c0_i32_233 : i32 to vector<256xi32>
      %651 = arith.cmpi sge, %649, %650 : vector<256xi32>
      %c2_i32_234 = arith.constant 2 : i32
      %652 = vector.broadcast %c2_i32_234 : i32 to vector<256xi32>
      %653 = arith.addi %41, %652 : vector<256xi32>
      %c16_i32_235 = arith.constant 16 : i32
      %654 = vector.broadcast %c16_i32_235 : i32 to vector<256xi32>
      %655 = arith.cmpi slt, %653, %654 : vector<256xi32>
      %656 = arith.andi %651, %655 : vector<256xi1>
      %c5 = arith.constant 5 : index
      %657 = memref.load %arg3[%c5] : memref<98xf32, #tpu.memory_space<smem>>
      %c0_236 = arith.constant 0 : index
      %c82 = arith.constant 82 : index
      %658 = vector.load %arg8[%c0_236, %c82] : memref<2x512xf32, #tpu.memory_space<vmem>>, vector<1x256xf32>
      %659 = vector.shape_cast %658 : vector<1x256xf32> to vector<256xf32>
      %cst_237 = arith.constant 0.000000e+00 : f32
      %660 = vector.broadcast %cst_237 : f32 to vector<256xf32>
      %661 = arith.select %656, %659, %660 : vector<256xi1>, vector<256xf32>
      %662 = vector.broadcast %657 : f32 to vector<256xf32>
      %663 = arith.mulf %662, %661 : vector<256xf32>
      %664 = arith.addf %647, %663 : vector<256xf32>
      %c12 = arith.constant 12 : index
      %665 = memref.load %arg3[%c12] : memref<98xf32, #tpu.memory_space<smem>>
      %c0_238 = arith.constant 0 : index
      %c98 = arith.constant 98 : index
      %666 = vector.load %arg8[%c0_238, %c98] : memref<2x512xf32, #tpu.memory_space<vmem>>, vector<1x256xf32>
      %667 = vector.shape_cast %666 : vector<1x256xf32> to vector<256xf32>
      %cst_239 = arith.constant 0.000000e+00 : f32
      %668 = vector.broadcast %cst_239 : f32 to vector<256xf32>
      %669 = arith.select %656, %667, %668 : vector<256xi1>, vector<256xf32>
      %670 = vector.broadcast %665 : f32 to vector<256xf32>
      %671 = arith.mulf %670, %669 : vector<256xf32>
      %672 = arith.addf %664, %671 : vector<256xf32>
      %c19 = arith.constant 19 : index
      %673 = memref.load %arg3[%c19] : memref<98xf32, #tpu.memory_space<smem>>
      %c0_240 = arith.constant 0 : index
      %c114 = arith.constant 114 : index
      %674 = vector.load %arg8[%c0_240, %c114] : memref<2x512xf32, #tpu.memory_space<vmem>>, vector<1x256xf32>
      %675 = vector.shape_cast %674 : vector<1x256xf32> to vector<256xf32>
      %cst_241 = arith.constant 0.000000e+00 : f32
      %676 = vector.broadcast %cst_241 : f32 to vector<256xf32>
      %677 = arith.select %656, %675, %676 : vector<256xi1>, vector<256xf32>
      %678 = vector.broadcast %673 : f32 to vector<256xf32>
      %679 = arith.mulf %678, %677 : vector<256xf32>
      %680 = arith.addf %672, %679 : vector<256xf32>
      %c26 = arith.constant 26 : index
      %681 = memref.load %arg3[%c26] : memref<98xf32, #tpu.memory_space<smem>>
      %c0_242 = arith.constant 0 : index
      %c130 = arith.constant 130 : index
      %682 = vector.load %arg8[%c0_242, %c130] : memref<2x512xf32, #tpu.memory_space<vmem>>, vector<1x256xf32>
      %683 = vector.shape_cast %682 : vector<1x256xf32> to vector<256xf32>
      %cst_243 = arith.constant 0.000000e+00 : f32
      %684 = vector.broadcast %cst_243 : f32 to vector<256xf32>
      %685 = arith.select %656, %683, %684 : vector<256xi1>, vector<256xf32>
      %686 = vector.broadcast %681 : f32 to vector<256xf32>
      %687 = arith.mulf %686, %685 : vector<256xf32>
      %688 = arith.addf %680, %687 : vector<256xf32>
      %c33 = arith.constant 33 : index
      %689 = memref.load %arg3[%c33] : memref<98xf32, #tpu.memory_space<smem>>
      %c0_244 = arith.constant 0 : index
      %c146 = arith.constant 146 : index
      %690 = vector.load %arg8[%c0_244, %c146] : memref<2x512xf32, #tpu.memory_space<vmem>>, vector<1x256xf32>
      %691 = vector.shape_cast %690 : vector<1x256xf32> to vector<256xf32>
      %cst_245 = arith.constant 0.000000e+00 : f32
      %692 = vector.broadcast %cst_245 : f32 to vector<256xf32>
      %693 = arith.select %656, %691, %692 : vector<256xi1>, vector<256xf32>
      %694 = vector.broadcast %689 : f32 to vector<256xf32>
      %695 = arith.mulf %694, %693 : vector<256xf32>
      %696 = arith.addf %688, %695 : vector<256xf32>
      %c40 = arith.constant 40 : index
      %697 = memref.load %arg3[%c40] : memref<98xf32, #tpu.memory_space<smem>>
      %c0_246 = arith.constant 0 : index
      %c162 = arith.constant 162 : index
      %698 = vector.load %arg8[%c0_246, %c162] : memref<2x512xf32, #tpu.memory_space<vmem>>, vector<1x256xf32>
      %699 = vector.shape_cast %698 : vector<1x256xf32> to vector<256xf32>
      %cst_247 = arith.constant 0.000000e+00 : f32
      %700 = vector.broadcast %cst_247 : f32 to vector<256xf32>
      %701 = arith.select %656, %699, %700 : vector<256xi1>, vector<256xf32>
      %702 = vector.broadcast %697 : f32 to vector<256xf32>
      %703 = arith.mulf %702, %701 : vector<256xf32>
      %704 = arith.addf %696, %703 : vector<256xf32>
      %c47 = arith.constant 47 : index
      %705 = memref.load %arg3[%c47] : memref<98xf32, #tpu.memory_space<smem>>
      %c0_248 = arith.constant 0 : index
      %c178 = arith.constant 178 : index
      %706 = vector.load %arg8[%c0_248, %c178] : memref<2x512xf32, #tpu.memory_space<vmem>>, vector<1x256xf32>
      %707 = vector.shape_cast %706 : vector<1x256xf32> to vector<256xf32>
      %cst_249 = arith.constant 0.000000e+00 : f32
      %708 = vector.broadcast %cst_249 : f32 to vector<256xf32>
      %709 = arith.select %656, %707, %708 : vector<256xi1>, vector<256xf32>
      %710 = vector.broadcast %705 : f32 to vector<256xf32>
      %711 = arith.mulf %710, %709 : vector<256xf32>
      %712 = arith.addf %704, %711 : vector<256xf32>
      %c54 = arith.constant 54 : index
      %713 = memref.load %arg3[%c54] : memref<98xf32, #tpu.memory_space<smem>>
      %c1_250 = arith.constant 1 : index
      %c82_251 = arith.constant 82 : index
      %714 = vector.load %arg8[%c1_250, %c82_251] : memref<2x512xf32, #tpu.memory_space<vmem>>, vector<1x256xf32>
      %715 = vector.shape_cast %714 : vector<1x256xf32> to vector<256xf32>
      %cst_252 = arith.constant 0.000000e+00 : f32
      %716 = vector.broadcast %cst_252 : f32 to vector<256xf32>
      %717 = arith.select %656, %715, %716 : vector<256xi1>, vector<256xf32>
      %718 = vector.broadcast %713 : f32 to vector<256xf32>
      %719 = arith.mulf %718, %717 : vector<256xf32>
      %720 = arith.addf %712, %719 : vector<256xf32>
      %c61 = arith.constant 61 : index
      %721 = memref.load %arg3[%c61] : memref<98xf32, #tpu.memory_space<smem>>
      %c1_253 = arith.constant 1 : index
      %c98_254 = arith.constant 98 : index
      %722 = vector.load %arg8[%c1_253, %c98_254] : memref<2x512xf32, #tpu.memory_space<vmem>>, vector<1x256xf32>
      %723 = vector.shape_cast %722 : vector<1x256xf32> to vector<256xf32>
      %cst_255 = arith.constant 0.000000e+00 : f32
      %724 = vector.broadcast %cst_255 : f32 to vector<256xf32>
      %725 = arith.select %656, %723, %724 : vector<256xi1>, vector<256xf32>
      %726 = vector.broadcast %721 : f32 to vector<256xf32>
      %727 = arith.mulf %726, %725 : vector<256xf32>
      %728 = arith.addf %720, %727 : vector<256xf32>
      %c68 = arith.constant 68 : index
      %729 = memref.load %arg3[%c68] : memref<98xf32, #tpu.memory_space<smem>>
      %c1_256 = arith.constant 1 : index
      %c114_257 = arith.constant 114 : index
      %730 = vector.load %arg8[%c1_256, %c114_257] : memref<2x512xf32, #tpu.memory_space<vmem>>, vector<1x256xf32>
      %731 = vector.shape_cast %730 : vector<1x256xf32> to vector<256xf32>
      %cst_258 = arith.constant 0.000000e+00 : f32
      %732 = vector.broadcast %cst_258 : f32 to vector<256xf32>
      %733 = arith.select %656, %731, %732 : vector<256xi1>, vector<256xf32>
      %734 = vector.broadcast %729 : f32 to vector<256xf32>
      %735 = arith.mulf %734, %733 : vector<256xf32>
      %736 = arith.addf %728, %735 : vector<256xf32>
      %c75 = arith.constant 75 : index
      %737 = memref.load %arg3[%c75] : memref<98xf32, #tpu.memory_space<smem>>
      %c1_259 = arith.constant 1 : index
      %c130_260 = arith.constant 130 : index
      %738 = vector.load %arg8[%c1_259, %c130_260] : memref<2x512xf32, #tpu.memory_space<vmem>>, vector<1x256xf32>
      %739 = vector.shape_cast %738 : vector<1x256xf32> to vector<256xf32>
      %cst_261 = arith.constant 0.000000e+00 : f32
      %740 = vector.broadcast %cst_261 : f32 to vector<256xf32>
      %741 = arith.select %656, %739, %740 : vector<256xi1>, vector<256xf32>
      %742 = vector.broadcast %737 : f32 to vector<256xf32>
      %743 = arith.mulf %742, %741 : vector<256xf32>
      %744 = arith.addf %736, %743 : vector<256xf32>
      %c82_262 = arith.constant 82 : index
      %745 = memref.load %arg3[%c82_262] : memref<98xf32, #tpu.memory_space<smem>>
      %c1_263 = arith.constant 1 : index
      %c146_264 = arith.constant 146 : index
      %746 = vector.load %arg8[%c1_263, %c146_264] : memref<2x512xf32, #tpu.memory_space<vmem>>, vector<1x256xf32>
      %747 = vector.shape_cast %746 : vector<1x256xf32> to vector<256xf32>
      %cst_265 = arith.constant 0.000000e+00 : f32
      %748 = vector.broadcast %cst_265 : f32 to vector<256xf32>
      %749 = arith.select %656, %747, %748 : vector<256xi1>, vector<256xf32>
      %750 = vector.broadcast %745 : f32 to vector<256xf32>
      %751 = arith.mulf %750, %749 : vector<256xf32>
      %752 = arith.addf %744, %751 : vector<256xf32>
      %c89 = arith.constant 89 : index
      %753 = memref.load %arg3[%c89] : memref<98xf32, #tpu.memory_space<smem>>
      %c1_266 = arith.constant 1 : index
      %c162_267 = arith.constant 162 : index
      %754 = vector.load %arg8[%c1_266, %c162_267] : memref<2x512xf32, #tpu.memory_space<vmem>>, vector<1x256xf32>
      %755 = vector.shape_cast %754 : vector<1x256xf32> to vector<256xf32>
      %cst_268 = arith.constant 0.000000e+00 : f32
      %756 = vector.broadcast %cst_268 : f32 to vector<256xf32>
      %757 = arith.select %656, %755, %756 : vector<256xi1>, vector<256xf32>
      %758 = vector.broadcast %753 : f32 to vector<256xf32>
      %759 = arith.mulf %758, %757 : vector<256xf32>
      %760 = arith.addf %752, %759 : vector<256xf32>
      %c96_269 = arith.constant 96 : index
      %761 = memref.load %arg3[%c96_269] : memref<98xf32, #tpu.memory_space<smem>>
      %c1_270 = arith.constant 1 : index
      %c178_271 = arith.constant 178 : index
      %762 = vector.load %arg8[%c1_270, %c178_271] : memref<2x512xf32, #tpu.memory_space<vmem>>, vector<1x256xf32>
      %763 = vector.shape_cast %762 : vector<1x256xf32> to vector<256xf32>
      %cst_272 = arith.constant 0.000000e+00 : f32
      %764 = vector.broadcast %cst_272 : f32 to vector<256xf32>
      %765 = arith.select %656, %763, %764 : vector<256xi1>, vector<256xf32>
      %766 = vector.broadcast %761 : f32 to vector<256xf32>
      %767 = arith.mulf %766, %765 : vector<256xf32>
      %768 = arith.addf %760, %767 : vector<256xf32>
      %c3_i32_273 = arith.constant 3 : i32
      %769 = vector.broadcast %c3_i32_273 : i32 to vector<256xi32>
      %770 = arith.addi %41, %769 : vector<256xi32>
      %c0_i32_274 = arith.constant 0 : i32
      %771 = vector.broadcast %c0_i32_274 : i32 to vector<256xi32>
      %772 = arith.cmpi sge, %770, %771 : vector<256xi32>
      %c3_i32_275 = arith.constant 3 : i32
      %773 = vector.broadcast %c3_i32_275 : i32 to vector<256xi32>
      %774 = arith.addi %41, %773 : vector<256xi32>
      %c16_i32_276 = arith.constant 16 : i32
      %775 = vector.broadcast %c16_i32_276 : i32 to vector<256xi32>
      %776 = arith.cmpi slt, %774, %775 : vector<256xi32>
      %777 = arith.andi %772, %776 : vector<256xi1>
      %c6 = arith.constant 6 : index
      %778 = memref.load %arg3[%c6] : memref<98xf32, #tpu.memory_space<smem>>
      %c0_277 = arith.constant 0 : index
      %c83 = arith.constant 83 : index
      %779 = vector.load %arg8[%c0_277, %c83] : memref<2x512xf32, #tpu.memory_space<vmem>>, vector<1x256xf32>
      %780 = vector.shape_cast %779 : vector<1x256xf32> to vector<256xf32>
      %cst_278 = arith.constant 0.000000e+00 : f32
      %781 = vector.broadcast %cst_278 : f32 to vector<256xf32>
      %782 = arith.select %777, %780, %781 : vector<256xi1>, vector<256xf32>
      %783 = vector.broadcast %778 : f32 to vector<256xf32>
      %784 = arith.mulf %783, %782 : vector<256xf32>
      %785 = arith.addf %768, %784 : vector<256xf32>
      %c13 = arith.constant 13 : index
      %786 = memref.load %arg3[%c13] : memref<98xf32, #tpu.memory_space<smem>>
      %c0_279 = arith.constant 0 : index
      %c99 = arith.constant 99 : index
      %787 = vector.load %arg8[%c0_279, %c99] : memref<2x512xf32, #tpu.memory_space<vmem>>, vector<1x256xf32>
      %788 = vector.shape_cast %787 : vector<1x256xf32> to vector<256xf32>
      %cst_280 = arith.constant 0.000000e+00 : f32
      %789 = vector.broadcast %cst_280 : f32 to vector<256xf32>
      %790 = arith.select %777, %788, %789 : vector<256xi1>, vector<256xf32>
      %791 = vector.broadcast %786 : f32 to vector<256xf32>
      %792 = arith.mulf %791, %790 : vector<256xf32>
      %793 = arith.addf %785, %792 : vector<256xf32>
      %c20 = arith.constant 20 : index
      %794 = memref.load %arg3[%c20] : memref<98xf32, #tpu.memory_space<smem>>
      %c0_281 = arith.constant 0 : index
      %c115 = arith.constant 115 : index
      %795 = vector.load %arg8[%c0_281, %c115] : memref<2x512xf32, #tpu.memory_space<vmem>>, vector<1x256xf32>
      %796 = vector.shape_cast %795 : vector<1x256xf32> to vector<256xf32>
      %cst_282 = arith.constant 0.000000e+00 : f32
      %797 = vector.broadcast %cst_282 : f32 to vector<256xf32>
      %798 = arith.select %777, %796, %797 : vector<256xi1>, vector<256xf32>
      %799 = vector.broadcast %794 : f32 to vector<256xf32>
      %800 = arith.mulf %799, %798 : vector<256xf32>
      %801 = arith.addf %793, %800 : vector<256xf32>
      %c27 = arith.constant 27 : index
      %802 = memref.load %arg3[%c27] : memref<98xf32, #tpu.memory_space<smem>>
      %c0_283 = arith.constant 0 : index
      %c131 = arith.constant 131 : index
      %803 = vector.load %arg8[%c0_283, %c131] : memref<2x512xf32, #tpu.memory_space<vmem>>, vector<1x256xf32>
      %804 = vector.shape_cast %803 : vector<1x256xf32> to vector<256xf32>
      %cst_284 = arith.constant 0.000000e+00 : f32
      %805 = vector.broadcast %cst_284 : f32 to vector<256xf32>
      %806 = arith.select %777, %804, %805 : vector<256xi1>, vector<256xf32>
      %807 = vector.broadcast %802 : f32 to vector<256xf32>
      %808 = arith.mulf %807, %806 : vector<256xf32>
      %809 = arith.addf %801, %808 : vector<256xf32>
      %c34 = arith.constant 34 : index
      %810 = memref.load %arg3[%c34] : memref<98xf32, #tpu.memory_space<smem>>
      %c0_285 = arith.constant 0 : index
      %c147 = arith.constant 147 : index
      %811 = vector.load %arg8[%c0_285, %c147] : memref<2x512xf32, #tpu.memory_space<vmem>>, vector<1x256xf32>
      %812 = vector.shape_cast %811 : vector<1x256xf32> to vector<256xf32>
      %cst_286 = arith.constant 0.000000e+00 : f32
      %813 = vector.broadcast %cst_286 : f32 to vector<256xf32>
      %814 = arith.select %777, %812, %813 : vector<256xi1>, vector<256xf32>
      %815 = vector.broadcast %810 : f32 to vector<256xf32>
      %816 = arith.mulf %815, %814 : vector<256xf32>
      %817 = arith.addf %809, %816 : vector<256xf32>
      %c41 = arith.constant 41 : index
      %818 = memref.load %arg3[%c41] : memref<98xf32, #tpu.memory_space<smem>>
      %c0_287 = arith.constant 0 : index
      %c163 = arith.constant 163 : index
      %819 = vector.load %arg8[%c0_287, %c163] : memref<2x512xf32, #tpu.memory_space<vmem>>, vector<1x256xf32>
      %820 = vector.shape_cast %819 : vector<1x256xf32> to vector<256xf32>
      %cst_288 = arith.constant 0.000000e+00 : f32
      %821 = vector.broadcast %cst_288 : f32 to vector<256xf32>
      %822 = arith.select %777, %820, %821 : vector<256xi1>, vector<256xf32>
      %823 = vector.broadcast %818 : f32 to vector<256xf32>
      %824 = arith.mulf %823, %822 : vector<256xf32>
      %825 = arith.addf %817, %824 : vector<256xf32>
      %c48 = arith.constant 48 : index
      %826 = memref.load %arg3[%c48] : memref<98xf32, #tpu.memory_space<smem>>
      %c0_289 = arith.constant 0 : index
      %c179 = arith.constant 179 : index
      %827 = vector.load %arg8[%c0_289, %c179] : memref<2x512xf32, #tpu.memory_space<vmem>>, vector<1x256xf32>
      %828 = vector.shape_cast %827 : vector<1x256xf32> to vector<256xf32>
      %cst_290 = arith.constant 0.000000e+00 : f32
      %829 = vector.broadcast %cst_290 : f32 to vector<256xf32>
      %830 = arith.select %777, %828, %829 : vector<256xi1>, vector<256xf32>
      %831 = vector.broadcast %826 : f32 to vector<256xf32>
      %832 = arith.mulf %831, %830 : vector<256xf32>
      %833 = arith.addf %825, %832 : vector<256xf32>
      %c55 = arith.constant 55 : index
      %834 = memref.load %arg3[%c55] : memref<98xf32, #tpu.memory_space<smem>>
      %c1_291 = arith.constant 1 : index
      %c83_292 = arith.constant 83 : index
      %835 = vector.load %arg8[%c1_291, %c83_292] : memref<2x512xf32, #tpu.memory_space<vmem>>, vector<1x256xf32>
      %836 = vector.shape_cast %835 : vector<1x256xf32> to vector<256xf32>
      %cst_293 = arith.constant 0.000000e+00 : f32
      %837 = vector.broadcast %cst_293 : f32 to vector<256xf32>
      %838 = arith.select %777, %836, %837 : vector<256xi1>, vector<256xf32>
      %839 = vector.broadcast %834 : f32 to vector<256xf32>
      %840 = arith.mulf %839, %838 : vector<256xf32>
      %841 = arith.addf %833, %840 : vector<256xf32>
      %c62 = arith.constant 62 : index
      %842 = memref.load %arg3[%c62] : memref<98xf32, #tpu.memory_space<smem>>
      %c1_294 = arith.constant 1 : index
      %c99_295 = arith.constant 99 : index
      %843 = vector.load %arg8[%c1_294, %c99_295] : memref<2x512xf32, #tpu.memory_space<vmem>>, vector<1x256xf32>
      %844 = vector.shape_cast %843 : vector<1x256xf32> to vector<256xf32>
      %cst_296 = arith.constant 0.000000e+00 : f32
      %845 = vector.broadcast %cst_296 : f32 to vector<256xf32>
      %846 = arith.select %777, %844, %845 : vector<256xi1>, vector<256xf32>
      %847 = vector.broadcast %842 : f32 to vector<256xf32>
      %848 = arith.mulf %847, %846 : vector<256xf32>
      %849 = arith.addf %841, %848 : vector<256xf32>
      %c69 = arith.constant 69 : index
      %850 = memref.load %arg3[%c69] : memref<98xf32, #tpu.memory_space<smem>>
      %c1_297 = arith.constant 1 : index
      %c115_298 = arith.constant 115 : index
      %851 = vector.load %arg8[%c1_297, %c115_298] : memref<2x512xf32, #tpu.memory_space<vmem>>, vector<1x256xf32>
      %852 = vector.shape_cast %851 : vector<1x256xf32> to vector<256xf32>
      %cst_299 = arith.constant 0.000000e+00 : f32
      %853 = vector.broadcast %cst_299 : f32 to vector<256xf32>
      %854 = arith.select %777, %852, %853 : vector<256xi1>, vector<256xf32>
      %855 = vector.broadcast %850 : f32 to vector<256xf32>
      %856 = arith.mulf %855, %854 : vector<256xf32>
      %857 = arith.addf %849, %856 : vector<256xf32>
      %c76 = arith.constant 76 : index
      %858 = memref.load %arg3[%c76] : memref<98xf32, #tpu.memory_space<smem>>
      %c1_300 = arith.constant 1 : index
      %c131_301 = arith.constant 131 : index
      %859 = vector.load %arg8[%c1_300, %c131_301] : memref<2x512xf32, #tpu.memory_space<vmem>>, vector<1x256xf32>
      %860 = vector.shape_cast %859 : vector<1x256xf32> to vector<256xf32>
      %cst_302 = arith.constant 0.000000e+00 : f32
      %861 = vector.broadcast %cst_302 : f32 to vector<256xf32>
      %862 = arith.select %777, %860, %861 : vector<256xi1>, vector<256xf32>
      %863 = vector.broadcast %858 : f32 to vector<256xf32>
      %864 = arith.mulf %863, %862 : vector<256xf32>
      %865 = arith.addf %857, %864 : vector<256xf32>
      %c83_303 = arith.constant 83 : index
      %866 = memref.load %arg3[%c83_303] : memref<98xf32, #tpu.memory_space<smem>>
      %c1_304 = arith.constant 1 : index
      %c147_305 = arith.constant 147 : index
      %867 = vector.load %arg8[%c1_304, %c147_305] : memref<2x512xf32, #tpu.memory_space<vmem>>, vector<1x256xf32>
      %868 = vector.shape_cast %867 : vector<1x256xf32> to vector<256xf32>
      %cst_306 = arith.constant 0.000000e+00 : f32
      %869 = vector.broadcast %cst_306 : f32 to vector<256xf32>
      %870 = arith.select %777, %868, %869 : vector<256xi1>, vector<256xf32>
      %871 = vector.broadcast %866 : f32 to vector<256xf32>
      %872 = arith.mulf %871, %870 : vector<256xf32>
      %873 = arith.addf %865, %872 : vector<256xf32>
      %c90 = arith.constant 90 : index
      %874 = memref.load %arg3[%c90] : memref<98xf32, #tpu.memory_space<smem>>
      %c1_307 = arith.constant 1 : index
      %c163_308 = arith.constant 163 : index
      %875 = vector.load %arg8[%c1_307, %c163_308] : memref<2x512xf32, #tpu.memory_space<vmem>>, vector<1x256xf32>
      %876 = vector.shape_cast %875 : vector<1x256xf32> to vector<256xf32>
      %cst_309 = arith.constant 0.000000e+00 : f32
      %877 = vector.broadcast %cst_309 : f32 to vector<256xf32>
      %878 = arith.select %777, %876, %877 : vector<256xi1>, vector<256xf32>
      %879 = vector.broadcast %874 : f32 to vector<256xf32>
      %880 = arith.mulf %879, %878 : vector<256xf32>
      %881 = arith.addf %873, %880 : vector<256xf32>
      %c97_310 = arith.constant 97 : index
      %882 = memref.load %arg3[%c97_310] : memref<98xf32, #tpu.memory_space<smem>>
      %c1_311 = arith.constant 1 : index
      %c179_312 = arith.constant 179 : index
      %883 = vector.load %arg8[%c1_311, %c179_312] : memref<2x512xf32, #tpu.memory_space<vmem>>, vector<1x256xf32>
      %884 = vector.shape_cast %883 : vector<1x256xf32> to vector<256xf32>
      %cst_313 = arith.constant 0.000000e+00 : f32
      %885 = vector.broadcast %cst_313 : f32 to vector<256xf32>
      %886 = arith.select %777, %884, %885 : vector<256xi1>, vector<256xf32>
      %887 = vector.broadcast %882 : f32 to vector<256xf32>
      %888 = arith.mulf %887, %886 : vector<256xf32>
      %889 = arith.addf %881, %888 : vector<256xf32>
      %890 = arith.negf %889 : vector<256xf32>
      %891 = math.exp %890 : vector<256xf32>
      %cst_314 = arith.constant 1.000000e+00 : f32
      %892 = vector.broadcast %cst_314 : f32 to vector<256xf32>
      %893 = arith.addf %892, %891 : vector<256xf32>
      %894 = arith.divf %892, %893 : vector<256xf32>
      %c0_315 = arith.constant 0 : index
      %c0_316 = arith.constant 0 : index
      %c0_317 = arith.constant 0 : index
      %895 = vector.load %arg5[%c0_315, %c0_316, %c0_317] : memref<1x1x256xf32, #tpu.memory_space<vmem>>, vector<1x1x256xf32>
      %896 = vector.shape_cast %895 : vector<1x1x256xf32> to vector<256xf32>
      %897 = vector.shape_cast %894 : vector<256xf32> to vector<1x1x256xf32>
      tpu.vector_store %arg5[%c0_315, %c0_316, %c0_317], %897 {strides = array<i32>} : memref<1x1x256xf32, #tpu.memory_space<vmem>>, vector<1x1x256xf32>,
    } else {
    }
    return
  }
  func.func @transform_0(%arg0: i32, %arg1: i32) -> (i32, i32, i32) {
    %c0_i32 = arith.constant 0 : i32
    %c0_i32_0 = arith.constant 0 : i32
    return %arg0, %arg1, %c0_i32 : i32, i32, i32
  }
  func.func @transform_1(%arg0: i32, %arg1: i32) -> i32 {
    %c0_i32 = arith.constant 0 : i32
    %c0_i32_0 = arith.constant 0 : i32
    return %c0_i32 : i32
  }
  func.func @transform_2(%arg0: i32, %arg1: i32) -> (i32, i32) {
    %c0_i32 = arith.constant 0 : i32
    %c0_i32_0 = arith.constant 0 : i32
    %c0_i32_1 = arith.constant 0 : i32
    return %c0_i32, %c0_i32_0 : i32, i32
  }
  func.func @transform_3(%arg0: i32, %arg1: i32) -> (i32, i32, i32) {
    %c0_i32 = arith.constant 0 : i32
    %c0_i32_0 = arith.constant 0 : i32
    %c0_i32_1 = arith.constant 0 : i32
    return %arg0, %c0_i32, %c0_i32_0 : i32, i32, i32
  }
}

</mosaic_0001>

<bundles_post_ra>
// kernel: tpu_custom_call.1
= control target key start
LH: loop header
LB: loop body
LE: loop exit
PB: predicated region body
PF: predicated region fallthrough
CT: control target
= control target key end

     0   :  { %s3106_s0 = inlined_call_operand.hbm [shape: f32[2,64,256], index: 0, kind: input, shape index: {}]   ;;  %s3107_s1 = inlined_call_operand.vmem [shape: f32[98], index: 1, kind: input, shape index: {}]   ;;  %s3108_s2 = inlined_call_operand.vmem [shape: s32[1,256], index: 2, kind: input, shape index: {}]   ;;  %s3109_s3 = inlined_call_operand.hbm [shape: f32[2,1,256], index: 3, kind: output, shape index: {}]  }
   0x1   :  { %3118 = sst [smem:[#allocation19_spill]] %s3107_s1 }
   0x2   :  { %8 = vsyncpa [#allocation6], 0 }
   0x3   :  { %10 = vsyncpa [#allocation6 + $0x1], 0 }
   0x4   :  { %11 = vsyncpa [#allocation8], 0 }
   0x5   :  { %12 = vsyncpa [#allocation7], 0 }
   0x6   :  { %14 = vsyncpa [#allocation7 + $0x1], 0  ;;  %s2057_s12 = smov 0   ;;  %s2059_s13 = smov 0  }
   0x7   :  { %s2061_s14 = smov 0   ;;  %s2063_s15 = smov 0  }
   0x8   :  { %s2065_s16 = smov 0   ;;  %s2067_s17 = smov 0  }
   0x9   :  { %s2069_s18 = smov 0   ;;  %s2071_s19 = smov 0  }
   0xa   :  { %s2073_s20 = smov 0   ;;  %s2075_s21 = smov 0  }
   0xb   :  { %s2077_s22 = smov 0  }
   0xc LB: > { %3119 = sst [smem:[#allocation14_spill]] %s1938_s12  ;;  %s1512_s23 = sadd.s32 4294967295, %s1978_s22   ;;  %s1978_s22 = sphi %s2077_s22, %s20_s22   ;;  %s1974_s21 = sphi %s2075_s21, %s3166_s21   ;;  %s1970_s20 = sphi %s2073_s20, %s3157_s20   ;;  %s1966_s19 = sphi %s2071_s19, %s3165_s19   ;;  %s1962_s18 = sphi %s2069_s18, %s3156_s18   ;;  %s1958_s17 = sphi %s2067_s17, %s3164_s17   ;;  %s1954_s16 = sphi %s2065_s16, %s3163_s16   ;;  %s1950_s15 = sphi %s2063_s15, %s3162_s15   ;;  %s1946_s14 = sphi %s2061_s14, %s3161_s14   ;;  %s1942_s13 = sphi %s2059_s13, %s3160_s13   ;;  %s1938_s12 = sphi %s2057_s12, %s3159_s12  }
   0xd   : > { %3120 = sst [smem:[#allocation15_spill]] %s1970_s20  ;;  %s1513_s24 = sadd.s32 4294967294, %s1978_s22  }
   0xe   : > { %p48_p0 = scmp.ne.s32.totalorder %s1958_s17, %s1954_s16  ;;  %p49_p1 = scmp.eq.s32.totalorder %s1978_s22, 0 }
   0xf   : > { %p54_p2 = scmp.ne.s32.totalorder %s1954_s16, %s1950_s15  ;;  %p2117_p3 = scmp.eq.s32.totalorder %s1512_s23, 0 }
  0x10   : > { %p2122_p4 = por %p49_p1, %p48_p0  ;;  %p119_p5 = scmp.ne.s32.totalorder %s1946_s14, %s1942_s13 }
  0x11   : > { %p2130_p6 = por %p2117_p3, %p54_p2  ;;  %p120_p7 = scmp.eq.s32.totalorder %s1512_s23, 7 }
  0x12   : > { %p125_p8 = scmp.ne.s32.totalorder %s1942_s13, %s1938_s12  ;;  %p126_p9 = scmp.eq.s32.totalorder %s1513_s24, 7 }
  0x13   : > { %s3123_s29 = scalar_select %p2130_p6, 1, 0 }
  0x14   : > { %p2136_p10 = por %p120_p7, %p119_p5  ;;  %p1514_p11 = scmp.ge.s32.totalorder %s1978_s22, 1 }
  0x15   : > { %p2141_p12 = por %p126_p9, %p125_p8  ;;  %p133_p13 = scmp.lt.s32.totalorder %s1978_s22, 9 }
  0x16   : > { %s3124_s30 = scalar_select %p2136_p10, 1, 0 }
  0x17   : > { %s3125_s4 = scalar_select %p2141_p12, 1, 0 }
  0x18   : > { %s3127_s1 = sld [smem:[#allocation19_spill]]  ;;  %p2149_p0 = pnand %p1514_p11, %p133_p13 }
  0x19   : > { %3126 = sst [smem:[#allocation16_spill]] %s3125_s4  ;;  %p1656_p2 = scmp.lt.s32.totalorder %s1978_s22, 8 }
  0x1a   : > { %s3128_s8 = scalar_select %p2149_p0, 1, 0 }
  0x1b   : > { %p1643_p1 = pneg %p2149_p0  ;;  %p2160_p7 = pnand %p1656_p2, %p2122_p4 }
  0x1d   : > { %p1644_p5 = pnand %p1643_p1, %p2117_p3 }
  0x1e   : > { %s146_s7 = sshll.u32 %s3127_s1, 4  ;;  %s147_s7 = int_to_ptr.vmem [resolvable:$true] %s146_s7 }
  0x1f   : > { %s1807_s10 = scalar_lea.vmem %s147_s7, 16  ;;  %p1809_p9 = pneg %p1644_p5 }
  0x20   : > { %p1808_p8 = scmp.ne.s32.totalorder %s147_s7, %s1807_s10  ;;  %p1815_p13 = scmp.lt.s32.totalorder %s147_s7, %s147_s7 }
  0x21   : > { %p1816_p10 = scmp.lt.s32.totalorder %s1807_s10, %s1807_s10 }
  0x22   : > { %p1810_p12 = pnand %p1809_p9, %p1808_p8 }
  0x23   : > { %p1817_p6 = por %p1816_p10, %p1815_p13 }
  0x24   : > { %p1811_p11 = pneg %p1810_p12 }
  0x26   : > { %p1818_p0 = pnand %p1817_p6, %p1811_p11 }
  0x28   : > { %1821 = shalt.err (!%p1818_p0)
}
  0x29   : > { %s1980_s11 = smov [#allocation9]   ;;  %s29_s15 = sadd.s32 1, %s1970_s20 }
  0x2a   : > { %1646 = dma.vmem_to_smem (!%p1644_p5), %s147_s7, 16, %s1980_s11, [#allocation8]  }
  0x2b   : > { %s32_s23 = sadd.s32 1, %s1974_s21  ;;  %p30_p4 = scmp.ge.s32.totalorder %s29_s15, 4 }
  0x2c   : > { %s160_s24 = sand.u32 1, %s1958_s17   ;;  %s1633_s6 = sshll.u32 %s1970_s20, 2 }
  0x2d   : > { %s1517_s28 = sshll.u32 %s160_s24, 5  ;;  %s3168_s15 = smov (%p30_p4, %s29_s15), 0 }
  0x2e   : > { %3130 = sst [smem:[#allocation17_spill]] %s3168_s15  ;;  %s3170_s23 = smov (!%p30_p4, %s32_s23), %s1974_s21 }
  0x2f   : > { %s37_s5 = ssub.s32 %s1970_s20, %s3168_s15  ;;  %p34_p6 = scmp.ge.s32.totalorder %s3170_s23, 2 }
  0x30   : > { %s1520_s10 = sshll.u32 %s1974_s21, 4  ;;  %s164_s25 = scalar_lea.vmem [#allocation5], %s1517_s28 }
  0x31   : > { %s174_s7 = sshll.u32 %s164_s25, 4  ;;  %s3172_s23 = smov (%p34_p6, %s3170_s23), 0  ;;  %s2176_s7 = int_to_ptr.vmem [resolvable:$true] %s174_s7 }
  0x32   : > { %3131 = sst [smem:[#allocation18_spill]] %s3172_s23  ;;  %s171_s11 = sadd.s32 %s1633_s6, %s1520_s10 }
  0x33   : > { %s36_s27 = ssub.s32 %s1974_s21, %s3172_s23  ;;  %s1521_s1 = sshll.u32 %s171_s11, 7 }
  0x34   : > { %s38_s4 = sor.u32 %s37_s5, %s36_s27  ;;  %p107_p10 = scmp.eq.s32.totalorder %s36_s27, 0 }
  0x35   : > { %p39_p12 = scmp.eq.s32.totalorder %s38_s4, 0  ;;  %s2183_s20 = scalar_lea.hbm %s3106_s0, %s1521_s1 }
  0x36   : > { %s3132_s28 = sadd.s32 1, %s1946_s14  ;;  %s3133_s6 = sadd.s32 1, %s1958_s17 }
  0x37   : > { %s2188_s25 = scalar_select %p107_p10, %s1946_s14, %s3132_s28  }
  0x38   : > { %s2193_s10 = scalar_select %p39_p12, %s1958_s17, %s3133_s6  }
  0x39   : > { %s2195_s23 = scalar_lea.sflag [#allocation6], %s160_s24  ;;  %s1822_s5 = scalar_lea.hbm %s2183_s20, 512 }
  0x3a   : > { %p1823_p0 = scmp.ne.s32.totalorder %s2183_s20, %s1822_s5  ;;  %p1824_p1 = pneg %p2160_p7 }
  0x3b   : > { %s1827_s27 = scalar_lea.hbm %s3106_s0, 4096  ;;  %p1828_p8 = scmp.lt.u32.totalorder %s2183_s20, %s3106_s0 }
  0x3c   : > { %p1825_p2 = pnand %p1824_p1, %p1823_p0  ;;  %p1829_p9 = scmp.lt.u32.totalorder %s1827_s27, %s1822_s5 }
  0x3d   : > { %p1831_p13 = scmp.lt.u32.totalorder %s1822_s5, %s2183_s20 }
  0x3e   : > { %p1826_p5 = pneg %p1825_p2  ;;  %p1830_p11 = por %p1829_p9, %p1828_p8 }
  0x40   : > { %p1832_p4 = por %p1831_p13, %p1830_p11 }
  0x42   : > { %p1833_p6 = pnand %p1832_p4, %p1826_p5 }
  0x44   : > { %1836 = shalt.err (!%p1833_p6)
}
  0x45   : > { %s1837_s24 = scalar_lea.vmem %s2176_s7, 512  ;;  %s1981_s11 = smov [#allocation5]  }
  0x46   : > { %p1838_p10 = scmp.ne.s32.totalorder %s2176_s7, %s1837_s24  ;;  %s1842_s28 = sshll.u32 %s1981_s11, 4  ;;  %s1843_s28 = int_to_ptr.vmem [resolvable:$false] %s1842_s28 }
  0x47   : > { %s1844_s6 = scalar_lea.vmem %s1843_s28, 1024  ;;  %p1845_p2 = scmp.lt.s32.totalorder %s2176_s7, %s1843_s28 }
  0x48   : > { %p1840_p12 = pnand %p1838_p10, %p1824_p1  ;;  %p1846_p8 = scmp.lt.s32.totalorder %s1844_s6, %s1837_s24 }
  0x4a   : > { %p1841_p0 = pneg %p1840_p12  ;;  %p1847_p9 = por %p1846_p8, %p1845_p2 }
  0x4c   : > { %p1848_p11 = pnand %p1847_p9, %p1841_p0 }
  0x4e   : > { %1851 = shalt.err (!%p1848_p11)
}
  0x4f   : > { %s1982_s5 = smov 256   ;;  %s1983_s1 = smov 16  }
  0x50   : > { %1650 = dma.hbm_to_vmem [thread:$0]  (!%p2160_p7), %s2183_s20, 512, %s2176_s7, %s2195_s23, %s1982_s5, %s1982_s5, %s1983_s1  }
  0x51   : > { %p3134_p1 = scmp.ne.s32.totalorder %s3128_s8, 0 }
  0x52   : > { %s188_s12 = sand.u32 (!%p3134_p1), 1, %s1954_s16   ;;  %p3135_p5 = scmp.ne.s32.totalorder (!%p3134_p1), %s3123_s29, 0 }
  0x53   : > { %186 = sbr.rel (%p3134_p1) target bundleno = 517 (0x205), region = 32  ;;  %s1523_s27 = sshll.u32 (!%p3134_p1), %s188_s12, 5 }
  0x54   : > { %s189_s4 = scalar_lea.sflag (!%p3134_p1), [#allocation6], %s188_s12  ;;  %s192_s15 = scalar_lea.vmem (!%p3134_p1), [#allocation5], %s1523_s27 }
  0x5a   : > { %1925 = dma.done.wait (%p3135_p5), %s189_s4, 512  }
  0x5b   : > { %1927 = vsyncadd (%p3135_p5), %s189_s4, 4294966784 }
  0x5c   : > { %1929 = dma.done.wait (%p2117_p3), [#allocation8], 16  }
  0x5d   : > { %1931 = vsyncadd (%p2117_p3), [#allocation8], 4294967280 }
  0x5e   : > { %201 = sfence }
  0x5f   : > { %s217_s20 = sand.u32 1, %s1942_s13   ;;  %p1526_p7 = scmp.ne.s32.totalorder %s1962_s18, 0 }
  0x60   : > { %s2237_s8 = sshll.u32 %s217_s20, 1  ;;  %v1984_v0 = vmov (!%p1526_p7), 0.0   ;;  %v1985_v1 = vmov (!%p1526_p7), -inf  }
  0x61   : > { %s219_s9 = scalar_lea.vmem [#allocation10], %s2237_s8  ;;  %224 = sbr.rel (%p1526_p7) target bundleno = 104 (0x68), region = 44  ;;  %225 = vst [vmem:[#allocation2] sm:$0xff] (!%p1526_p7), %v1984_v0  ;;  %226 = vst [vmem:[#allocation2 + $0x8] sm:$0xff] (!%p1526_p7), %v1984_v0 }
  0x62   : > { %227 = vst [vmem:[#allocation3] sm:$0xff] (!%p1526_p7), %v1985_v1  ;;  %228 = vst [vmem:[#allocation3 + $0x8] sm:$0xff] (!%p1526_p7), %v1985_v1 }
  0x68 PF: > { %v232_v2 = vld [vmem:[%s192_s15] sm:$0xff]  ;;  %v1527_v3 = vld [vmem:[%s192_s15 + $0x10] sm:$0xff]  ;;  %v243_v4 = vld [vmem:[#allocation2] sm:$0xff]  ;;  %p1529_p3 = scmp.ne.s32.totalorder %s1962_s18, 3 }
  0x69   : > { %v239_v5 = vadd.f32 %v1527_v3, %v232_v2  ;;  %v233_v6 = vld [vmem:[%s192_s15 + $0x8] sm:$0xff]  ;;  %v1528_v7 = vld [vmem:[%s192_s15 + $0x18] sm:$0xff]  ;;  %v244_v8 = vld [vmem:[#allocation2 + $0x8] sm:$0xff]  ;;  %v241_v9 = vmax.f32 %v232_v2, %v1527_v3  ;;  %v1986_v22 = vmov (!%p1529_p3), 0.0   ;;  %v1987_v33 = vmov (!%p1529_p3), 1966171168  }
  0x6a   : > { %v240_v10 = vadd.f32 %v1528_v7, %v233_v6  ;;  %v249_v11 = vld [vmem:[#allocation3] sm:$0xff]  ;;  %v242_v12 = vmax.f32 %v233_v6, %v1528_v7  ;;  %v250_v13 = vld [vmem:[#allocation3 + $0x8] sm:$0xff]  ;;  %258 = sbr.rel (%p1529_p3) target bundleno = 492 (0x1ec), region = 48  ;;  %289 = vst [vmem:[#allocation4] sm:$0xff] (!%p1529_p3), %v1986_v22  ;;  %v294_v34 = vunpack.c.l.s4 (!%p1529_p3), %v1987_v33  ;;  %v296_v35 = vlaneseq (!%p1529_p3)  ;;  %s1988_s18 = smov (!%p1529_p3), 51  }
  0x6b   : > { %v245_v14 = vadd.f32 %v243_v4, %v239_v5  ;;  %v251_v15 = vmax.f32 %v249_v11, %v241_v9  ;;  %s1989_s26 = smov (!%p1529_p3), 19   ;;  %s1990_s29 = smov (!%p1529_p3), 35   ;;  %v2315_v2 = vld [vmem:[%s3108_s2] sm:$0x3] (!%p1529_p3)  ;;  %vm345_vm3 = vcmask (!%p1529_p3), 416768   ;;  %vm367_vm4 = vcmask (!%p1529_p3), 154624  }
  0x6c   : > { %v246_v16 = vadd.f32 %v244_v8, %v240_v10  ;;  %v252_v17 = vmax.f32 %v250_v13, %v242_v12  ;;  %v295_v44 = vunpack.c.0.s8 (!%p1529_p3), %v294_v34  ;;  %v297_v45 = vshrl.u32 (!%p1529_p3), %v296_v35, 7  ;;  %s1991_s23 = smov (!%p1529_p3), 3   ;;  %s1992_s7 = smov (!%p1529_p3), 115  }
  0x6d   : > { %247 = vst [vmem:[#allocation2] sm:$0xff] %v245_v14  ;;  %253 = vst [vmem:[#allocation3] sm:$0xff] %v251_v15  ;;  %vm2242_vm0 = vcmp.lt.s32.totalorder (!%p1529_p3), %v296_v35, 256  ;;  %s1993_s24 = smov (!%p1529_p3), 99   ;;  %s1994_s11 = smov (!%p1529_p3), 83   ;;  %v335_v3 = vadd.s32 (!%p1529_p3), 4294967293, %v2315_v2 }
  0x6e   : > { %248 = vst [vmem:[#allocation2 + $0x8] sm:$0xff] %v246_v16  ;;  %254 = vst [vmem:[#allocation3 + $0x8] sm:$0xff] %v252_v17  ;;  %v298_v54 = vsub.s32 (!%p1529_p3), %v295_v44, %v297_v45  ;;  %s1995_s28 = smov (!%p1529_p3), 50   ;;  %s1996_s6 = smov (!%p1529_p3), 34   ;;  %vm356_vm6 = vcmask (!%p1529_p3), 285696   ;;  %vm378_vm7 = vcmask (!%p1529_p3), 23552  }
  0x6f   : > { %s1997_s5 = smov (!%p1529_p3), 18   ;;  %s1998_s1 = smov (!%p1529_p3), 2   ;;  %vm336_vm1 = vcmp.ge.s32.totalorder (!%p1529_p3), %v335_v3, 0  ;;  %vm337_vm2 = vcmp.lt.s32.totalorder (!%p1529_p3), %v335_v3, 16  ;;  %vm392_vm8 = vcmask (!%p1529_p3), 941056   ;;  %vm403_vm9 = vcmask (!%p1529_p3), 809984  }
  0x70   : > { %s1999_s12 = smov (!%p1529_p3), 114   ;;  %s2000_s27 = smov (!%p1529_p3), 98   ;;  %vm2338_vm5 = vmand (!%p1529_p3), %vm336_vm1, %vm337_vm2  ;;  %vm414_vm10 = vcmask (!%p1529_p3), 678912   ;;  %vm505_vm13 = vcmask (!%p1529_p3), 408576   ;;  %vm516_vm15 = vcmask (!%p1529_p3), 277504   ;;  %vm527_vm1 = vcmask (!%p1529_p3), 146432  }
  0x71   : > { %s2001_s4 = smov 82   ;;  %s2002_s15 = smov 49   ;;  %vm538_vm2 = vcmask 15360  }
  0x74   : > { %v259_v18 = vld [vmem:[#allocation2] sm:$0xff]  ;;  %v275_v23 = vld [vmem:[#allocation3] sm:$0xff] }
  0x75   : > { %v260_v19 = vld [vmem:[#allocation2 + $0x8] sm:$0xff]  ;;  %v261_v20 = vrot.slane %v259_v18, 4  ;;  %v276_v24 = vld [vmem:[#allocation3 + $0x8] sm:$0xff]  ;;  %v277_v25 = vrot.slane %v275_v23, 4 }
  0x76   : > { %v267_v21 = vrot.slane %v260_v19, 4  ;;  %v283_v26 = vrot.slane %v276_v24, 4 }
  0x77   : > { %v262_v27 = vadd.f32 %v261_v20, %v259_v18  ;;  %v278_v29 = vmax.f32 %v275_v23, %v277_v25 }
  0x78   : > { %v268_v28 = vadd.f32 %v267_v21, %v260_v19  ;;  %v284_v30 = vmax.f32 %v276_v24, %v283_v26 }
  0x79   : > { %v263_v31 = vrot.slane %v262_v27, 2  ;;  %v279_v36 = vrot.slane %v278_v29, 2 }
  0x7a   : > { %v269_v32 = vrot.slane %v268_v28, 2  ;;  %v285_v37 = vrot.slane %v284_v30, 2 }
  0x7b   : > { %v264_v38 = vadd.f32 %v263_v31, %v262_v27  ;;  %v280_v40 = vmax.f32 %v278_v29, %v279_v36 }
  0x7c   : > { %v270_v39 = vadd.f32 %v269_v32, %v268_v28  ;;  %v286_v41 = vmax.f32 %v284_v30, %v285_v37 }
  0x7d   : > { %v265_v42 = vrot.slane %v264_v38, 1  ;;  %v281_v46 = vrot.slane %v280_v40, 1 }
  0x7e   : > { %v271_v43 = vrot.slane %v270_v39, 1  ;;  %v287_v47 = vrot.slane %v286_v41, 1 }
  0x7f   : > { %v266_v48 = vadd.f32 %v265_v42, %v264_v38  ;;  %v282_v50 = vmax.f32 %v280_v40, %v281_v46 }
  0x80   : > { %v272_v49 = vadd.f32 %v271_v43, %v270_v39  ;;  %v288_v51 = vmax.f32 %v286_v41, %v287_v47 }
  0x81   : > { %v273_v52 = vmul.f32 0.015625, %v266_v48 }
  0x82   : > { %v274_v53 = vmul.f32 0.015625, %v272_v49  ;;  %v316_v55 = vcombine.low %v282_v50, %v288_v51 }
  0x84   : > { %v292_v56 = vcombine.low %v273_v52, %v274_v53  ;;  %v323_v57 = vrot.slane %v316_v55, %v298_v54 }
  0x86   : > { %v299_v58 = vrot.slane %v292_v56, %v298_v54  ;;  %v330_v60 = vrot.slane %v323_v57, %v298_v54 }
  0x88   : > { %v306_v61 = vrot.slane %v299_v58, %v298_v54  ;;  %333 = vst.msk [vmem:[#allocation4 + $0x3] ss:$2 sm:$0x3] %vm2242_vm0, %v330_v60 }
  0x8a   : > { %313 = vst.msk [vmem:[#allocation4 + $0x2] ss:$2 sm:$0x3] %vm2242_vm0, %v306_v61 }
  0x8f   : > { %v2260_v0 = vld [vmem:[#allocation4 + $0x1] ss:$2 sm:$0x7] }
  0x90   : > { %v2266_v1 = vld [vmem:[#allocation4 + $0x3] ss:$2 sm:$0x7] }
  0x91   : > { %v2250_v62 = vld [vmem:[#allocation4] ss:$2 sm:$0x7] }
  0x92   : > { %342 = vrot.lane.b32.xlu0 %v2250_v62, %s1988_s18  ;;  %364 = vrot.lane.b32.xlu1 %v2250_v62, %s1989_s26  ;;  %v2256_v63 = vld [vmem:[#allocation4 + $0x2] ss:$2 sm:$0x7] }
  0x96   : > { %353 = vrot.lane.b32.xlu0 %v2250_v62, %s1990_s29  ;;  %375 = vrot.lane.b32.xlu1 %v2250_v62, %s1991_s23 }
  0x9a   : > { %389 = vrot.lane.b32.xlu0 %v2256_v63, %s1992_s7  ;;  %400 = vrot.lane.b32.xlu1 %v2256_v63, %s1993_s24 }
  0x9e   : > { %411 = vrot.lane.b32.xlu0 %v2256_v63, %s1994_s11  ;;  %425 = vrot.lane.b32.xlu1 %v2260_v0, %s1988_s18  ;;  %s2003_s18 = smov 33  }
  0xa2   : > { %435 = vrot.lane.b32.xlu0 %v2260_v0, %s1990_s29  ;;  %445 = vrot.lane.b32.xlu1 %v2260_v0, %s1989_s26  ;;  %s2004_s26 = smov 17   ;;  %s2005_s29 = smov 1  }
  0xa6   : > { %455 = vrot.lane.b32.xlu0 %v2260_v0, %s1991_s23  ;;  %468 = vrot.lane.b32.xlu1 %v2266_v1, %s1992_s7  ;;  %s2006_s23 = smov 113   ;;  %s2007_s7 = smov 97  }
  0xaa   : > { %478 = vrot.lane.b32.xlu0 %v2266_v1, %s1993_s24  ;;  %488 = vrot.lane.b32.xlu1 %v2266_v1, %s1994_s11  ;;  %s2008_s24 = smov 81   ;;  %s2009_s11 = smov 48  }
  0xae   : > { %502 = vrot.lane.b32.xlu0 %v2250_v62, %s1995_s28  ;;  %513 = vrot.lane.b32.xlu1 %v2250_v62, %s1996_s6 }
  0xb2   : > { %524 = vrot.lane.b32.xlu0 %v2250_v62, %s1997_s5  ;;  %535 = vrot.lane.b32.xlu1 %v2250_v62, %s1998_s1 }
  0xb6   : > { %546 = vrot.lane.b32.xlu0 %v2256_v63, %s1999_s12  ;;  %557 = vrot.lane.b32.xlu1 %v2256_v63, %s2000_s27 }
  0xba   : > { %568 = vrot.lane.b32.xlu0 %v2256_v63, %s2001_s4  ;;  %579 = vrot.lane.b32.xlu1 %v2260_v0, %s1995_s28  ;;  %s2010_s28 = smov 32  }
  0xbe   : > { %589 = vrot.lane.b32.xlu0 %v2260_v0, %s1996_s6  ;;  %599 = vrot.lane.b32.xlu1 %v2260_v0, %s1997_s5  ;;  %s2011_s6 = smov 16   ;;  %s2012_s5 = smov 112  }
  0xc2   : > { %609 = vrot.lane.b32.xlu0 %v2260_v0, %s1998_s1  ;;  %619 = vrot.lane.b32.xlu1 %v2266_v1, %s1999_s12  ;;  %s2013_s1 = smov 96   ;;  %s2014_s12 = smov 80  }
  0xc6   : > { %629 = vrot.lane.b32.xlu0 %v2266_v1, %s2000_s27  ;;  %639 = vrot.lane.b32.xlu1 %v2266_v1, %s2001_s4  ;;  %s2363_s27 = sld [smem:[#allocation9 + $0x2a]]  ;;  %s2368_s4 = sld [smem:[#allocation9 + $0x31]] }
  0xca   : > { %653 = vrot.lane.b32.xlu0 %v2250_v62, %s2002_s15  ;;  %664 = vrot.lane.b32.xlu1 %v2250_v62, %s2003_s18 }
  0xcc   : > { %v418_v48 = vstv %s2363_s27  ;;  %v431_v56 = vstv %s2368_s4  ;;  %s2455_s27 = sld [smem:[#allocation9 + $0x16]]  ;;  %s2026_s4 = smov 110  }
  0xce   : > { %675 = vrot.lane.b32.xlu0 %v2250_v62, %s2004_s26  ;;  %686 = vrot.lane.b32.xlu1 %v2250_v62, %s2005_s29 }
  0xd2   : > { %697 = vrot.lane.b32.xlu0 %v2256_v63, %s2006_s23  ;;  %708 = vrot.lane.b32.xlu1 %v2256_v63, %s2007_s7 }
  0xd6   : > { %719 = vrot.lane.b32.xlu0 %v2256_v63, %s2008_s24  ;;  %730 = vrot.lane.b32.xlu1 %v2260_v0, %s2002_s15  ;;  %s2015_s15 = smov 47  }
  0xda   : > { %740 = vrot.lane.b32.xlu0 %v2260_v0, %s2003_s18  ;;  %750 = vrot.lane.b32.xlu1 %v2260_v0, %s2004_s26  ;;  %s2016_s18 = smov 31   ;;  %s2322_s26 = sld [smem:[#allocation9]] }
  0xde   : > { %760 = vrot.lane.b32.xlu0 %v2260_v0, %s2005_s29  ;;  %770 = vrot.lane.b32.xlu1 %v2266_v1, %s2006_s23  ;;  %s2324_s29 = sld [smem:[#allocation9 + $0xe]]  ;;  %s2017_s23 = smov 15  }
  0xe0   : > { %v349_v15 = vstv %s2322_s26  ;;  %s2395_s26 = sld [smem:[#allocation9 + $0x46]] }
  0xe2   : > { %780 = vrot.lane.b32.xlu0 %v2266_v1, %s2007_s7  ;;  %790 = vrot.lane.b32.xlu1 %v2266_v1, %s2008_s24  ;;  %s2018_s7 = smov 127   ;;  %s2330_s24 = sld [smem:[#allocation9 + $0x7]] }
  0xe4   : > { %v371_v18 = vstv %s2324_s29  ;;  %s2397_s29 = sld [smem:[#allocation9 + $0x4d]] }
  0xe6   : > { %803 = vrot.lane.b32.xlu0 %v2250_v62, %s2009_s11  ;;  %814 = vrot.lane.b32.xlu1 %v2250_v62, %s2010_s28 }
  0xe8   : > { %v360_v17 = vstv %s2330_s24  ;;  %s2022_s24 = smov 46  }
  0xea   : > { %825 = vrot.lane.b32.xlu0 %v2250_v62, %s2011_s6  ;;  %842 = vrot.lane.b32.xlu1 %v2256_v63, %s2012_s5 }
  0xee   : > { %853 = vrot.lane.b32.xlu0 %v2256_v63, %s2013_s1  ;;  %864 = vrot.lane.b32.xlu1 %v2256_v63, %s2014_s12 }
  0xf2   : > { %875 = vrot.lane.b32.xlu0 %v2260_v0, %s2009_s11  ;;  %885 = vrot.lane.b32.xlu1 %v2260_v0, %s2010_s28  ;;  %s2332_s11 = sld [smem:[#allocation9 + $0x15]]  ;;  %s2019_s28 = smov 111  }
  0xf6   : > { %895 = vrot.lane.b32.xlu0 %v2260_v0, %s2011_s6  ;;  %911 = vrot.lane.b32.xlu1 %v2266_v1, %s2012_s5  ;;  %s2020_s6 = smov 95   ;;  %s2343_s5 = sld [smem:[#allocation9 + $0x1c]] }
  0xf8   : > { %v382_v29 = vstv %s2332_s11  ;;  %s2023_s11 = smov 30  }
  0xfa   : > { %921 = vrot.lane.b32.xlu0 %v2266_v1, %s2013_s1  ;;  %931 = vrot.lane.b32.xlu1 %v2266_v1, %s2014_s12  ;;  %s2350_s1 = sld [smem:[#allocation9 + $0x23]]  ;;  %s2021_s12 = smov 79  }
  0xfc   : > { %v396_v35 = vstv %s2343_s5  ;;  %s2024_s5 = smov 14  }
  0xfe   : > { %945 = vrot.lane.b32.xlu0 %v2250_v62, %s2015_s15  ;;  %956 = vrot.lane.b32.xlu1 %v2250_v62, %s2016_s18 }
 0x100   : > { %v407_v42 = vstv %s2350_s1  ;;  %s2025_s1 = smov 126  }
 0x102   : > { %967 = vrot.lane.b32.xlu0 %v2250_v62, %s2017_s23  ;;  %978 = vrot.lane.b32.xlu1 %v2256_v63, %s2018_s7 }
 0x104   : > { %v343_v4 = vpop.permute.xlu0 %342  ;;  %v365_v5 = vpop.permute.xlu1 %364 }
 0x105   : > { %v344_v6 = vrot.slane %v343_v4, 1  ;;  %v366_v7 = vrot.slane %v365_v5, 1 }
 0x106   : > { %989 = vrot.lane.b32.xlu0 %v2256_v63, %s2019_s28  ;;  %1000 = vrot.lane.b32.xlu1 %v2256_v63, %s2020_s6 }
 0x107   : > { %v346_v9 = vsel %vm345_vm3, %v343_v4, %v344_v6  ;;  %v368_v12 = vsel %vm367_vm4, %v365_v5, %v366_v7 }
 0x108   : > { %v354_v10 = vpop.permute.xlu0 %353  ;;  %v376_v11 = vpop.permute.xlu1 %375  ;;  %v348_v16 = vsel %vm2338_vm5, %v346_v9, 0.0  ;;  %v370_v21 = vsel %vm2338_vm5, %v368_v12, 0.0 }
 0x109   : > { %v355_v13 = vrot.slane %v354_v10, 1  ;;  %v377_v14 = vrot.slane %v376_v11, 1  ;;  %v350_v25 = vmul.f32 %v349_v15, %v348_v16  ;;  %v372_v31 = vmul.f32 %v371_v18, %v370_v21 }
 0x10a   : > { %1011 = vrot.lane.b32.xlu0 %v2256_v63, %s2021_s12  ;;  %1022 = vrot.lane.b32.xlu1 %v2260_v0, %s2015_s15  ;;  %s2379_s15 = sld [smem:[#allocation9 + $0x38]]  ;;  %v497_v16 = vadd.s32 4294967294, %v2315_v2 }
 0x10b   : > { %v357_v19 = vsel %vm356_vm6, %v354_v10, %v355_v13  ;;  %v379_v20 = vsel %vm378_vm7, %v376_v11, %v377_v14 }
 0x10c   : > { %v359_v22 = vsel %vm2338_vm5, %v357_v19, 0.0  ;;  %v390_v23 = vpop.permute.xlu0 %389  ;;  %v401_v24 = vpop.permute.xlu1 %400  ;;  %v381_v30 = vsel %vm2338_vm5, %v379_v20, 0.0  ;;  %v461_v20 = vstv %s2395_s26  ;;  %vm498_vm11 = vcmp.ge.s32.totalorder %v497_v16, 0  ;;  %s2471_s26 = sld [smem:[#allocation9 + $0x24]] }
 0x10d   : > { %v361_v26 = vmul.f32 %v360_v17, %v359_v22  ;;  %v391_v27 = vrot.slane %v390_v23, 1  ;;  %v402_v28 = vrot.slane %v401_v24, 1  ;;  %v383_v40 = vmul.f32 %v382_v29, %v381_v30 }
 0x10e   : > { %1032 = vrot.lane.b32.xlu0 %v2260_v0, %s2016_s18  ;;  %1042 = vrot.lane.b32.xlu1 %v2260_v0, %s2017_s23  ;;  %s2384_s18 = sld [smem:[#allocation9 + $0x3f]]  ;;  %s2411_s23 = sld [smem:[#allocation9 + $0x54]]  ;;  %vm499_vm12 = vcmp.lt.s32.totalorder %v497_v16, 16 }
 0x10f   : > { %v362_v32 = vadd.f32 %v361_v26, %v350_v25  ;;  %v393_v33 = vsel %vm392_vm8, %v390_v23, %v391_v27  ;;  %v404_v34 = vsel %vm403_vm9, %v401_v24, %v402_v28  ;;  %v474_v27 = vstv %s2397_s29  ;;  %vm2448_vm14 = vmand %vm498_vm11, %vm499_vm12  ;;  %s2028_s29 = smov 78  }
 0x110   : > { %v395_v36 = vsel %vm2338_vm5, %v393_v33, 0.0  ;;  %v412_v37 = vpop.permute.xlu0 %411  ;;  %v426_v38 = vpop.permute.xlu1 %425  ;;  %v406_v43 = vsel %vm2338_vm5, %v404_v34, 0.0  ;;  %v441_v4 = vstv %s2379_s15  ;;  %s2027_s15 = smov 94   ;;  %vm678_vm11 = vcmask 138240  }
 0x111   : > { %v373_v39 = vadd.f32 %v372_v31, %v362_v32  ;;  %v413_v41 = vrot.slane %v412_v37, 1  ;;  %v427_v44 = vrot.slane %v426_v38, 1  ;;  %v397_v46 = vmul.f32 %v396_v35, %v395_v36 }
 0x112   : > { %1052 = vrot.lane.b32.xlu0 %v2266_v1, %s2018_s7  ;;  %1062 = vrot.lane.b32.xlu1 %v2266_v1, %s2019_s28  ;;  %v408_v54 = vmul.f32 %v407_v42, %v406_v43  ;;  %s2416_s7 = sld [smem:[#allocation9 + $0x5b]]  ;;  %s2428_s28 = sld [smem:[#allocation9 + $0x1]]  ;;  %vm689_vm12 = vcmask 7168  }
 0x113   : > { %v384_v45 = vadd.f32 %v383_v40, %v373_v39  ;;  %v415_v47 = vsel %vm414_vm10, %v412_v37, %v413_v41  ;;  %v428_v50 = vsel %vm345_vm3, %v426_v38, %v427_v44  ;;  %vm549_vm3 = vcmask 932864  }
 0x114   : > { %v417_v49 = vsel %vm2338_vm5, %v415_v47, 0.0  ;;  %v436_v51 = vpop.permute.xlu0 %435  ;;  %v446_v52 = vpop.permute.xlu1 %445  ;;  %v430_v57 = vsel %vm2338_vm5, %v428_v50, 0.0  ;;  %v451_v13 = vstv %s2384_s18  ;;  %v484_v34 = vstv %s2411_s23  ;;  %s2466_s18 = sld [smem:[#allocation9 + $0x1d]]  ;;  %s2482_s23 = sld [smem:[#allocation9 + $0x2b]] }
 0x115   : > { %v398_v53 = vadd.f32 %v397_v46, %v384_v45  ;;  %v437_v55 = vrot.slane %v436_v51, 1  ;;  %v447_v58 = vrot.slane %v446_v52, 1  ;;  %v419_v61 = vmul.f32 %v418_v48, %v417_v49 }
 0x116   : > { %1072 = vrot.lane.b32.xlu0 %v2266_v1, %s2020_s6  ;;  %1082 = vrot.lane.b32.xlu1 %v2266_v1, %s2021_s12  ;;  %v432_v11 = vmul.f32 %v431_v56, %v430_v57  ;;  %s2433_s6 = sld [smem:[#allocation9 + $0x8]]  ;;  %s2444_s12 = sld [smem:[#allocation9 + $0xf]] }
 0x117   : > { %v409_v60 = vadd.f32 %v408_v54, %v398_v53  ;;  %v438_v3 = vsel %vm356_vm6, %v436_v51, %v437_v55  ;;  %v448_v6 = vsel %vm367_vm4, %v446_v52, %v447_v58  ;;  %vm560_vm4 = vcmask 801792  }
 0x118   : > { %v440_v5 = vsel %vm2338_vm5, %v438_v3, 0.0  ;;  %v456_v7 = vpop.permute.xlu0 %455  ;;  %v469_v9 = vpop.permute.xlu1 %468  ;;  %v450_v14 = vsel %vm2338_vm5, %v448_v6, 0.0  ;;  %v494_v43 = vstv %s2416_s7  ;;  %v509_v49 = vstv %s2428_s28  ;;  %s2487_s7 = sld [smem:[#allocation9 + $0x32]]  ;;  %s2514_s28 = sld [smem:[#allocation9 + $0x47]] }
 0x119   : > { %v420_v10 = vadd.f32 %v419_v61, %v409_v60  ;;  %v457_v12 = vrot.slane %v456_v7, 1  ;;  %v470_v15 = vrot.slane %v469_v9, 1  ;;  %v442_v18 = vmul.f32 %v441_v4, %v440_v5 }
 0x11a   : > { %1096 = vrot.lane.b32.xlu0 %v2250_v62, %s2022_s24  ;;  %1107 = vrot.lane.b32.xlu1 %v2250_v62, %s2023_s11  ;;  %v452_v26 = vmul.f32 %v451_v13, %v450_v14  ;;  %v542_v13 = vstv %s2455_s27  ;;  %s2030_s27 = smov 29  }
 0x11b   : > { %v433_v17 = vadd.f32 %v432_v11, %v420_v10  ;;  %v458_v19 = vsel %vm378_vm7, %v456_v7, %v457_v12  ;;  %v471_v22 = vsel %vm392_vm8, %v469_v9, %v470_v15  ;;  %vm656_vm8 = vcmask 400384  }
 0x11c   : > { %v460_v21 = vsel %vm2338_vm5, %v458_v19, 0.0  ;;  %v479_v23 = vpop.permute.xlu0 %478  ;;  %v489_v24 = vpop.permute.xlu1 %488  ;;  %v473_v29 = vsel %vm2338_vm5, %v471_v22, 0.0  ;;  %v520_v56 = vstv %s2433_s6  ;;  %v531_v4 = vstv %s2444_s12  ;;  %s2516_s6 = sld [smem:[#allocation9 + $0x4e]]  ;;  %s2029_s12 = smov 45  }
 0x11d   : > { %v443_v25 = vadd.f32 %v442_v18, %v433_v17  ;;  %v480_v28 = vrot.slane %v479_v23, 1  ;;  %v490_v30 = vrot.slane %v489_v24, 1  ;;  %v462_v32 = vmul.f32 %v461_v20, %v460_v21 }
 0x11e   : > { %1118 = vrot.lane.b32.xlu0 %v2250_v62, %s2024_s5  ;;  %1129 = vrot.lane.b32.xlu1 %v2256_v63, %s2025_s1  ;;  %v475_v40 = vmul.f32 %v474_v27, %v473_v29  ;;  %v553_v19 = vstv %s2466_s18  ;;  %v564_v27 = vstv %s2471_s26  ;;  %s2031_s18 = smov 13   ;;  %s2032_s26 = smov 125  }
 0x11f   : > { %v453_v31 = vadd.f32 %v452_v26, %v443_v25  ;;  %v481_v33 = vsel %vm403_vm9, %v479_v23, %v480_v28  ;;  %v491_v36 = vsel %vm414_vm10, %v489_v24, %v490_v30  ;;  %vm667_vm10 = vcmask 269312  }
 0x120   : > { %v483_v35 = vsel %vm2338_vm5, %v481_v33, 0.0  ;;  %v503_v37 = vpop.permute.xlu0 %502  ;;  %v514_v38 = vpop.permute.xlu1 %513  ;;  %v493_v44 = vsel %vm2338_vm5, %v491_v36, 0.0  ;;  %vm571_vm5 = vcmask 670720   ;;  %v575_v33 = vstv %s2482_s23  ;;  %s2574_s23 = sld [smem:[#allocation9 + $0x17]] }
 0x121   : > { %v463_v39 = vadd.f32 %v462_v32, %v453_v31  ;;  %v504_v42 = vrot.slane %v503_v37, 1  ;;  %v515_v45 = vrot.slane %v514_v38, 1  ;;  %v485_v47 = vmul.f32 %v484_v34, %v483_v35 }
 0x122   : > { %1140 = vrot.lane.b32.xlu0 %v2256_v63, %s2026_s4  ;;  %1151 = vrot.lane.b32.xlu1 %v2256_v63, %s2027_s15  ;;  %v495_v54 = vmul.f32 %v494_v43, %v493_v44 }
 0x123   : > { %v476_v46 = vadd.f32 %v475_v40, %v463_v39  ;;  %v506_v48 = vsel %vm505_vm13, %v503_v37, %v504_v42  ;;  %v517_v50 = vsel %vm516_vm15, %v514_v38, %v515_v45  ;;  %v585_v42 = vstv %s2487_s7  ;;  %s2033_s7 = smov 109  }
 0x124   : > { %v508_v8 = vsel %vm2448_vm14, %v506_v48, 0.0  ;;  %v525_v51 = vpop.permute.xlu0 %524  ;;  %v536_v52 = vpop.permute.xlu1 %535  ;;  %v519_v57 = vsel %vm2448_vm14, %v517_v50, 0.0 }
 0x125   : > { %v486_v53 = vadd.f32 %v485_v47, %v476_v46  ;;  %v526_v55 = vrot.slane %v525_v51, 1  ;;  %v537_v58 = vrot.slane %v536_v52, 1  ;;  %v510_v61 = vmul.f32 %v509_v49, %v508_v8 }
 0x126   : > { %1162 = vrot.lane.b32.xlu0 %v2256_v63, %s2028_s29  ;;  %1173 = vrot.lane.b32.xlu1 %v2260_v0, %s2022_s24  ;;  %v521_v11 = vmul.f32 %v520_v56, %v519_v57  ;;  %s2498_s24 = sld [smem:[#allocation9 + $0x39]] }
 0x127   : > { %v496_v60 = vadd.f32 %v495_v54, %v486_v53  ;;  %v528_v3 = vsel %vm527_vm1, %v525_v51, %v526_v55  ;;  %v539_v6 = vsel %vm538_vm2, %v536_v52, %v537_v58  ;;  %v648_v58 = vadd.s32 4294967295, %v2315_v2 }
 0x128   : > { %v530_v5 = vsel %vm2448_vm14, %v528_v3, 0.0  ;;  %v547_v7 = vpop.permute.xlu0 %546  ;;  %v558_v9 = vpop.permute.xlu1 %557  ;;  %v541_v14 = vsel %vm2448_vm14, %v539_v6, 0.0 }
 0x129   : > { %v511_v10 = vadd.f32 %v510_v61, %v496_v60  ;;  %v548_v12 = vrot.slane %v547_v7, 1  ;;  %v559_v15 = vrot.slane %v558_v9, 1  ;;  %v532_v17 = vmul.f32 %v531_v4, %v530_v5 }
 0x12a   : > { %1183 = vrot.lane.b32.xlu0 %v2260_v0, %s2023_s11  ;;  %1193 = vrot.lane.b32.xlu1 %v2260_v0, %s2024_s5  ;;  %v543_v25 = vmul.f32 %v542_v13, %v541_v14  ;;  %s2503_s11 = sld [smem:[#allocation9 + $0x40]]  ;;  %s2530_s5 = sld [smem:[#allocation9 + $0x55]]  ;;  %v615_v4 = vstv %s2514_s28  ;;  %vm649_vm6 = vcmp.ge.s32.totalorder %v648_v58, 0  ;;  %vm650_vm7 = vcmp.lt.s32.totalorder %v648_v58, 16 }
 0x12b   : > { %v522_v16 = vadd.f32 %v521_v11, %v511_v10  ;;  %v550_v18 = vsel %vm549_vm3, %v547_v7, %v548_v12  ;;  %v561_v21 = vsel %vm560_vm4, %v558_v9, %v559_v15  ;;  %v625_v12 = vstv %s2516_s6  ;;  %vm2567_vm9 = vmand %vm649_vm6, %vm650_vm7  ;;  %s2590_s28 = sld [smem:[#allocation9 + $0x25]]  ;;  %s2035_s6 = smov 77  }
 0x12c   : > { %v552_v20 = vsel %vm2448_vm14, %v550_v18, 0.0  ;;  %v569_v22 = vpop.permute.xlu0 %568  ;;  %v580_v23 = vpop.permute.xlu1 %579  ;;  %v563_v28 = vsel %vm2448_vm14, %v561_v21, 0.0  ;;  %v595_v48 = vstv %s2498_s24  ;;  %s2034_s24 = smov 93   ;;  %vm828_vm6 = vcmask 130048  }
 0x12d   : > { %v533_v24 = vadd.f32 %v532_v17, %v522_v16  ;;  %v570_v26 = vrot.slane %v569_v22, 1  ;;  %v581_v29 = vrot.slane %v580_v23, 1  ;;  %v554_v31 = vmul.f32 %v553_v19, %v552_v20 }
 0x12e   : > { %1203 = vrot.lane.b32.xlu0 %v2266_v1, %s2025_s1  ;;  %1213 = vrot.lane.b32.xlu1 %v2266_v1, %s2026_s4  ;;  %v565_v39 = vmul.f32 %v564_v27, %v563_v28  ;;  %s2535_s1 = sld [smem:[#allocation9 + $0x5c]]  ;;  %s2547_s4 = sld [smem:[#allocation9 + $0x2]]  ;;  %vm845_vm7 = vcmask 916480  }
 0x12f   : > { %v544_v30 = vadd.f32 %v543_v25, %v533_v24  ;;  %v572_v32 = vsel %vm571_vm5, %v569_v22, %v570_v26  ;;  %v582_v35 = vsel %vm505_vm13, %v580_v23, %v581_v29  ;;  %vm700_vm13 = vcmask 924672  }
 0x130   : > { %v574_v34 = vsel %vm2448_vm14, %v572_v32, 0.0  ;;  %v590_v36 = vpop.permute.xlu0 %589  ;;  %v600_v37 = vpop.permute.xlu1 %599  ;;  %v584_v43 = vsel %vm2448_vm14, %v582_v35, 0.0  ;;  %v605_v55 = vstv %s2503_s11  ;;  %v635_v19 = vstv %s2530_s5  ;;  %s2585_s11 = sld [smem:[#allocation9 + $0x1e]]  ;;  %s2601_s5 = sld [smem:[#allocation9 + $0x2c]] }
 0x131   : > { %v555_v38 = vadd.f32 %v554_v31, %v544_v30  ;;  %v591_v40 = vrot.slane %v590_v36, 1  ;;  %v601_v44 = vrot.slane %v600_v37, 1  ;;  %v576_v46 = vmul.f32 %v575_v33, %v574_v34 }
 0x132   : > { %1223 = vrot.lane.b32.xlu0 %v2266_v1, %s2027_s15  ;;  %1233 = vrot.lane.b32.xlu1 %v2266_v1, %s2028_s29  ;;  %v586_v53 = vmul.f32 %v585_v42, %v584_v43  ;;  %s2552_s15 = sld [smem:[#allocation9 + $0x9]]  ;;  %s2563_s29 = sld [smem:[#allocation9 + $0x10]] }
 0x133   : > { %v566_v45 = vadd.f32 %v565_v39, %v555_v38  ;;  %v592_v47 = vsel %vm516_vm15, %v590_v36, %v591_v40  ;;  %v602_v8 = vsel %vm527_vm1, %v600_v37, %v601_v44  ;;  %vm722_vm15 = vcmask 662528  }
 0x134   : > { %v594_v49 = vsel %vm2448_vm14, %v592_v47, 0.0  ;;  %v610_v50 = vpop.permute.xlu0 %609  ;;  %v620_v51 = vpop.permute.xlu1 %619  ;;  %v604_v56 = vsel %vm2448_vm14, %v602_v8, 0.0  ;;  %v645_v27 = vstv %s2535_s1  ;;  %v660_v33 = vstv %s2547_s4  ;;  %s2606_s1 = sld [smem:[#allocation9 + $0x33]]  ;;  %s2633_s4 = sld [smem:[#allocation9 + $0x48]] }
 0x135   : > { %v577_v52 = vadd.f32 %v576_v46, %v566_v45  ;;  %v611_v54 = vrot.slane %v610_v50, 1  ;;  %v621_v57 = vrot.slane %v620_v51, 1  ;;  %v596_v61 = vmul.f32 %v595_v48, %v594_v49 }
 0x136   : > { %1247 = vrot.lane.b32.xlu0 %v2250_v62, %s2029_s12  ;;  %1258 = vrot.lane.b32.xlu1 %v2250_v62, %s2030_s27  ;;  %v606_v11 = vmul.f32 %v605_v55, %v604_v56  ;;  %vm799_vm1 = vcmp.ge.s32.totalorder %v2315_v2, 0 }
 0x137   : > { %v587_v60 = vadd.f32 %v586_v53, %v577_v52  ;;  %v612_v3 = vsel %vm538_vm2, %v610_v50, %v611_v54  ;;  %v622_v6 = vsel %vm549_vm3, %v620_v51, %v621_v57  ;;  %v693_v53 = vstv %s2574_s23  ;;  %s2668_s23 = sld [smem:[#allocation9 + $0xa]] }
 0x138   : > { %v614_v5 = vsel %vm2448_vm14, %v612_v3, 0.0  ;;  %v630_v7 = vpop.permute.xlu0 %629  ;;  %v640_v9 = vpop.permute.xlu1 %639  ;;  %v624_v14 = vsel %vm2448_vm14, %v622_v6, 0.0  ;;  %v671_v40 = vstv %s2552_s15  ;;  %v682_v47 = vstv %s2563_s29  ;;  %s2635_s15 = sld [smem:[#allocation9 + $0x4f]]  ;;  %s2661_s29 = sld [smem:[#allocation9 + $0x3]] }
 0x139   : > { %v597_v10 = vadd.f32 %v596_v61, %v587_v60  ;;  %v631_v13 = vrot.slane %v630_v7, 1  ;;  %v641_v15 = vrot.slane %v640_v9, 1  ;;  %v616_v17 = vmul.f32 %v615_v4, %v614_v5 }
 0x13a   : > { %1269 = vrot.lane.b32.xlu0 %v2250_v62, %s2031_s18  ;;  %1280 = vrot.lane.b32.xlu1 %v2256_v63, %s2032_s26  ;;  %v626_v24 = vmul.f32 %v625_v12, %v624_v14  ;;  %v704_v60 = vstv %s2585_s11  ;;  %vm800_vm2 = vcmp.lt.s32.totalorder %v2315_v2, 16  ;;  %vm806_vm3 = vcmask 392192   ;;  %s2695_s11 = sld [smem:[#allocation9 + $0x1f]] }
 0x13b   : > { %v607_v16 = vadd.f32 %v606_v11, %v597_v10  ;;  %v632_v18 = vsel %vm560_vm4, %v630_v7, %v631_v13  ;;  %v642_v21 = vsel %vm571_vm5, %v640_v9, %v641_v15  ;;  %v726_v15 = vstv %s2601_s5  ;;  %vm2683_vm4 = vmand %vm799_vm1, %vm800_vm2  ;;  %s2712_s5 = sld [smem:[#allocation9 + $0x34]] }
 0x13c   : > { %v634_v20 = vsel %vm2448_vm14, %v632_v18, 0.0  ;;  %v654_v22 = vpop.permute.xlu0 %653  ;;  %v665_v23 = vpop.permute.xlu1 %664  ;;  %v644_v28 = vsel %vm2448_vm14, %v642_v21, 0.0  ;;  %vm711_vm14 = vcmask 793600   ;;  %vm817_vm5 = vcmask 261120  }
 0x13d   : > { %v617_v62 = vadd.f32 %v616_v17, %v607_v16  ;;  %v655_v26 = vrot.slane %v654_v22, 1  ;;  %v666_v29 = vrot.slane %v665_v23, 1  ;;  %v636_v31 = vmul.f32 %v635_v19, %v634_v20 }
 0x13e   : > { %1291 = vrot.lane.b32.xlu0 %v2256_v63, %s2033_s7  ;;  %1302 = vrot.lane.b32.xlu1 %v2256_v63, %s2034_s24  ;;  %v646_v38 = vmul.f32 %v645_v27, %v644_v28  ;;  %vm981_vm1 = vcmask 1039360   ;;  %vm992_vm2 = vcmask 908288  }
 0x13f   : > { %v627_v30 = vadd.f32 %v626_v24, %v617_v62  ;;  %v657_v32 = vsel %vm656_vm8, %v654_v22, %v655_v26  ;;  %v668_v34 = vsel %vm667_vm10, %v665_v23, %v666_v29  ;;  %v736_v23 = vstv %s2606_s1  ;;  %s2718_s1 = sld [smem:[#allocation9 + $0x3b]] }
 0x140   : > { %v659_v41 = vsel %vm2567_vm9, %v657_v32, 0.0  ;;  %v676_v35 = vpop.permute.xlu0 %675  ;;  %v687_v36 = vpop.permute.xlu1 %686  ;;  %v670_v42 = vsel %vm2567_vm9, %v668_v34, 0.0 }
 0x141   : > { %v637_v37 = vadd.f32 %v636_v31, %v627_v30  ;;  %v677_v39 = vrot.slane %v676_v35, 1  ;;  %v688_v43 = vrot.slane %v687_v36, 1  ;;  %v661_v45 = vmul.f32 %v660_v33, %v659_v41 }
 0x142   : > { %1313 = vrot.lane.b32.xlu0 %v2256_v63, %s2035_s6  ;;  %1324 = vrot.lane.b32.xlu1 %v2260_v0, %s2029_s12  ;;  %v672_v51 = vmul.f32 %v671_v40, %v670_v42  ;;  %s2617_s12 = sld [smem:[#allocation9 + $0x3a]]  ;;  %v766_v42 = vstv %s2633_s4  ;;  %s2732_s4 = sld [smem:[#allocation9 + $0x50]] }
 0x143   : > { %v647_v44 = vadd.f32 %v646_v38, %v637_v37  ;;  %v679_v46 = vsel %vm678_vm11, %v676_v35, %v677_v39  ;;  %v690_v49 = vsel %vm689_vm12, %v687_v36, %v688_v43 }
 0x144   : > { %v681_v48 = vsel %vm2567_vm9, %v679_v46, 0.0  ;;  %v698_v8 = vpop.permute.xlu0 %697  ;;  %v709_v50 = vpop.permute.xlu1 %708  ;;  %v692_v54 = vsel %vm2567_vm9, %v690_v49, 0.0  ;;  %v776_v49 = vstv %s2635_s15  ;;  %s2744_s15 = sld [smem:[#allocation9 + $0x57]] }
 0x145   : > { %v662_v63 = vadd.f32 %v661_v45, %v647_v44  ;;  %v699_v52 = vrot.slane %v698_v8, 1  ;;  %v710_v55 = vrot.slane %v709_v50, 1  ;;  %v683_v57 = vmul.f32 %v682_v47, %v681_v48 }
 0x146   : > { %1334 = vrot.lane.b32.xlu0 %v2260_v0, %s2030_s27  ;;  %1344 = vrot.lane.b32.xlu1 %v2260_v0, %s2031_s18  ;;  %v694_v7 = vmul.f32 %v693_v53, %v692_v54  ;;  %v715_v0 = vstv %s2590_s28  ;;  %s2622_s27 = sld [smem:[#allocation9 + $0x41]]  ;;  %s2649_s18 = sld [smem:[#allocation9 + $0x56]] }
 0x147   : > { %v673_v56 = vadd.f32 %v672_v51, %v662_v63  ;;  %v701_v58 = vsel %vm700_vm13, %v698_v8, %v699_v52  ;;  %v712_v3 = vsel %vm711_vm14, %v709_v50, %v710_v55  ;;  %s2700_s28 = sld [smem:[#allocation9 + $0x26]] }
 0x148   : > { %v703_v61 = vsel %vm2567_vm9, %v701_v58, 0.0  ;;  %v720_v4 = vpop.permute.xlu0 %719  ;;  %v731_v5 = vpop.permute.xlu1 %730  ;;  %v714_v10 = vsel %vm2567_vm9, %v712_v3, 0.0  ;;  %v746_v29 = vstv %s2617_s12  ;;  %s2721_s12 = sld [smem:[#allocation9 + $0x49]] }
 0x149   : > { %v684_v6 = vadd.f32 %v683_v57, %v673_v56  ;;  %v721_v9 = vrot.slane %v720_v4, 1  ;;  %v732_v11 = vrot.slane %v731_v5, 1  ;;  %v705_v13 = vmul.f32 %v704_v60, %v703_v61 }
 0x14a   : > { %1354 = vrot.lane.b32.xlu0 %v2266_v1, %s2032_s26  ;;  %1364 = vrot.lane.b32.xlu1 %v2266_v1, %s2033_s7  ;;  %v716_v21 = vmul.f32 %v715_v0, %v714_v10  ;;  %s2654_s26 = sld [smem:[#allocation9 + $0x5d]]  ;;  %s2671_s7 = sld [smem:[#allocation9 + $0x11]] }
 0x14b   : > { %v695_v12 = vadd.f32 %v694_v7, %v684_v6  ;;  %v723_v14 = vsel %vm722_vm15, %v720_v4, %v721_v9  ;;  %v733_v17 = vsel %vm656_vm8, %v731_v5, %v732_v11  ;;  %v810_v11 = vstv %s2661_s29  ;;  %s2850_s29 = sld [smem:[#allocation9 + $0x5]] }
 0x14c   : > { %v725_v16 = vsel %vm2567_vm9, %v723_v14, 0.0  ;;  %v741_v18 = vpop.permute.xlu0 %740  ;;  %v751_v19 = vpop.permute.xlu1 %750  ;;  %v735_v62 = vsel %vm2567_vm9, %v733_v17, 0.0  ;;  %v786_v54 = vstv %s2649_s18  ;;  %vm856_vm8 = vcmask 785408   ;;  %s2750_s18 = sld [smem:[#allocation9 + $0x5e]] }
 0x14d   : > { %v706_v20 = vadd.f32 %v705_v13, %v695_v12  ;;  %v742_v22 = vrot.slane %v741_v18, 1  ;;  %v752_v24 = vrot.slane %v751_v19, 1  ;;  %v727_v27 = vmul.f32 %v726_v15, %v725_v16  ;;  %v836_v16 = vld [vmem:[#allocation4 + $0x2] ss:$2 sm:$0x3] }
 0x14e   : > { %1374 = vrot.lane.b32.xlu0 %v2266_v1, %s2034_s24  ;;  %1384 = vrot.lane.b32.xlu1 %v2266_v1, %s2035_s6  ;;  %v737_v34 = vmul.f32 %v736_v23, %v735_v62  ;;  %v756_v1 = vstv %s2622_s27  ;;  %s2677_s24 = sld [smem:[#allocation9 + $0x18]]  ;;  %s2709_s6 = sld [smem:[#allocation9 + $0x2d]] }
 0x14f   : > { %v717_v26 = vadd.f32 %v716_v21, %v706_v20  ;;  %v743_v28 = vsel %vm667_vm10, %v741_v18, %v742_v22  ;;  %v753_v31 = vsel %vm678_vm11, %v751_v19, %v752_v24  ;;  %v821_v18 = vstv %s2668_s23  ;;  %s2726_s27 = sld [smem:[#allocation9 + $0x42]]  ;;  %s2760_s23 = sld [smem:[#allocation9 + $0x4]] }
 0x150   : > { %v745_v30 = vsel %vm2567_vm9, %v743_v28, 0.0  ;;  %v761_v32 = vpop.permute.xlu0 %760  ;;  %v771_v33 = vpop.permute.xlu1 %770  ;;  %v755_v36 = vsel %vm2567_vm9, %v753_v31, 0.0  ;;  %v796_v5 = vstv %s2654_s26  ;;  %v832_v23 = vstv %s2671_s7  ;;  %s2765_s7 = sld [smem:[#allocation9 + $0xb]]  ;;  %s2842_s26 = sld [smem:[#allocation9 + $0x5f]] }
 0x151   : > { %v728_v41 = vadd.f32 %v727_v27, %v717_v26  ;;  %v762_v35 = vrot.slane %v761_v32, 1  ;;  %v772_v37 = vrot.slane %v771_v33, 1  ;;  %v747_v39 = vmul.f32 %v746_v29, %v745_v30 }
 0x152   : > { %v757_v48 = vmul.f32 %v756_v1, %v755_v36  ;;  %v837_v24 = vsel %vm2683_vm4, %v836_v16, 0.0  ;;  %v2755_v16 = vld [vmem:[%s3108_s2] sm:$0x3] }
 0x153   : > { %v738_v38 = vadd.f32 %v737_v34, %v728_v41  ;;  %v763_v40 = vsel %vm689_vm12, %v761_v32, %v762_v35  ;;  %v773_v44 = vsel %vm700_vm13, %v771_v33, %v772_v37  ;;  %v849_v37 = vstv %s2695_s11  ;;  %s2782_s11 = sld [smem:[#allocation9 + $0x19]] }
 0x154   : > { %v765_v43 = vsel %vm2567_vm9, %v763_v40, 0.0  ;;  %v781_v45 = vpop.permute.xlu0 %780  ;;  %v791_v46 = vpop.permute.xlu1 %790  ;;  %v775_v50 = vsel %vm2567_vm9, %v773_v44, 0.0  ;;  %v838_v26 = vstv %s2677_s24  ;;  %vm948_vm12 = vcmask 384000   ;;  %s2771_s24 = sld [smem:[#allocation9 + $0x12]] }
 0x155   : > { %v748_v47 = vadd.f32 %v747_v39, %v738_v38  ;;  %v782_v8 = vrot.slane %v781_v45, 1  ;;  %v792_v63 = vrot.slane %v791_v46, 1  ;;  %v767_v52 = vmul.f32 %v766_v42, %v765_v43 }
 0x156   : > { %v777_v61 = vmul.f32 %v776_v49, %v775_v50  ;;  %v839_v35 = vmul.f32 %v838_v26, %v837_v24  ;;  %v871_v50 = vstv %s2709_s6  ;;  %vm959_vm13 = vcmask 252928   ;;  %s2794_s6 = sld [smem:[#allocation9 + $0x27]] }
 0x157   : > { %v758_v51 = vadd.f32 %v757_v48, %v748_v47  ;;  %v783_v53 = vsel %vm711_vm14, %v781_v45, %v782_v8  ;;  %v793_v56 = vsel %vm722_vm15, %v791_v46, %v792_v63  ;;  %v860_v45 = vstv %s2700_s28  ;;  %s2788_s28 = sld [smem:[#allocation9 + $0x20]] }
 0x158   : > { %v785_v55 = vsel %vm2567_vm9, %v783_v53, 0.0  ;;  %v804_v57 = vpop.permute.xlu0 %803  ;;  %v815_v58 = vpop.permute.xlu1 %814  ;;  %v795_v6 = vsel %vm2567_vm9, %v793_v56, 0.0  ;;  %vm867_vm9 = vcmask 654336   ;;  %v905_v56 = vld [vmem:[#allocation4 + $0x3] ss:$2 sm:$0x3] }
 0x159   : > { %v768_v60 = vadd.f32 %v767_v52, %v758_v51  ;;  %v805_v4 = vrot.slane %v804_v57, 1  ;;  %v816_v7 = vrot.slane %v815_v58, 1  ;;  %v787_v0 = vmul.f32 %v786_v54, %v785_v55 }
 0x15a   : > { %v797_v15 = vmul.f32 %v796_v5, %v795_v6  ;;  %vm970_vm15 = vcmask 121856  }
 0x15b   : > { %v778_v9 = vadd.f32 %v777_v61, %v768_v60  ;;  %v807_v10 = vsel %vm806_vm3, %v804_v57, %v805_v4  ;;  %v818_v12 = vsel %vm817_vm5, %v815_v58, %v816_v7  ;;  %v881_v58 = vstv %s2712_s5  ;;  %s2800_s5 = sld [smem:[#allocation9 + $0x2e]] }
 0x15c   : > { %v809_v2 = vsel %vm2683_vm4, %v807_v10, 0.0  ;;  %v826_v13 = vpop.permute.xlu0 %825  ;;  %v843_v25 = vpop.permute.xlu1 %842  ;;  %v820_v19 = vsel %vm2683_vm4, %v818_v12, 0.0  ;;  %v891_v7 = vstv %s2718_s1  ;;  %s2806_s1 = sld [smem:[#allocation9 + $0x35]] }
 0x15d   : > { %v788_v14 = vadd.f32 %v787_v0, %v778_v9  ;;  %v827_v17 = vrot.slane %v826_v13, 1  ;;  %v844_v20 = vrot.slane %v843_v25, 1  ;;  %v811_v22 = vmul.f32 %v810_v11, %v809_v2 }
 0x15e   : > { %v822_v31 = vmul.f32 %v821_v18, %v820_v19  ;;  %v906_v0 = vsel %vm2683_vm4, %v905_v56, 0.0 }
 0x15f   : > { %v798_v21 = vadd.f32 %v797_v15, %v788_v14  ;;  %v829_v62 = vsel %vm828_vm6, %v826_v13, %v827_v17  ;;  %v846_v32 = vsel %vm845_vm7, %v843_v25, %v844_v20  ;;  %v907_v13 = vstv %s2721_s12  ;;  %s2812_s12 = sld [smem:[#allocation9 + $0x3c]] }
 0x160   : > { %v831_v27 = vsel %vm2683_vm4, %v829_v62, 0.0  ;;  %v854_v28 = vpop.permute.xlu0 %853  ;;  %v865_v29 = vpop.permute.xlu1 %864  ;;  %v848_v38 = vsel %vm2683_vm4, %v846_v32, 0.0  ;;  %v901_v14 = vstv %s2726_s27  ;;  %v940_v17 = vadd.s32 1, %v2755_v16  ;;  %s2818_s27 = sld [smem:[#allocation9 + $0x43]] }
 0x161   : > { %v812_v30 = vadd.f32 %v811_v22, %v798_v21  ;;  %v855_v33 = vrot.slane %v854_v28, 1  ;;  %v866_v41 = vrot.slane %v865_v29, 1  ;;  %v833_v1 = vmul.f32 %v832_v23, %v831_v27 }
 0x162   : > { %v850_v49 = vmul.f32 %v849_v37, %v848_v38  ;;  %v908_v22 = vmul.f32 %v907_v13, %v906_v0  ;;  %v917_v23 = vstv %s2732_s4  ;;  %vm941_vm10 = vcmp.ge.s32.totalorder %v940_v17, 0  ;;  %s2824_s4 = sld [smem:[#allocation9 + $0x4a]] }
 0x163   : > { %v823_v34 = vadd.f32 %v822_v31, %v812_v30  ;;  %v857_v36 = vsel %vm856_vm8, %v854_v28, %v855_v33  ;;  %v868_v43 = vsel %vm867_vm9, %v865_v29, %v866_v41  ;;  %vm942_vm11 = vcmp.lt.s32.totalorder %v940_v17, 16 }
 0x164   : > { %v876_v39 = vpop.permute.xlu0 %875  ;;  %v886_v40 = vpop.permute.xlu1 %885  ;;  %v859_v46 = vsel %vm2683_vm4, %v857_v36, 0.0  ;;  %v870_v63 = vsel %vm2683_vm4, %v868_v43, 0.0  ;;  %v927_v41 = vstv %s2744_s15  ;;  %vm2774_vm14 = vmand %vm941_vm10, %vm942_vm11  ;;  %s2826_s15 = sld [smem:[#allocation9 + $0x51]]  ;;  %vm1121_vm10 = vcmask 113664  }
 0x165   : > { %v834_v42 = vadd.f32 %v833_v1, %v823_v34  ;;  %v877_v44 = vrot.slane %v876_v39, 1  ;;  %v887_v47 = vrot.slane %v886_v40, 1  ;;  %v861_v54 = vmul.f32 %v860_v45, %v859_v46 }
 0x166   : > { %v872_v4 = vmul.f32 %v871_v50, %v870_v63  ;;  %vm1132_vm11 = vcmask 1031168  }
 0x167   : > { %v840_v48 = vadd.f32 %v839_v35, %v834_v42  ;;  %v878_v8 = vsel %vm806_vm3, %v876_v39, %v877_v44  ;;  %v888_v55 = vsel %vm817_vm5, %v886_v40, %v887_v47  ;;  %v937_v42 = vstv %s2750_s18  ;;  %s2836_s18 = sld [smem:[#allocation9 + $0x58]] }
 0x168   : > { %v896_v51 = vpop.permute.xlu0 %895  ;;  %v912_v52 = vpop.permute.xlu1 %911  ;;  %v880_v60 = vsel %vm2683_vm4, %v878_v8, 0.0  ;;  %v890_v9 = vsel %vm2683_vm4, %v888_v55, 0.0  ;;  %vm1003_vm3 = vcmask 777216  }
 0x169   : > { %v851_v53 = vadd.f32 %v850_v49, %v840_v48  ;;  %v897_v57 = vrot.slane %v896_v51, 1  ;;  %v913_v6 = vrot.slane %v912_v52, 1  ;;  %v882_v12 = vmul.f32 %v881_v58, %v880_v60 }
 0x16a   : > { %v892_v19 = vmul.f32 %v891_v7, %v890_v9  ;;  %v952_v48 = vstv %s2760_s23  ;;  %v974_v60 = vstv %s2771_s24  ;;  %s2855_s23 = sld [smem:[#allocation9 + $0xc]]  ;;  %s2873_s24 = sld [smem:[#allocation9 + $0x1a]] }
 0x16b   : > { %v862_v61 = vadd.f32 %v861_v54, %v851_v53  ;;  %v898_v5 = vsel %vm828_vm6, %v896_v51, %v897_v57  ;;  %v914_v20 = vsel %vm845_vm7, %v912_v52, %v913_v6  ;;  %v963_v53 = vstv %s2765_s7  ;;  %s2861_s7 = sld [smem:[#allocation9 + $0x13]] }
 0x16c   : > { %v922_v10 = vpop.permute.xlu0 %921  ;;  %v932_v11 = vpop.permute.xlu1 %931  ;;  %v900_v15 = vsel %vm2683_vm4, %v898_v5, 0.0  ;;  %v916_v30 = vsel %vm2683_vm4, %v914_v20, 0.0  ;;  %vm1099_vm7 = vcmask 375808  }
 0x16d   : > { %v873_v2 = vadd.f32 %v872_v4, %v862_v61  ;;  %v923_v25 = vrot.slane %v922_v10, 1  ;;  %v933_v21 = vrot.slane %v932_v11, 1  ;;  %v902_v27 = vmul.f32 %v901_v14, %v900_v15 }
 0x16e   : > { %v918_v37 = vmul.f32 %v917_v23, %v916_v30  ;;  %v996_v14 = vstv %s2788_s28  ;;  %v1007_v23 = vstv %s2794_s6  ;;  %s2885_s28 = sld [smem:[#allocation9 + $0x28]]  ;;  %s2891_s6 = sld [smem:[#allocation9 + $0x2f]] }
 0x16f   : > { %v883_v18 = vadd.f32 %v882_v12, %v873_v2  ;;  %v924_v28 = vsel %vm856_vm8, %v922_v10, %v923_v25  ;;  %v934_v32 = vsel %vm867_vm9, %v932_v11, %v933_v21  ;;  %v985_v10 = vstv %s2782_s11  ;;  %s2879_s11 = sld [smem:[#allocation9 + $0x21]] }
 0x170   : > { %v946_v62 = vpop.permute.xlu0 %945  ;;  %v957_v24 = vpop.permute.xlu1 %956  ;;  %v926_v34 = vsel %vm2683_vm4, %v924_v28, 0.0  ;;  %v936_v43 = vsel %vm2683_vm4, %v934_v32, 0.0  ;;  %vm1014_vm4 = vcmask 646144   ;;  %vm1110_vm8 = vcmask 244736  }
 0x171   : > { %v893_v26 = vadd.f32 %v892_v19, %v883_v18  ;;  %v947_v29 = vrot.slane %v946_v62, 1  ;;  %v958_v33 = vrot.slane %v957_v24, 1  ;;  %v928_v45 = vmul.f32 %v927_v41, %v926_v34 }
 0x172   : > { %v938_v63 = vmul.f32 %v937_v42, %v936_v43  ;;  %v1038_v43 = vstv %s2812_s12  ;;  %s2909_s12 = sld [smem:[#allocation9 + $0x44]] }
 0x173   : > { %v903_v31 = vadd.f32 %v902_v27, %v893_v26  ;;  %v949_v39 = vsel %vm948_vm12, %v946_v62, %v947_v29  ;;  %v960_v46 = vsel %vm959_vm13, %v957_v24, %v958_v33  ;;  %v1018_v29 = vstv %s2800_s5  ;;  %s2897_s5 = sld [smem:[#allocation9 + $0x36]] }
 0x174   : > { %v968_v35 = vpop.permute.xlu0 %967  ;;  %v979_v1 = vpop.permute.xlu1 %978  ;;  %v951_v49 = vsel %vm2774_vm14, %v949_v39, 0.0  ;;  %v962_v54 = vsel %vm2774_vm14, %v960_v46, 0.0 }
 0x175   : > { %v909_v36 = vadd.f32 %v908_v22, %v903_v31  ;;  %v969_v40 = vrot.slane %v968_v35, 1  ;;  %v980_v47 = vrot.slane %v979_v1, 1  ;;  %v953_v56 = vmul.f32 %v952_v48, %v951_v49 }
 0x176   : > { %v964_v7 = vmul.f32 %v963_v53, %v962_v54 }
 0x177   : > { %v919_v44 = vadd.f32 %v918_v37, %v909_v36  ;;  %v971_v51 = vsel %vm970_vm15, %v968_v35, %v969_v40  ;;  %v982_v57 = vsel %vm981_vm1, %v979_v1, %v980_v47  ;;  %v1028_v1 = vstv %s2806_s1  ;;  %s2903_s1 = sld [smem:[#allocation9 + $0x3d]] }
 0x178   : > { %v990_v8 = vpop.permute.xlu0 %989  ;;  %v1001_v3 = vpop.permute.xlu1 %1000  ;;  %v973_v61 = vsel %vm2774_vm14, %v971_v51, 0.0  ;;  %v984_v11 = vsel %vm2774_vm14, %v982_v57, 0.0  ;;  %v1068_v57 = vstv %s2826_s15  ;;  %s2927_s15 = sld [smem:[#allocation9 + $0x59]] }
 0x179   : > { %v929_v50 = vadd.f32 %v928_v45, %v919_v44  ;;  %v991_v52 = vrot.slane %v990_v8, 1  ;;  %v1002_v58 = vrot.slane %v1001_v3, 1  ;;  %v975_v12 = vmul.f32 %v974_v60, %v973_v61 }
 0x17a   : > { %v986_v20 = vmul.f32 %v985_v10, %v984_v11 }
 0x17b   : > { %v939_v55 = vadd.f32 %v938_v63, %v929_v50  ;;  %v993_v9 = vsel %vm992_vm2, %v990_v8, %v991_v52  ;;  %v1004_v13 = vsel %vm1003_vm3, %v1001_v3, %v1002_v58  ;;  %v1048_v3 = vstv %s2818_s27  ;;  %s2915_s27 = sld [smem:[#allocation9 + $0x4b]] }
 0x17c   : > { %v1012_v4 = vpop.permute.xlu0 %1011  ;;  %v1023_v5 = vpop.permute.xlu1 %1022  ;;  %v995_v15 = vsel %vm2774_vm14, %v993_v9, 0.0  ;;  %v1006_v62 = vsel %vm2774_vm14, %v1004_v13, 0.0  ;;  %v1091_v63 = vadd.s32 2, %v2755_v16 }
 0x17d   : > { %v954_v6 = vadd.f32 %v953_v56, %v939_v55  ;;  %v1013_v0 = vrot.slane %v1012_v4, 1  ;;  %v1024_v25 = vrot.slane %v1023_v5, 1  ;;  %v997_v26 = vmul.f32 %v996_v14, %v995_v15 }
 0x17e   : > { %v1008_v41 = vmul.f32 %v1007_v23, %v1006_v62  ;;  %v1058_v55 = vstv %s2824_s4  ;;  %vm1092_vm5 = vcmp.ge.s32.totalorder %v1091_v63, 0  ;;  %vm1093_vm6 = vcmp.lt.s32.totalorder %v1091_v63, 16  ;;  %s2917_s4 = sld [smem:[#allocation9 + $0x52]] }
 0x17f   : > { %v965_v2 = vadd.f32 %v964_v7, %v954_v6  ;;  %v1015_v21 = vsel %vm1014_vm4, %v1012_v4, %v1013_v0  ;;  %v1025_v27 = vsel %vm948_vm12, %v1023_v5, %v1024_v25  ;;  %vm2865_vm9 = vmand %vm1092_vm5, %vm1093_vm6  ;;  %vm1143_vm12 = vcmask 900096  }
 0x180   : > { %v1033_v17 = vpop.permute.xlu0 %1032  ;;  %v1043_v18 = vpop.permute.xlu1 %1042  ;;  %v1017_v30 = vsel %vm2774_vm14, %v1015_v21, 0.0  ;;  %v1027_v36 = vsel %vm2774_vm14, %v1025_v27, 0.0  ;;  %v1147_v63 = vstv %s2879_s11  ;;  %vm1272_vm5 = vcmask 105472   ;;  %s2976_s11 = sld [smem:[#allocation9 + $0x29]] }
 0x181   : > { %v976_v19 = vadd.f32 %v975_v12, %v965_v2  ;;  %v1034_v22 = vrot.slane %v1033_v17, 1  ;;  %v1044_v28 = vrot.slane %v1043_v18, 1  ;;  %v1019_v39 = vmul.f32 %v1018_v29, %v1017_v30 }
 0x182   : > { %v1029_v48 = vmul.f32 %v1028_v1, %v1027_v36  ;;  %v1078_v2 = vstv %s2836_s18  ;;  %s2933_s18 = sld [smem:[#allocation9 + $0x60]]  ;;  %vm1283_vm6 = vcmask 1022976  }
 0x183   : > { %v987_v24 = vadd.f32 %v986_v20, %v976_v19  ;;  %v1035_v34 = vsel %vm959_vm13, %v1033_v17, %v1034_v22  ;;  %v1045_v40 = vsel %vm970_vm15, %v1043_v18, %v1044_v28  ;;  %v1088_v20 = vstv %s2842_s26  ;;  %s2941_s26 = sld [smem:[#allocation9 + $0x6]] }
 0x184   : > { %v1053_v31 = vpop.permute.xlu0 %1052  ;;  %v1063_v32 = vpop.permute.xlu1 %1062  ;;  %v1037_v44 = vsel %vm2774_vm14, %v1035_v34, 0.0  ;;  %v1047_v50 = vsel %vm2774_vm14, %v1045_v40, 0.0  ;;  %vm1154_vm13 = vcmask 769024  }
 0x185   : > { %v998_v33 = vadd.f32 %v997_v26, %v987_v24  ;;  %v1054_v35 = vrot.slane %v1053_v31, 1  ;;  %v1064_v42 = vrot.slane %v1063_v32, 1  ;;  %v1039_v52 = vmul.f32 %v1038_v43, %v1037_v44 }
 0x186   : > { %v1049_v4 = vmul.f32 %v1048_v3, %v1047_v50  ;;  %v1103_v26 = vstv %s2850_s29  ;;  %s2946_s29 = sld [smem:[#allocation9 + $0xd]] }
 0x187   : > { %v1009_v37 = vadd.f32 %v1008_v41, %v998_v33  ;;  %v1055_v49 = vsel %vm981_vm1, %v1053_v31, %v1054_v35  ;;  %v1065_v53 = vsel %vm992_vm2, %v1063_v32, %v1064_v42  ;;  %v1114_v33 = vstv %s2855_s23  ;;  %s2952_s23 = sld [smem:[#allocation9 + $0x14]] }
 0x188   : > { %v1073_v45 = vpop.permute.xlu0 %1072  ;;  %v1083_v46 = vpop.permute.xlu1 %1082  ;;  %v1057_v56 = vsel %vm2774_vm14, %v1055_v49, 0.0  ;;  %v1067_v7 = vsel %vm2774_vm14, %v1065_v53, 0.0  ;;  %vm1250_vm2 = vcmask 367616  }
 0x189   : > { %v1020_v47 = vadd.f32 %v1019_v39, %v1009_v37  ;;  %v1074_v8 = vrot.slane %v1073_v45, 1  ;;  %v1084_v54 = vrot.slane %v1083_v46, 1  ;;  %v1059_v0 = vmul.f32 %v1058_v55, %v1057_v56 }
 0x18a   : > { %v1069_v15 = vmul.f32 %v1068_v57, %v1067_v7  ;;  %v1125_v37 = vstv %s2861_s7  ;;  %v1169_v7 = vstv %s2891_s6  ;;  %s2964_s7 = sld [smem:[#allocation9 + $0x1b]]  ;;  %s2988_s6 = sld [smem:[#allocation9 + $0x37]] }
 0x18b   : > { %v1030_v51 = vadd.f32 %v1029_v48, %v1020_v47  ;;  %v1075_v5 = vsel %vm1003_vm3, %v1073_v45, %v1074_v8  ;;  %v1085_v10 = vsel %vm1014_vm4, %v1083_v46, %v1084_v54  ;;  %v1136_v47 = vstv %s2873_s24  ;;  %s2970_s24 = sld [smem:[#allocation9 + $0x22]] }
 0x18c   : > { %v1097_v58 = vpop.permute.xlu0 %1096  ;;  %v1108_v60 = vpop.permute.xlu1 %1107  ;;  %v1077_v12 = vsel %vm2774_vm14, %v1075_v5, 0.0  ;;  %v1087_v21 = vsel %vm2774_vm14, %v1085_v10, 0.0  ;;  %vm1165_vm14 = vcmask 637952   ;;  %vm1261_vm3 = vcmask 236544  }
 0x18d   : > { %v1040_v61 = vadd.f32 %v1039_v52, %v1030_v51  ;;  %v1098_v6 = vrot.slane %v1097_v58, 1  ;;  %v1109_v11 = vrot.slane %v1108_v60, 1  ;;  %v1079_v23 = vmul.f32 %v1078_v2, %v1077_v12 }
 0x18e   : > { %v1089_v30 = vmul.f32 %v1088_v20, %v1087_v21  ;;  %v1189_v21 = vstv %s2903_s1  ;;  %s3000_s1 = sld [smem:[#allocation9 + $0x45]] }
 0x18f   : > { %v1050_v9 = vadd.f32 %v1049_v4, %v1040_v61  ;;  %v1100_v18 = vsel %vm1099_vm7, %v1097_v58, %v1098_v6  ;;  %v1111_v62 = vsel %vm1110_vm8, %v1108_v60, %v1109_v11  ;;  %v1158_v58 = vstv %s2885_s28  ;;  %s2982_s28 = sld [smem:[#allocation9 + $0x30]] }
 0x190   : > { %v1119_v13 = vpop.permute.xlu0 %1118  ;;  %v1130_v25 = vpop.permute.xlu1 %1129  ;;  %v1102_v27 = vsel %vm2865_vm9, %v1100_v18, 0.0  ;;  %v1113_v41 = vsel %vm2865_vm9, %v1111_v62, 0.0 }
 0x191   : > { %v1060_v14 = vadd.f32 %v1059_v0, %v1050_v9  ;;  %v1120_v19 = vrot.slane %v1119_v13, 1  ;;  %v1131_v24 = vrot.slane %v1130_v25, 1  ;;  %v1104_v35 = vmul.f32 %v1103_v26, %v1102_v27 }
 0x192   : > { %v1115_v44 = vmul.f32 %v1114_v33, %v1113_v41 }
 0x193   : > { %v1070_v22 = vadd.f32 %v1069_v15, %v1060_v14  ;;  %v1122_v31 = vsel %vm1121_vm10, %v1119_v13, %v1120_v19  ;;  %v1133_v1 = vsel %vm1132_vm11, %v1130_v25, %v1131_v24  ;;  %v1179_v25 = vstv %s2897_s5  ;;  %s2994_s5 = sld [smem:[#allocation9 + $0x3e]] }
 0x194   : > { %v1141_v28 = vpop.permute.xlu0 %1140  ;;  %v1152_v38 = vpop.permute.xlu1 %1151  ;;  %v1124_v39 = vsel %vm2865_vm9, %v1122_v31, 0.0  ;;  %v1135_v48 = vsel %vm2865_vm9, %v1133_v1, 0.0  ;;  %v1219_v1 = vstv %s2917_s4  ;;  %s3018_s4 = sld [smem:[#allocation9 + $0x5a]] }
 0x195   : > { %v1080_v29 = vadd.f32 %v1079_v23, %v1070_v22  ;;  %v1142_v32 = vrot.slane %v1141_v28, 1  ;;  %v1153_v36 = vrot.slane %v1152_v38, 1  ;;  %v1126_v8 = vmul.f32 %v1125_v37, %v1124_v39 }
 0x196   : > { %v1137_v55 = vmul.f32 %v1136_v47, %v1135_v48  ;;  %v1229_v48 = vstv %s2927_s15  ;;  %s1626_s15 = sld [smem:[#allocation9 + $0x61]] }
 0x197   : > { %v1090_v34 = vadd.f32 %v1089_v30, %v1080_v29  ;;  %v1144_v45 = vsel %vm1143_vm12, %v1141_v28, %v1142_v32  ;;  %v1155_v3 = vsel %vm1154_vm13, %v1152_v38, %v1153_v36  ;;  %v1199_v38 = vstv %s2909_s12  ;;  %s3006_s12 = sld [smem:[#allocation9 + $0x4c]] }
 0x198   : > { %v1163_v40 = vpop.permute.xlu0 %1162  ;;  %v1174_v42 = vpop.permute.xlu1 %1173  ;;  %v1146_v51 = vsel %vm2865_vm9, %v1144_v45, 0.0  ;;  %v1157_v60 = vsel %vm2865_vm9, %v1155_v3, 0.0  ;;  %v1242_v30 = vadd.s32 3, %v2755_v16 }
 0x199   : > { %v1105_v43 = vadd.f32 %v1104_v35, %v1090_v34  ;;  %v1164_v46 = vrot.slane %v1163_v40, 1  ;;  %v1175_v50 = vrot.slane %v1174_v42, 1  ;;  %v1148_v4 = vmul.f32 %v1147_v63, %v1146_v51 }
 0x19a   : > { %v1159_v2 = vmul.f32 %v1158_v58, %v1157_v60  ;;  %v1209_v34 = vstv %s2915_s27  ;;  %vm1243_vm15 = vcmp.ge.s32.totalorder %v1242_v30, 0  ;;  %vm1244_vm1 = vcmp.lt.s32.totalorder %v1242_v30, 16  ;;  %s3012_s27 = sld [smem:[#allocation9 + $0x53]] }
 0x19b   : > { %v1116_v49 = vadd.f32 %v1115_v44, %v1105_v43  ;;  %v1166_v56 = vsel %vm1165_vm14, %v1163_v40, %v1164_v46  ;;  %v1176_v5 = vsel %vm1099_vm7, %v1174_v42, %v1175_v50  ;;  %vm2956_vm4 = vmand %vm1243_vm15, %vm1244_vm1  ;;  %vm1294_vm7 = vcmask 891904  }
 0x19c   : > { %v1184_v52 = vpop.permute.xlu0 %1183  ;;  %v1194_v53 = vpop.permute.xlu1 %1193  ;;  %v1168_v9 = vsel %vm2865_vm9, %v1166_v56, 0.0  ;;  %v1178_v14 = vsel %vm2865_vm9, %v1176_v5, 0.0 }
 0x19d   : > { %v1127_v54 = vadd.f32 %v1126_v8, %v1116_v49  ;;  %v1185_v57 = vrot.slane %v1184_v52, 1  ;;  %v1195_v6 = vrot.slane %v1194_v53, 1  ;;  %v1170_v18 = vmul.f32 %v1169_v7, %v1168_v9 }
 0x19e   : > { %v1180_v26 = vmul.f32 %v1179_v25, %v1178_v14  ;;  %v1276_v14 = vstv %s2952_s23 }
 0x19f   : > { %v1138_v61 = vadd.f32 %v1137_v55, %v1127_v54  ;;  %v1186_v12 = vsel %vm1110_vm8, %v1184_v52, %v1185_v57  ;;  %v1196_v19 = vsel %vm1121_vm10, %v1194_v53, %v1195_v6  ;;  %v1239_v54 = vstv %s2933_s18 }
 0x1a0   : > { %v1204_v0 = vpop.permute.xlu0 %1203  ;;  %v1214_v10 = vpop.permute.xlu1 %1213  ;;  %v1188_v22 = vsel %vm2865_vm9, %v1186_v12, 0.0  ;;  %v1198_v29 = vsel %vm2865_vm9, %v1196_v19, 0.0  ;;  %vm1305_vm8 = vcmask 760832  }
 0x1a1   : > { %v1149_v11 = vadd.f32 %v1148_v4, %v1138_v61  ;;  %v1205_v13 = vrot.slane %v1204_v0, 1  ;;  %v1215_v20 = vrot.slane %v1214_v10, 1  ;;  %v1190_v32 = vmul.f32 %v1189_v21, %v1188_v22 }
 0x1a2   : > { %v1200_v40 = vmul.f32 %v1199_v38, %v1198_v29  ;;  %v1254_v61 = vstv %s2941_s26  ;;  %v1298_v29 = vstv %s2970_s24 }
 0x1a3   : > { %v1160_v15 = vadd.f32 %v1159_v2, %v1149_v11  ;;  %v1206_v27 = vsel %vm1132_vm11, %v1204_v0, %v1205_v13  ;;  %v1216_v33 = vsel %vm1143_vm12, %v1214_v10, %v1215_v20  ;;  %v1265_v10 = vstv %s2946_s29 }
 0x1a4   : > { %v1224_v23 = vpop.permute.xlu0 %1223  ;;  %v1234_v62 = vpop.permute.xlu1 %1233  ;;  %v1208_v35 = vsel %vm2865_vm9, %v1206_v27, 0.0  ;;  %v1218_v43 = vsel %vm2865_vm9, %v1216_v33, 0.0 }
 0x1a5   : > { %v1171_v24 = vadd.f32 %v1170_v18, %v1160_v15  ;;  %v1225_v28 = vrot.slane %v1224_v23, 1  ;;  %v1235_v41 = vrot.slane %v1234_v62, 1  ;;  %v1210_v45 = vmul.f32 %v1209_v34, %v1208_v35 }
 0x1a6   : > { %v1220_v63 = vmul.f32 %v1219_v1, %v1218_v43  ;;  %v1309_v1 = vstv %s2976_s11 }
 0x1a7   : > { %v1181_v31 = vadd.f32 %v1180_v26, %v1171_v24  ;;  %v1226_v42 = vsel %vm1154_vm13, %v1224_v23, %v1225_v28  ;;  %v1236_v46 = vsel %vm1165_vm14, %v1234_v62, %v1235_v41  ;;  %v1287_v62 = vstv %s2964_s7 }
 0x1a8   : > { %v1248_v36 = vpop.permute.xlu0 %1247  ;;  %v1259_v37 = vpop.permute.xlu1 %1258  ;;  %v1228_v49 = vsel %vm2865_vm9, %v1226_v42, 0.0  ;;  %v1238_v55 = vsel %vm2865_vm9, %v1236_v46, 0.0  ;;  %vm1316_vm9 = vcmask 629760  }
 0x1a9   : > { %v1191_v39 = vadd.f32 %v1190_v32, %v1181_v31  ;;  %v1249_v16 = vrot.slane %v1248_v36, 1  ;;  %v1260_v47 = vrot.slane %v1259_v37, 1  ;;  %v1230_v57 = vmul.f32 %v1229_v48, %v1228_v49 }
 0x1aa   : > { %v1240_v7 = vmul.f32 %v1239_v54, %v1238_v55  ;;  %v1340_v54 = vstv %s2994_s5 }
 0x1ab   : > { %v1201_v44 = vadd.f32 %v1200_v40, %v1191_v39  ;;  %v1251_v52 = vsel %vm1250_vm2, %v1248_v36, %v1249_v16  ;;  %v1262_v58 = vsel %vm1261_vm3, %v1259_v37, %v1260_v47  ;;  %v1320_v16 = vstv %s2982_s28 }
 0x1ac   : > { %v1270_v8 = vpop.permute.xlu0 %1269  ;;  %v1281_v3 = vpop.permute.xlu1 %1280  ;;  %v1253_v4 = vsel %vm2956_vm4, %v1251_v52, 0.0  ;;  %v1264_v11 = vsel %vm2956_vm4, %v1262_v58, 0.0 }
 0x1ad   : > { %v1211_v50 = vadd.f32 %v1210_v45, %v1201_v44  ;;  %v1271_v53 = vrot.slane %v1270_v8, 1  ;;  %v1282_v60 = vrot.slane %v1281_v3, 1  ;;  %v1255_v12 = vmul.f32 %v1254_v61, %v1253_v4 }
 0x1ae   : > { %v1266_v21 = vmul.f32 %v1265_v10, %v1264_v11  ;;  %v1360_v10 = vstv %s3006_s12 }
 0x1af   : > { %v1221_v56 = vadd.f32 %v1220_v63, %v1211_v50  ;;  %v1273_v9 = vsel %vm1272_vm5, %v1270_v8, %v1271_v53  ;;  %v1284_v13 = vsel %vm1283_vm6, %v1281_v3, %v1282_v60  ;;  %v1330_v8 = vstv %s2988_s6 }
 0x1b0   : > { %v1292_v5 = vpop.permute.xlu0 %1291  ;;  %v1303_v17 = vpop.permute.xlu1 %1302  ;;  %v1275_v15 = vsel %vm2956_vm4, %v1273_v9, 0.0  ;;  %v1286_v24 = vsel %vm2956_vm4, %v1284_v13, 0.0 }
 0x1b1   : > { %v1231_v6 = vadd.f32 %v1230_v57, %v1221_v56  ;;  %v1293_v0 = vrot.slane %v1292_v5, 1  ;;  %v1304_v25 = vrot.slane %v1303_v17, 1  ;;  %v1277_v27 = vmul.f32 %v1276_v14, %v1275_v15 }
 0x1b2   : > { %v1288_v41 = vmul.f32 %v1287_v62, %v1286_v24  ;;  %v1390_v62 = vstv %s1626_s15 }
 0x1b3   : > { %v1241_v2 = vadd.f32 %v1240_v7, %v1231_v6  ;;  %v1295_v22 = vsel %vm1294_vm7, %v1292_v5, %v1293_v0  ;;  %v1306_v28 = vsel %vm1305_vm8, %v1303_v17, %v1304_v25  ;;  %v1350_v5 = vstv %s3000_s1 }
 0x1b4   : > { %v1314_v18 = vpop.permute.xlu0 %1313  ;;  %v1325_v19 = vpop.permute.xlu1 %1324  ;;  %v1297_v30 = vsel %vm2956_vm4, %v1295_v22, 0.0  ;;  %v1308_v36 = vsel %vm2956_vm4, %v1306_v28, 0.0  ;;  %v1370_v25 = vstv %s3012_s27 }
 0x1b5   : > { %v1256_v20 = vadd.f32 %v1255_v12, %v1241_v2  ;;  %v1315_v23 = vrot.slane %v1314_v18, 1  ;;  %v1326_v38 = vrot.slane %v1325_v19, 1  ;;  %v1299_v39 = vmul.f32 %v1298_v29, %v1297_v30 }
 0x1b6   : > { %v1310_v47 = vmul.f32 %v1309_v1, %v1308_v36 }
 0x1b7   : > { %v1267_v26 = vadd.f32 %v1266_v21, %v1256_v20  ;;  %v1317_v34 = vsel %vm1316_vm9, %v1314_v18, %v1315_v23  ;;  %v1327_v40 = vsel %vm1250_vm2, %v1325_v19, %v1326_v38  ;;  %v1380_v20 = vstv %s3018_s4 }
 0x1b8   : > { %v1335_v31 = vpop.permute.xlu0 %1334  ;;  %v1345_v32 = vpop.permute.xlu1 %1344  ;;  %v1319_v43 = vsel %vm2956_vm4, %v1317_v34, 0.0  ;;  %v1329_v3 = vsel %vm2956_vm4, %v1327_v40, 0.0 }
 0x1b9   : > { %v1278_v33 = vadd.f32 %v1277_v27, %v1267_v26  ;;  %v1336_v35 = vrot.slane %v1335_v31, 1  ;;  %v1346_v42 = vrot.slane %v1345_v32, 1  ;;  %v1321_v63 = vmul.f32 %v1320_v16, %v1319_v43 }
 0x1ba   : > { %v1331_v60 = vmul.f32 %v1330_v8, %v1329_v3 }
 0x1bb   : > { %v1289_v37 = vadd.f32 %v1288_v41, %v1278_v33  ;;  %v1337_v48 = vsel %vm1261_vm3, %v1335_v31, %v1336_v35  ;;  %v1347_v52 = vsel %vm1272_vm5, %v1345_v32, %v1346_v42 }
 0x1bc   : > { %v1355_v44 = vpop.permute.xlu0 %1354  ;;  %v1365_v45 = vpop.permute.xlu1 %1364  ;;  %v1339_v55 = vsel %vm2956_vm4, %v1337_v48, 0.0  ;;  %v1349_v17 = vsel %vm2956_vm4, %v1347_v52, 0.0 }
 0x1bd   : > { %v1300_v46 = vadd.f32 %v1299_v39, %v1289_v37  ;;  %v1356_v49 = vrot.slane %v1355_v44, 1  ;;  %v1366_v53 = vrot.slane %v1365_v45, 1  ;;  %v1341_v7 = vmul.f32 %v1340_v54, %v1339_v55 }
 0x1be   : > { %v1351_v12 = vmul.f32 %v1350_v5, %v1349_v17 }
 0x1bf   : > { %v1311_v50 = vadd.f32 %v1310_v47, %v1300_v46  ;;  %v1357_v61 = vsel %vm1283_vm6, %v1355_v44, %v1356_v49  ;;  %v1367_v9 = vsel %vm1294_vm7, %v1365_v45, %v1366_v53 }
 0x1c0   : > { %v1375_v56 = vpop.permute.xlu0 %1374  ;;  %v1385_v57 = vpop.permute.xlu1 %1384  ;;  %v1359_v11 = vsel %vm2956_vm4, %v1357_v61, 0.0  ;;  %v1369_v14 = vsel %vm2956_vm4, %v1367_v9, 0.0 }
 0x1c1   : > { %v1322_v58 = vadd.f32 %v1321_v63, %v1311_v50  ;;  %v1376_v4 = vrot.slane %v1375_v56, 1  ;;  %v1386_v0 = vrot.slane %v1385_v57, 1  ;;  %v1361_v18 = vmul.f32 %v1360_v10, %v1359_v11 }
 0x1c2   : > { %v1371_v23 = vmul.f32 %v1370_v25, %v1369_v14 }
 0x1c3   : > { %v1332_v6 = vadd.f32 %v1331_v60, %v1322_v58  ;;  %v1377_v13 = vsel %vm1305_vm8, %v1375_v56, %v1376_v4  ;;  %v1387_v19 = vsel %vm1316_vm9, %v1385_v57, %v1386_v0 }
 0x1c4   : > { %v1379_v21 = vsel %vm2956_vm4, %v1377_v13, 0.0  ;;  %v1389_v24 = vsel %vm2956_vm4, %v1387_v19, 0.0 }
 0x1c5   : > { %v1342_v2 = vadd.f32 %v1341_v7, %v1332_v6  ;;  %v1381_v27 = vmul.f32 %v1380_v20, %v1379_v21  ;;  %v1391_v38 = vmul.f32 %v1390_v62, %v1389_v24 }
 0x1c7   : > { %v1352_v15 = vadd.f32 %v1351_v12, %v1342_v2 }
 0x1c9   : > { %v1362_v22 = vadd.f32 %v1361_v18, %v1352_v15 }
 0x1cb   : > { %v1372_v26 = vadd.f32 %v1371_v23, %v1362_v22 }
 0x1cd   : > { %v1382_v28 = vadd.f32 %v1381_v27, %v1372_v26 }
 0x1cf   : > { %v1392_v29 = vadd.f32 %v1391_v38, %v1382_v28 }
 0x1d1   : > { %v1627_v30 = vmul.f32 -1.442695, %v1392_v29 }
 0x1d3   : > { %1802 = vpow2.f32 %v1627_v30 }
 0x1dd   : > { %v1803_v31 = vpop.eup %1802 }
 0x1de   : > { %v1396_v32 = vadd.f32 1.0, %v1803_v31 }
 0x1e0   : > { %1804 = vrcp.f32 %v1396_v32 }
 0x1ea   : > { %v1805_v33 = vpop.eup %1804 }
 0x1eb   : > { %1399 = vst.msk [vmem:[%s219_s9] sm:$0x3] %vm2242_vm0, %v1805_v33 }
 0x1ec PF: > { %s1634_s18 = sshll.u32 %s1966_s19, 5  ;;  %s1415_s7 = sshll.u32 %s219_s9, 4  ;;  %s1416_s7 = int_to_ptr.vmem [resolvable:$true] %s1415_s7 }
 0x1ed   : > { %s3046_s23 = scalar_lea.hbm %s3109_s3, %s1634_s18  ;;  %s1401_s24 = scalar_lea.sflag [#allocation7], %s217_s20 }
 0x1ee   : > { %s1852_s11 = scalar_lea.vmem %s1416_s7, 32  ;;  %p3152_p4 = scmp.ne.s32.totalorder %s3124_s30, 0 }
 0x1ef   : > { %p1853_p13 = scmp.ne.s32.totalorder %s1416_s7, %s1852_s11  ;;  %s2036_s28 = smov [#allocation10]  }
 0x1f0   : > { %s1856_s6 = sshll.u32 %s2036_s28, 4  ;;  %s1857_s6 = int_to_ptr.vmem [resolvable:$false] %s1856_s6 }
 0x1f1   : > { %p1854_p6 = pnand %p1853_p13, %p3152_p4  ;;  %s1858_s5 = scalar_lea.vmem %s1857_s6, 64 }
 0x1f2   : > { %p1859_p12 = scmp.lt.s32.totalorder %s1416_s7, %s1857_s6  ;;  %p1860_p0 = scmp.lt.s32.totalorder %s1858_s5, %s1852_s11 }
 0x1f3   : > { %p1855_p10 = pneg %p1854_p6 }
 0x1f4   : > { %p1861_p2 = por %p1860_p0, %p1859_p12 }
 0x1f6   : > { %p1862_p8 = pnand %p1861_p2, %p1855_p10 }
 0x1f8   : > { %1865 = shalt.err (!%p1862_p8)
}
 0x1f9   : > { %s1866_s19 = scalar_lea.hbm %s3046_s23, 32  ;;  %s1870_s9 = scalar_lea.hbm %s3109_s3, 64 }
 0x1fa   : > { %p1867_p9 = scmp.ne.s32.totalorder %s3046_s23, %s1866_s19  ;;  %p1871_p5 = scmp.lt.u32.totalorder %s3046_s23, %s3109_s3 }
 0x1fb   : > { %p1872_p7 = scmp.lt.u32.totalorder %s1870_s9, %s1866_s19  ;;  %p1874_p13 = scmp.lt.u32.totalorder %s1866_s19, %s3046_s23 }
 0x1fc   : > { %p1868_p11 = pnand %p1867_p9, %p3152_p4 }
 0x1fd   : > { %p1873_p3 = por %p1872_p7, %p1871_p5 }
 0x1fe   : > { %p1869_p1 = pneg %p1868_p11 }
 0x1ff   : > { %p1875_p6 = por %p1874_p13, %p1873_p3 }
 0x201   : > { %p1876_p10 = pnand %p1875_p6, %p1869_p1 }
 0x203   : > { %1879 = shalt.err (!%p1876_p10)
}
 0x204   : > { %1641 = dma.vmem_to_hbm [thread:$0]  (%p3152_p4), %s1416_s7, 32, %s3046_s23, %s1401_s24  }
 0x205 PF: > { %s3153_s27 = sld [smem:[#allocation14_spill]]  ;;  %s3154_s4 = sld [smem:[#allocation16_spill]] }
 0x206   : > { %p1658_p12 = scmp.ge.s32.totalorder %s1978_s22, 2 }
 0x20b   : > { %s1427_s15 = sand.u32 1, %s3153_s27   ;;  %p3155_p0 = scmp.ne.s32.totalorder %s3154_s4, 0 }
 0x20c   : > { %s1428_s18 = scalar_lea.sflag [#allocation7], %s1427_s15 }
 0x20d   : > { %p1652_p2 = pnand %p1658_p12, %p3155_p0 }
 0x20f   : > { %1933 = dma.done.wait (!%p1652_p2), %s1428_s18, 32  }
 0x210   : > { %1935 = vsyncadd (!%p1652_p2), %s1428_s18, 4294967264  ;;  %s20_s22 = sadd.s32 1, %s1978_s22   ;;  %s3156_s18 = sld [smem:[#allocation15_spill]] }
 0x211   : > { %p17_p8 = scmp.ge.s32.totalorder %s20_s22, 10   ;;  %s3157_s20 = sld [smem:[#allocation17_spill]] }
 0x212   : > { %s3158_s30 = sld [smem:[#allocation18_spill]]  ;;  %s3159_s12 = smov %s1942_s13 }
 0x213   : > { %s3160_s13 = smov %s1946_s14  ;;  %s3161_s14 = smov %s2188_s25 }
 0x214   : > { %s3162_s15 = smov %s1954_s16  ;;  %s3163_s16 = smov %s1958_s17 }
 0x215   : > { %s3164_s17 = smov %s2193_s10  ;;  %s3165_s19 = smov %s1974_s21 }
 0x216   :  { %19 = sbr.rel (!%p17_p8) target bundleno = 12 (0xc), region = 97 }
 0x218   : > { %s3166_s21 = smov %s3158_s30 }
 0x21d   :  { %1433 = vsyncpa [#allocation6], 1 }
 0x21e   :  { %1435 = vsyncpa [#allocation6 + $0x1], 1 }
 0x21f   :  { %1436 = vsyncpa [#allocation7], 1 }
 0x220   :  { %1438 = vsyncpa [#allocation7 + $0x1], 1 }
 0x221   :  { %1439 = vsyncpa [#allocation8], 1 }
 0x222   :  { %1441 = vsyncpa [#allocation8 + $0x1], 1 }

</bundles_post_ra>
